<compile_context>
chip_gen: v7x
topology: tpu7x:2x2x1
jax: 0.10.0
libtpu: 0.0.40
codegen_flags: <defaults>
</compile_context>

<pallas_src>
import functools

import jax
import jax.numpy as jnp
import numpy as np
from jax import lax
from jax.experimental import pallas as pl
from jax.experimental.pallas import tpu as pltpu

# ----------------------------- model config (small) ------------------------
VOCAB_SIZE = 50
EMBED_DIM = 32
HIDDEN_DIM = 32
NUM_LAYERS = 2
NUM_NUMERICAL = 8
NUM_BOOLEAN = 1
NUM_CLASSES = 2
BIDIRECTIONAL = True
LSTM_OUT_DIM = HIDDEN_DIM * (2 if BIDIRECTIONAL else 1)   # 64
NUM_HID = 64
BOOL_HID = 16
COMBINED_DIM = LSTM_OUT_DIM + NUM_HID + BOOL_HID          # 144
CLS_HID = 128

BATCH = 2
SEQ = 8

VMEM_SPEC = pl.BlockSpec(memory_space=pltpu.MemorySpace.VMEM)


# ----------------------------- fused Pallas kernel ---------------------------
def _fused_kernel(ids_ref, mask_ref, num_ref, bool_ref, emb_ref,
                  wih0f_ref, whh0f_ref, b0f_ref,
                  wih0b_ref, whh0b_ref, b0b_ref,
                  wih1f_ref, whh1f_ref, b1f_ref,
                  wih1b_ref, whh1b_ref, b1b_ref,
                  wa_ref, ba_ref, wn_ref, bn_ref, wb_ref, bb_ref,
                  w1a_ref, w1b_ref, w1c_ref, bc1_ref, w2_ref, bc2_ref,
                  out_ref, y0_ref, *, batch, seq, hid, vocab):
    B, S, H = batch, seq, hid

    def cell(gates, c_prev):
        # one full-width sigmoid over [B, 4H], one tanh on the g slice
        sg = jax.nn.sigmoid(gates)
        i = sg[:, 0:H]
        f = sg[:, H:2 * H]
        o = sg[:, 3 * H:4 * H]
        g = jnp.tanh(gates[:, 2 * H:3 * H])
        c = i * g if c_prev is None else f * c_prev + i * g
        h = o * jnp.tanh(c)
        return h, c

    def run_bilstm(xg_f, xg_b, whh_f, whh_b, emit):
        # forward & backward recurrences interleaved in one fully-unrolled loop
        h_f = c_f = h_b = c_b = None
        for t in range(S):                      # static -> fully unrolled
            tb = S - 1 - t                      # backward direction index
            g_f = xg_f[t * B:(t + 1) * B, :]
            g_b = xg_b[tb * B:(tb + 1) * B, :]
            if h_f is not None:
                g_f = g_f + jnp.dot(h_f, whh_f, preferred_element_type=jnp.float32)
                g_b = g_b + jnp.dot(h_b, whh_b, preferred_element_type=jnp.float32)
            h_f, c_f = cell(g_f, c_f)
            h_b, c_b = cell(g_b, c_b)
            emit(t, tb, h_f, h_b)

    # ---- embedding: in-kernel one-hot x table matmul (time-major [S*B, E]) ----
    ids = ids_ref[...]                                                    # [S*B, 1] int32
    onehot = (lax.broadcasted_iota(jnp.int32, (S * B, vocab), 1) == ids)
    x0 = jnp.dot(onehot.astype(jnp.float32), emb_ref[...],
                 preferred_element_type=jnp.float32)                      # [S*B, E]

    # ---- layer 0: hoisted input projections (whole sequence, both directions) --
    xg0f = jnp.dot(x0, wih0f_ref[...], preferred_element_type=jnp.float32) + b0f_ref[...]
    xg0b = jnp.dot(x0, wih0b_ref[...], preferred_element_type=jnp.float32) + b0b_ref[...]
    whh0f = whh0f_ref[...]
    whh0b = whh0b_ref[...]

    def emit0(t, tb, h_f, h_b):
        y0_ref[t * B:(t + 1) * B, 0:H] = h_f
        y0_ref[tb * B:(tb + 1) * B, H:2 * H] = h_b

    run_bilstm(xg0f, xg0b, whh0f, whh0b, emit0)
    # TODO(synk): inter-layer LSTM dropout is identity in eval mode.

    # ---- layer 1 (reads layer-0 output from VMEM scratch) ----------------------
    y0 = y0_ref[...]                                                      # [S*B, 2H]
    xg1f = jnp.dot(y0, wih1f_ref[...], preferred_element_type=jnp.float32) + b1f_ref[...]
    xg1b = jnp.dot(y0, wih1b_ref[...], preferred_element_type=jnp.float32) + b1b_ref[...]
    whh1f = whh1f_ref[...]
    whh1b = whh1b_ref[...]

    y1_f = [None] * S
    y1_b = [None] * S

    def emit1(t, tb, h_f, h_b):
        y1_f[t] = h_f
        y1_b[tb] = h_b

    run_bilstm(xg1f, xg1b, whh1f, whh1b, emit1)

    # ---- attention over the sequence (per-step; no [B,S,2H] materialization) ---
    wa = wa_ref[...]                                                      # [1, 2H]
    wa_f = wa[:, 0:H]
    wa_b = wa[:, H:2 * H]
    ba = ba_ref[0, 0]
    mask = mask_ref[...]                                                  # [S*B, 1]

    scores = []
    for t in range(S):
        s_t = jnp.tanh(jnp.sum(y1_f[t] * wa_f, axis=-1, keepdims=True)
                       + jnp.sum(y1_b[t] * wa_b, axis=-1, keepdims=True) + ba)
        m_t = mask[t * B:(t + 1) * B, :]
        scores.append(jnp.where(m_t == 0.0, -1e9, s_t))                   # [B, 1]

    m = scores[0]
    for t in range(1, S):
        m = jnp.maximum(m, scores[t])
    exps = [jnp.exp(s - m) for s in scores]
    denom = exps[0]
    for t in range(1, S):
        denom = denom + exps[t]
    inv = 1.0 / denom                                                     # [B, 1]

    ctx_f = exps[0] * y1_f[0]
    ctx_b = exps[0] * y1_b[0]
    for t in range(1, S):
        ctx_f = ctx_f + exps[t] * y1_f[t]
        ctx_b = ctx_b + exps[t] * y1_b[t]
    ctx_f = ctx_f * inv                                                   # [B, H]
    ctx_b = ctx_b * inv                                                   # [B, H]

    # ---- feature branches + classifier (concat expressed as split matmuls) -----
    num_out = jnp.maximum(
        jnp.dot(num_ref[...], wn_ref[...], preferred_element_type=jnp.float32)
        + bn_ref[...], 0.0)                                               # [B, 64]
    bool_out = jnp.maximum(bool_ref[...] * wb_ref[...] + bb_ref[...], 0.0)  # [B, 16]

    # TODO(synk): head dropout layers are identity in eval mode.
    w1a = w1a_ref[...]                                                    # [2H, 128]
    h1 = jnp.maximum(
        jnp.dot(ctx_f, w1a[0:H, :], preferred_element_type=jnp.float32)
        + jnp.dot(ctx_b, w1a[H:2 * H, :], preferred_element_type=jnp.float32)
        + jnp.dot(num_out, w1b_ref[...], preferred_element_type=jnp.float32)
        + jnp.dot(bool_out, w1c_ref[...], preferred_element_type=jnp.float32)
        + bc1_ref[...], 0.0)                                              # [B, 128]
    out_ref[...] = (jnp.dot(h1, w2_ref[...], preferred_element_type=jnp.float32)
                    + bc2_ref[...])                                       # [B, C]


def forward_pallas(params, input_ids, attention_mask, numerical_features, boolean_features):
    B, S = input_ids.shape
    # minimal host glue: time-major flattening of the tiny [B, S] id / mask arrays
    ids_tm = jnp.transpose(input_ids).reshape(S * B, 1).astype(jnp.int32)
    mask_tm = jnp.transpose(attention_mask).reshape(S * B, 1).astype(jnp.float32)

    (w_ih0f, w_hh0f, b0f), (w_ih0b, w_hh0b, b0b) = params["lstm"][0]
    (w_ih1f, w_hh1f, b1f), (w_ih1b, w_hh1b, b1b) = params["lstm"][1]

    args = (ids_tm, mask_tm, numerical_features, boolean_features, params["embedding"],
            w_ih0f, w_hh0f, b0f, w_ih0b, w_hh0b, b0b,
            w_ih1f, w_hh1f, b1f, w_ih1b, w_hh1b, b1b,
            params["wa"], params["ba"], params["wn"], params["bn"],
            params["wb"], params["bb"],
            params["w1a"], params["w1b"], params["w1c"], params["b1"],
            params["w2"], params["b2"])

    kernel = functools.partial(_fused_kernel, batch=B, seq=S,
                               hid=HIDDEN_DIM, vocab=VOCAB_SIZE)
    return pl.pallas_call(
        kernel,
        out_shape=jax.ShapeDtypeStruct((B, NUM_CLASSES), jnp.float32),
        in_specs=[VMEM_SPEC] * len(args),
        out_specs=VMEM_SPEC,
        scratch_shapes=[pltpu.VMEM((S * B, 2 * HIDDEN_DIM), jnp.float32)],
    )(*args)


# ----------------------------- parameter init -------------------------------
def xavier_uniform(key, fan_in, fan_out):
    bound = float(np.sqrt(6.0 / (fan_in + fan_out)))
    return jax.random.uniform(key, (fan_in, fan_out), jnp.float32, -bound, bound)


def init_params(key):
    keys = iter(jax.random.split(key, 64))
    p = {}
    # embedding (padding_idx=0 row zeroed)
    emb = jax.random.normal(next(keys), (VOCAB_SIZE, EMBED_DIM), jnp.float32)
    p["embedding"] = emb.at[0].set(0.0)

    # LSTM weights: per layer, per direction (stored [Din,4H]/[H,4H], bias = b_ih+b_hh)
    k = 1.0 / float(np.sqrt(HIDDEN_DIM))
    p["lstm"] = []
    for layer in range(NUM_LAYERS):
        din = EMBED_DIM if layer == 0 else LSTM_OUT_DIM
        dirs = []
        for _ in range(2 if BIDIRECTIONAL else 1):
            w_ih = jax.random.uniform(next(keys), (din, 4 * HIDDEN_DIM), jnp.float32, -k, k)
            w_hh = jax.random.uniform(next(keys), (HIDDEN_DIM, 4 * HIDDEN_DIM), jnp.float32, -k, k)
            b_ih = jax.random.uniform(next(keys), (1, 4 * HIDDEN_DIM), jnp.float32, -k, k)
            b_hh = jax.random.uniform(next(keys), (1, 4 * HIDDEN_DIM), jnp.float32, -k, k)
            dirs.append((w_ih, w_hh, b_ih + b_hh))
        p["lstm"].append(dirs)

    # attention Linear(lstm_out_dim, 1), bias = 0
    p["wa"] = xavier_uniform(next(keys), LSTM_OUT_DIM, 1).reshape(1, LSTM_OUT_DIM)
    p["ba"] = jnp.zeros((1, 1), jnp.float32)
    # numerical Linear(8, 64), boolean Linear(1, 16)
    p["wn"] = xavier_uniform(next(keys), NUM_NUMERICAL, NUM_HID)
    p["bn"] = jnp.zeros((1, NUM_HID), jnp.float32)
    p["wb"] = xavier_uniform(next(keys), NUM_BOOLEAN, BOOL_HID)
    p["bb"] = jnp.zeros((1, BOOL_HID), jnp.float32)
    # classifier Linear(144, 128) split along the concat axis, Linear(128, 2)
    w1 = xavier_uniform(next(keys), COMBINED_DIM, CLS_HID)
    p["w1a"] = w1[:LSTM_OUT_DIM]
    p["w1b"] = w1[LSTM_OUT_DIM:LSTM_OUT_DIM + NUM_HID]
    p["w1c"] = w1[LSTM_OUT_DIM + NUM_HID:]
    p["b1"] = jnp.zeros((1, CLS_HID), jnp.float32)
    p["w2"] = xavier_uniform(next(keys), CLS_HID, NUM_CLASSES)
    p["b2"] = jnp.zeros((1, NUM_CLASSES), jnp.float32)
    return p


# ----------------------------- pure-JAX reference ---------------------------
def _lstm_ref(x_sbd, w_ih, w_hh, b, hid):
    B = x_sbd.shape[1]
    h0 = jnp.zeros((B, hid), jnp.float32)
    c0 = jnp.zeros((B, hid), jnp.float32)

    def step(carry, x_t):
        h, c = carry
        gates = x_t @ w_ih + h @ w_hh + b
        i = jax.nn.sigmoid(gates[:, :hid])
        f = jax.nn.sigmoid(gates[:, hid:2 * hid])
        g = jnp.tanh(gates[:, 2 * hid:3 * hid])
        o = jax.nn.sigmoid(gates[:, 3 * hid:])
        c = f * c + i * g
        h = o * jnp.tanh(c)
        return (h, c), h

    _, ys = lax.scan(step, (h0, c0), x_sbd)
    return ys


def forward_ref(params, input_ids, attention_mask, numerical_features, boolean_features):
    embedded = params["embedding"][input_ids]
    x_sbd = jnp.transpose(embedded, (1, 0, 2))
    for layer in range(NUM_LAYERS):
        dirs = params["lstm"][layer]
        y_f = _lstm_ref(x_sbd, *dirs[0], HIDDEN_DIM)
        y_b = _lstm_ref(x_sbd[::-1], *dirs[1], HIDDEN_DIM)[::-1]
        x_sbd = jnp.concatenate([y_f, y_b], axis=-1)
    lstm_out = jnp.transpose(x_sbd, (1, 0, 2))                    # [B, S, 2H]

    scores = jnp.tanh(jnp.einsum("bsd,d->bs", lstm_out, params["wa"][0]) + params["ba"][0, 0])
    scores = jnp.where(attention_mask == 0, -1e9, scores)
    attn = jax.nn.softmax(scores, axis=1)
    context = jnp.sum(attn[:, :, None] * lstm_out, axis=1)

    num_out = jax.nn.relu(numerical_features @ params["wn"] + params["bn"])
    bool_out = jax.nn.relu(boolean_features @ params["wb"].reshape(NUM_BOOLEAN, BOOL_HID) + params["bb"])
    h1 = jax.nn.relu(context @ params["w1a"] + num_out @ params["w1b"]
                     + bool_out @ params["w1c"] + params["b1"])
    return h1 @ params["w2"] + params["b2"]


# ----------------------------- main ------------------------------------------
if __name__ == "__main__":
    key = jax.random.PRNGKey(0)
    k_param, k_ids, k_num, k_bool = jax.random.split(key, 4)

    params = init_params(k_param)

    input_ids = jax.random.randint(k_ids, (BATCH, SEQ), 1, VOCAB_SIZE, dtype=jnp.int32)
    # mask out the last 3 tokens of the second example
    attention_mask = jnp.ones((BATCH, SEQ), jnp.int32).at[1, -3:].set(0)
    numerical_features = jax.random.normal(k_num, (BATCH, NUM_NUMERICAL), jnp.float32)
    boolean_features = (jax.random.uniform(k_bool, (BATCH, NUM_BOOLEAN)) > 0.5).astype(jnp.float32)

    forward = jax.jit(forward_pallas)
    logits = forward(params, input_ids, attention_mask,
                     numerical_features, boolean_features)
    logits = jax.block_until_ready(logits)

    ref = forward_ref(params, input_ids, attention_mask,
                      numerical_features, boolean_features)
    np.testing.assert_allclose(np.asarray(logits), np.asarray(ref), rtol=1e-4, atol=1e-4)

    assert logits.shape == (BATCH, NUM_CLASSES)
    print("KERNEL_OK")
</pallas_src>

<mosaic_0001>
module attributes {stable_mosaic.version = 11 : i64} {
  func.func @_fused_kernel(%arg0: memref<16x1xi32, #tpu.memory_space<vmem>>, %arg1: memref<16x1xf32, #tpu.memory_space<vmem>>, %arg2: memref<2x8xf32, #tpu.memory_space<vmem>>, %arg3: memref<2x1xf32, #tpu.memory_space<vmem>>, %arg4: memref<50x32xf32, #tpu.memory_space<vmem>>, %arg5: memref<32x128xf32, #tpu.memory_space<vmem>>, %arg6: memref<32x128xf32, #tpu.memory_space<vmem>>, %arg7: memref<1x128xf32, #tpu.memory_space<vmem>>, %arg8: memref<32x128xf32, #tpu.memory_space<vmem>>, %arg9: memref<32x128xf32, #tpu.memory_space<vmem>>, %arg10: memref<1x128xf32, #tpu.memory_space<vmem>>, %arg11: memref<64x128xf32, #tpu.memory_space<vmem>>, %arg12: memref<32x128xf32, #tpu.memory_space<vmem>>, %arg13: memref<1x128xf32, #tpu.memory_space<vmem>>, %arg14: memref<64x128xf32, #tpu.memory_space<vmem>>, %arg15: memref<32x128xf32, #tpu.memory_space<vmem>>, %arg16: memref<1x128xf32, #tpu.memory_space<vmem>>, %arg17: memref<1x64xf32, #tpu.memory_space<vmem>>, %arg18: memref<1x1xf32, #tpu.memory_space<vmem>>, %arg19: memref<8x64xf32, #tpu.memory_space<vmem>>, %arg20: memref<1x64xf32, #tpu.memory_space<vmem>>, %arg21: memref<1x16xf32, #tpu.memory_space<vmem>>, %arg22: memref<1x16xf32, #tpu.memory_space<vmem>>, %arg23: memref<64x128xf32, #tpu.memory_space<vmem>>, %arg24: memref<64x128xf32, #tpu.memory_space<vmem>>, %arg25: memref<16x128xf32, #tpu.memory_space<vmem>>, %arg26: memref<1x128xf32, #tpu.memory_space<vmem>>, %arg27: memref<128x2xf32, #tpu.memory_space<vmem>>, %arg28: memref<1x2xf32, #tpu.memory_space<vmem>>, %arg29: memref<2x2xf32, #tpu.memory_space<vmem>>, %arg30: memref<16x64xf32, #tpu.memory_space<vmem>>) attributes {dimension_semantics = [], scalar_prefetch = 0 : i64, scratch_operands = 1 : i64, tpu.core_type = #tpu.core_type<tc>} {
    %c0 = arith.constant 0 : index
    %c0_0 = arith.constant 0 : index
    %0 = vector.load %arg0[%c0, %c0_0] : memref<16x1xi32, #tpu.memory_space<vmem>>, vector<16x1xi32>
    %1 = tpu.iota {dimensions = array<i32: 1>} : vector<16x50xi32>
    %2 = vector.broadcast %0 : vector<16x1xi32> to vector<16x50xi32>
    %3 = arith.cmpi eq, %1, %2 : vector<16x50xi32>
    %4 = arith.extui %3 : vector<16x50xi1> to vector<16x50xi32>
    %5 = arith.sitofp %4 : vector<16x50xi32> to vector<16x50xf32>
    %c0_1 = arith.constant 0 : index
    %c0_2 = arith.constant 0 : index
    %6 = vector.load %arg4[%c0_1, %c0_2] : memref<50x32xf32, #tpu.memory_space<vmem>>, vector<50x32xf32>
    %cst = arith.constant dense<0.000000e+00> : vector<16x32xf32>
    %7 = tpu.matmul %5, %6, %cst {dimension_numbers = #tpu.dot_dimension_numbers<[1], [0], [0], [1], [0, 0, 1, 1], [], []>} : vector<16x50xf32>, vector<50x32xf32>, vector<16x32xf32> -> vector<16x32xf32>
    %c0_3 = arith.constant 0 : index
    %c0_4 = arith.constant 0 : index
    %8 = vector.load %arg5[%c0_3, %c0_4] : memref<32x128xf32, #tpu.memory_space<vmem>>, vector<32x128xf32>
    %cst_5 = arith.constant dense<0.000000e+00> : vector<16x128xf32>
    %9 = tpu.matmul %7, %8, %cst_5 {dimension_numbers = #tpu.dot_dimension_numbers<[1], [0], [0], [1], [0, 0, 1, 1], [], []>} : vector<16x32xf32>, vector<32x128xf32>, vector<16x128xf32> -> vector<16x128xf32>
    %c0_6 = arith.constant 0 : index
    %c0_7 = arith.constant 0 : index
    %10 = vector.load %arg7[%c0_6, %c0_7] : memref<1x128xf32, #tpu.memory_space<vmem>>, vector<1x128xf32>
    %11 = vector.broadcast %10 : vector<1x128xf32> to vector<16x128xf32>
    %12 = arith.addf %9, %11 : vector<16x128xf32>
    %c0_8 = arith.constant 0 : index
    %c0_9 = arith.constant 0 : index
    %13 = vector.load %arg8[%c0_8, %c0_9] : memref<32x128xf32, #tpu.memory_space<vmem>>, vector<32x128xf32>
    %cst_10 = arith.constant dense<0.000000e+00> : vector<16x128xf32>
    %14 = tpu.matmul %7, %13, %cst_10 {dimension_numbers = #tpu.dot_dimension_numbers<[1], [0], [0], [1], [0, 0, 1, 1], [], []>} : vector<16x32xf32>, vector<32x128xf32>, vector<16x128xf32> -> vector<16x128xf32>
    %c0_11 = arith.constant 0 : index
    %c0_12 = arith.constant 0 : index
    %15 = vector.load %arg10[%c0_11, %c0_12] : memref<1x128xf32, #tpu.memory_space<vmem>>, vector<1x128xf32>
    %16 = vector.broadcast %15 : vector<1x128xf32> to vector<16x128xf32>
    %17 = arith.addf %14, %16 : vector<16x128xf32>
    %c0_13 = arith.constant 0 : index
    %c0_14 = arith.constant 0 : index
    %18 = vector.load %arg6[%c0_13, %c0_14] : memref<32x128xf32, #tpu.memory_space<vmem>>, vector<32x128xf32>
    %c0_15 = arith.constant 0 : index
    %c0_16 = arith.constant 0 : index
    %19 = vector.load %arg9[%c0_15, %c0_16] : memref<32x128xf32, #tpu.memory_space<vmem>>, vector<32x128xf32>
    %20 = vector.extract_strided_slice %12 {offsets = [0, 0], sizes = [2, 128], strides = [1, 1]} : vector<16x128xf32> to vector<2x128xf32>
    %21 = vector.extract_strided_slice %17 {offsets = [14, 0], sizes = [2, 128], strides = [1, 1]} : vector<16x128xf32> to vector<2x128xf32>
    %22 = arith.negf %20 : vector<2x128xf32>
    %23 = math.exp %22 : vector<2x128xf32>
    %cst_17 = arith.constant 1.000000e+00 : f32
    %24 = vector.broadcast %cst_17 : f32 to vector<2x128xf32>
    %25 = arith.addf %24, %23 : vector<2x128xf32>
    %26 = arith.divf %24, %25 : vector<2x128xf32>
    %27 = vector.extract_strided_slice %26 {offsets = [0, 0], sizes = [2, 32], strides = [1, 1]} : vector<2x128xf32> to vector<2x32xf32>
    %28 = vector.extract_strided_slice %26 {offsets = [0, 96], sizes = [2, 32], strides = [1, 1]} : vector<2x128xf32> to vector<2x32xf32>
    %29 = vector.extract_strided_slice %20 {offsets = [0, 64], sizes = [2, 32], strides = [1, 1]} : vector<2x128xf32> to vector<2x32xf32>
    %30 = math.tanh %29 : vector<2x32xf32>
    %31 = arith.mulf %27, %30 : vector<2x32xf32>
    %32 = math.tanh %31 : vector<2x32xf32>
    %33 = arith.mulf %28, %32 : vector<2x32xf32>
    %34 = arith.negf %21 : vector<2x128xf32>
    %35 = math.exp %34 : vector<2x128xf32>
    %cst_18 = arith.constant 1.000000e+00 : f32
    %36 = vector.broadcast %cst_18 : f32 to vector<2x128xf32>
    %37 = arith.addf %36, %35 : vector<2x128xf32>
    %38 = arith.divf %36, %37 : vector<2x128xf32>
    %39 = vector.extract_strided_slice %38 {offsets = [0, 0], sizes = [2, 32], strides = [1, 1]} : vector<2x128xf32> to vector<2x32xf32>
    %40 = vector.extract_strided_slice %38 {offsets = [0, 96], sizes = [2, 32], strides = [1, 1]} : vector<2x128xf32> to vector<2x32xf32>
    %41 = vector.extract_strided_slice %21 {offsets = [0, 64], sizes = [2, 32], strides = [1, 1]} : vector<2x128xf32> to vector<2x32xf32>
    %42 = math.tanh %41 : vector<2x32xf32>
    %43 = arith.mulf %39, %42 : vector<2x32xf32>
    %44 = math.tanh %43 : vector<2x32xf32>
    %45 = arith.mulf %40, %44 : vector<2x32xf32>
    %c0_19 = arith.constant 0 : index
    %c0_20 = arith.constant 0 : index
    %46 = vector.load %arg30[%c0_19, %c0_20] : memref<16x64xf32, #tpu.memory_space<vmem>>, vector<2x32xf32>
    tpu.vector_store %arg30[%c0_19, %c0_20], %33 {strides = array<i32>} : memref<16x64xf32, #tpu.memory_space<vmem>>, vector<2x32xf32>,
    %c14 = arith.constant 14 : index
    %c32 = arith.constant 32 : index
    %47 = vector.load %arg30[%c14, %c32] : memref<16x64xf32, #tpu.memory_space<vmem>>, vector<2x32xf32>
    tpu.vector_store %arg30[%c14, %c32], %45 {strides = array<i32>} : memref<16x64xf32, #tpu.memory_space<vmem>>, vector<2x32xf32>,
    %48 = vector.extract_strided_slice %12 {offsets = [2, 0], sizes = [2, 128], strides = [1, 1]} : vector<16x128xf32> to vector<2x128xf32>
    %49 = vector.extract_strided_slice %17 {offsets = [12, 0], sizes = [2, 128], strides = [1, 1]} : vector<16x128xf32> to vector<2x128xf32>
    %cst_21 = arith.constant dense<0.000000e+00> : vector<2x128xf32>
    %50 = tpu.matmul %33, %18, %cst_21 {dimension_numbers = #tpu.dot_dimension_numbers<[1], [0], [0], [1], [0, 0, 1, 1], [], []>} : vector<2x32xf32>, vector<32x128xf32>, vector<2x128xf32> -> vector<2x128xf32>
    %51 = arith.addf %48, %50 : vector<2x128xf32>
    %cst_22 = arith.constant dense<0.000000e+00> : vector<2x128xf32>
    %52 = tpu.matmul %45, %19, %cst_22 {dimension_numbers = #tpu.dot_dimension_numbers<[1], [0], [0], [1], [0, 0, 1, 1], [], []>} : vector<2x32xf32>, vector<32x128xf32>, vector<2x128xf32> -> vector<2x128xf32>
    %53 = arith.addf %49, %52 : vector<2x128xf32>
    %54 = arith.negf %51 : vector<2x128xf32>
    %55 = math.exp %54 : vector<2x128xf32>
    %cst_23 = arith.constant 1.000000e+00 : f32
    %56 = vector.broadcast %cst_23 : f32 to vector<2x128xf32>
    %57 = arith.addf %56, %55 : vector<2x128xf32>
    %58 = arith.divf %56, %57 : vector<2x128xf32>
    %59 = vector.extract_strided_slice %58 {offsets = [0, 0], sizes = [2, 32], strides = [1, 1]} : vector<2x128xf32> to vector<2x32xf32>
    %60 = vector.extract_strided_slice %58 {offsets = [0, 32], sizes = [2, 32], strides = [1, 1]} : vector<2x128xf32> to vector<2x32xf32>
    %61 = vector.extract_strided_slice %58 {offsets = [0, 96], sizes = [2, 32], strides = [1, 1]} : vector<2x128xf32> to vector<2x32xf32>
    %62 = vector.extract_strided_slice %51 {offsets = [0, 64], sizes = [2, 32], strides = [1, 1]} : vector<2x128xf32> to vector<2x32xf32>
    %63 = math.tanh %62 : vector<2x32xf32>
    %64 = arith.mulf %60, %31 : vector<2x32xf32>
    %65 = arith.mulf %59, %63 : vector<2x32xf32>
    %66 = arith.addf %64, %65 : vector<2x32xf32>
    %67 = math.tanh %66 : vector<2x32xf32>
    %68 = arith.mulf %61, %67 : vector<2x32xf32>
    %69 = arith.negf %53 : vector<2x128xf32>
    %70 = math.exp %69 : vector<2x128xf32>
    %cst_24 = arith.constant 1.000000e+00 : f32
    %71 = vector.broadcast %cst_24 : f32 to vector<2x128xf32>
    %72 = arith.addf %71, %70 : vector<2x128xf32>
    %73 = arith.divf %71, %72 : vector<2x128xf32>
    %74 = vector.extract_strided_slice %73 {offsets = [0, 0], sizes = [2, 32], strides = [1, 1]} : vector<2x128xf32> to vector<2x32xf32>
    %75 = vector.extract_strided_slice %73 {offsets = [0, 32], sizes = [2, 32], strides = [1, 1]} : vector<2x128xf32> to vector<2x32xf32>
    %76 = vector.extract_strided_slice %73 {offsets = [0, 96], sizes = [2, 32], strides = [1, 1]} : vector<2x128xf32> to vector<2x32xf32>
    %77 = vector.extract_strided_slice %53 {offsets = [0, 64], sizes = [2, 32], strides = [1, 1]} : vector<2x128xf32> to vector<2x32xf32>
    %78 = math.tanh %77 : vector<2x32xf32>
    %79 = arith.mulf %75, %43 : vector<2x32xf32>
    %80 = arith.mulf %74, %78 : vector<2x32xf32>
    %81 = arith.addf %79, %80 : vector<2x32xf32>
    %82 = math.tanh %81 : vector<2x32xf32>
    %83 = arith.mulf %76, %82 : vector<2x32xf32>
    %c2 = arith.constant 2 : index
    %c0_25 = arith.constant 0 : index
    %84 = vector.load %arg30[%c2, %c0_25] : memref<16x64xf32, #tpu.memory_space<vmem>>, vector<2x32xf32>
    tpu.vector_store %arg30[%c2, %c0_25], %68 {strides = array<i32>} : memref<16x64xf32, #tpu.memory_space<vmem>>, vector<2x32xf32>,
    %c12 = arith.constant 12 : index
    %c32_26 = arith.constant 32 : index
    %85 = vector.load %arg30[%c12, %c32_26] : memref<16x64xf32, #tpu.memory_space<vmem>>, vector<2x32xf32>
    tpu.vector_store %arg30[%c12, %c32_26], %83 {strides = array<i32>} : memref<16x64xf32, #tpu.memory_space<vmem>>, vector<2x32xf32>,
    %86 = vector.extract_strided_slice %12 {offsets = [4, 0], sizes = [2, 128], strides = [1, 1]} : vector<16x128xf32> to vector<2x128xf32>
    %87 = vector.extract_strided_slice %17 {offsets = [10, 0], sizes = [2, 128], strides = [1, 1]} : vector<16x128xf32> to vector<2x128xf32>
    %cst_27 = arith.constant dense<0.000000e+00> : vector<2x128xf32>
    %88 = tpu.matmul %68, %18, %cst_27 {dimension_numbers = #tpu.dot_dimension_numbers<[1], [0], [0], [1], [0, 0, 1, 1], [], []>} : vector<2x32xf32>, vector<32x128xf32>, vector<2x128xf32> -> vector<2x128xf32>
    %89 = arith.addf %86, %88 : vector<2x128xf32>
    %cst_28 = arith.constant dense<0.000000e+00> : vector<2x128xf32>
    %90 = tpu.matmul %83, %19, %cst_28 {dimension_numbers = #tpu.dot_dimension_numbers<[1], [0], [0], [1], [0, 0, 1, 1], [], []>} : vector<2x32xf32>, vector<32x128xf32>, vector<2x128xf32> -> vector<2x128xf32>
    %91 = arith.addf %87, %90 : vector<2x128xf32>
    %92 = arith.negf %89 : vector<2x128xf32>
    %93 = math.exp %92 : vector<2x128xf32>
    %cst_29 = arith.constant 1.000000e+00 : f32
    %94 = vector.broadcast %cst_29 : f32 to vector<2x128xf32>
    %95 = arith.addf %94, %93 : vector<2x128xf32>
    %96 = arith.divf %94, %95 : vector<2x128xf32>
    %97 = vector.extract_strided_slice %96 {offsets = [0, 0], sizes = [2, 32], strides = [1, 1]} : vector<2x128xf32> to vector<2x32xf32>
    %98 = vector.extract_strided_slice %96 {offsets = [0, 32], sizes = [2, 32], strides = [1, 1]} : vector<2x128xf32> to vector<2x32xf32>
    %99 = vector.extract_strided_slice %96 {offsets = [0, 96], sizes = [2, 32], strides = [1, 1]} : vector<2x128xf32> to vector<2x32xf32>
    %100 = vector.extract_strided_slice %89 {offsets = [0, 64], sizes = [2, 32], strides = [1, 1]} : vector<2x128xf32> to vector<2x32xf32>
    %101 = math.tanh %100 : vector<2x32xf32>
    %102 = arith.mulf %98, %66 : vector<2x32xf32>
    %103 = arith.mulf %97, %101 : vector<2x32xf32>
    %104 = arith.addf %102, %103 : vector<2x32xf32>
    %105 = math.tanh %104 : vector<2x32xf32>
    %106 = arith.mulf %99, %105 : vector<2x32xf32>
    %107 = arith.negf %91 : vector<2x128xf32>
    %108 = math.exp %107 : vector<2x128xf32>
    %cst_30 = arith.constant 1.000000e+00 : f32
    %109 = vector.broadcast %cst_30 : f32 to vector<2x128xf32>
    %110 = arith.addf %109, %108 : vector<2x128xf32>
    %111 = arith.divf %109, %110 : vector<2x128xf32>
    %112 = vector.extract_strided_slice %111 {offsets = [0, 0], sizes = [2, 32], strides = [1, 1]} : vector<2x128xf32> to vector<2x32xf32>
    %113 = vector.extract_strided_slice %111 {offsets = [0, 32], sizes = [2, 32], strides = [1, 1]} : vector<2x128xf32> to vector<2x32xf32>
    %114 = vector.extract_strided_slice %111 {offsets = [0, 96], sizes = [2, 32], strides = [1, 1]} : vector<2x128xf32> to vector<2x32xf32>
    %115 = vector.extract_strided_slice %91 {offsets = [0, 64], sizes = [2, 32], strides = [1, 1]} : vector<2x128xf32> to vector<2x32xf32>
    %116 = math.tanh %115 : vector<2x32xf32>
    %117 = arith.mulf %113, %81 : vector<2x32xf32>
    %118 = arith.mulf %112, %116 : vector<2x32xf32>
    %119 = arith.addf %117, %118 : vector<2x32xf32>
    %120 = math.tanh %119 : vector<2x32xf32>
    %121 = arith.mulf %114, %120 : vector<2x32xf32>
    %c4 = arith.constant 4 : index
    %c0_31 = arith.constant 0 : index
    %122 = vector.load %arg30[%c4, %c0_31] : memref<16x64xf32, #tpu.memory_space<vmem>>, vector<2x32xf32>
    tpu.vector_store %arg30[%c4, %c0_31], %106 {strides = array<i32>} : memref<16x64xf32, #tpu.memory_space<vmem>>, vector<2x32xf32>,
    %c10 = arith.constant 10 : index
    %c32_32 = arith.constant 32 : index
    %123 = vector.load %arg30[%c10, %c32_32] : memref<16x64xf32, #tpu.memory_space<vmem>>, vector<2x32xf32>
    tpu.vector_store %arg30[%c10, %c32_32], %121 {strides = array<i32>} : memref<16x64xf32, #tpu.memory_space<vmem>>, vector<2x32xf32>,
    %124 = vector.extract_strided_slice %12 {offsets = [6, 0], sizes = [2, 128], strides = [1, 1]} : vector<16x128xf32> to vector<2x128xf32>
    %125 = vector.extract_strided_slice %17 {offsets = [8, 0], sizes = [2, 128], strides = [1, 1]} : vector<16x128xf32> to vector<2x128xf32>
    %cst_33 = arith.constant dense<0.000000e+00> : vector<2x128xf32>
    %126 = tpu.matmul %106, %18, %cst_33 {dimension_numbers = #tpu.dot_dimension_numbers<[1], [0], [0], [1], [0, 0, 1, 1], [], []>} : vector<2x32xf32>, vector<32x128xf32>, vector<2x128xf32> -> vector<2x128xf32>
    %127 = arith.addf %124, %126 : vector<2x128xf32>
    %cst_34 = arith.constant dense<0.000000e+00> : vector<2x128xf32>
    %128 = tpu.matmul %121, %19, %cst_34 {dimension_numbers = #tpu.dot_dimension_numbers<[1], [0], [0], [1], [0, 0, 1, 1], [], []>} : vector<2x32xf32>, vector<32x128xf32>, vector<2x128xf32> -> vector<2x128xf32>
    %129 = arith.addf %125, %128 : vector<2x128xf32>
    %130 = arith.negf %127 : vector<2x128xf32>
    %131 = math.exp %130 : vector<2x128xf32>
    %cst_35 = arith.constant 1.000000e+00 : f32
    %132 = vector.broadcast %cst_35 : f32 to vector<2x128xf32>
    %133 = arith.addf %132, %131 : vector<2x128xf32>
    %134 = arith.divf %132, %133 : vector<2x128xf32>
    %135 = vector.extract_strided_slice %134 {offsets = [0, 0], sizes = [2, 32], strides = [1, 1]} : vector<2x128xf32> to vector<2x32xf32>
    %136 = vector.extract_strided_slice %134 {offsets = [0, 32], sizes = [2, 32], strides = [1, 1]} : vector<2x128xf32> to vector<2x32xf32>
    %137 = vector.extract_strided_slice %134 {offsets = [0, 96], sizes = [2, 32], strides = [1, 1]} : vector<2x128xf32> to vector<2x32xf32>
    %138 = vector.extract_strided_slice %127 {offsets = [0, 64], sizes = [2, 32], strides = [1, 1]} : vector<2x128xf32> to vector<2x32xf32>
    %139 = math.tanh %138 : vector<2x32xf32>
    %140 = arith.mulf %136, %104 : vector<2x32xf32>
    %141 = arith.mulf %135, %139 : vector<2x32xf32>
    %142 = arith.addf %140, %141 : vector<2x32xf32>
    %143 = math.tanh %142 : vector<2x32xf32>
    %144 = arith.mulf %137, %143 : vector<2x32xf32>
    %145 = arith.negf %129 : vector<2x128xf32>
    %146 = math.exp %145 : vector<2x128xf32>
    %cst_36 = arith.constant 1.000000e+00 : f32
    %147 = vector.broadcast %cst_36 : f32 to vector<2x128xf32>
    %148 = arith.addf %147, %146 : vector<2x128xf32>
    %149 = arith.divf %147, %148 : vector<2x128xf32>
    %150 = vector.extract_strided_slice %149 {offsets = [0, 0], sizes = [2, 32], strides = [1, 1]} : vector<2x128xf32> to vector<2x32xf32>
    %151 = vector.extract_strided_slice %149 {offsets = [0, 32], sizes = [2, 32], strides = [1, 1]} : vector<2x128xf32> to vector<2x32xf32>
    %152 = vector.extract_strided_slice %149 {offsets = [0, 96], sizes = [2, 32], strides = [1, 1]} : vector<2x128xf32> to vector<2x32xf32>
    %153 = vector.extract_strided_slice %129 {offsets = [0, 64], sizes = [2, 32], strides = [1, 1]} : vector<2x128xf32> to vector<2x32xf32>
    %154 = math.tanh %153 : vector<2x32xf32>
    %155 = arith.mulf %151, %119 : vector<2x32xf32>
    %156 = arith.mulf %150, %154 : vector<2x32xf32>
    %157 = arith.addf %155, %156 : vector<2x32xf32>
    %158 = math.tanh %157 : vector<2x32xf32>
    %159 = arith.mulf %152, %158 : vector<2x32xf32>
    %c6 = arith.constant 6 : index
    %c0_37 = arith.constant 0 : index
    %160 = vector.load %arg30[%c6, %c0_37] : memref<16x64xf32, #tpu.memory_space<vmem>>, vector<2x32xf32>
    tpu.vector_store %arg30[%c6, %c0_37], %144 {strides = array<i32>} : memref<16x64xf32, #tpu.memory_space<vmem>>, vector<2x32xf32>,
    %c8 = arith.constant 8 : index
    %c32_38 = arith.constant 32 : index
    %161 = vector.load %arg30[%c8, %c32_38] : memref<16x64xf32, #tpu.memory_space<vmem>>, vector<2x32xf32>
    tpu.vector_store %arg30[%c8, %c32_38], %159 {strides = array<i32>} : memref<16x64xf32, #tpu.memory_space<vmem>>, vector<2x32xf32>,
    %162 = vector.extract_strided_slice %12 {offsets = [8, 0], sizes = [2, 128], strides = [1, 1]} : vector<16x128xf32> to vector<2x128xf32>
    %163 = vector.extract_strided_slice %17 {offsets = [6, 0], sizes = [2, 128], strides = [1, 1]} : vector<16x128xf32> to vector<2x128xf32>
    %cst_39 = arith.constant dense<0.000000e+00> : vector<2x128xf32>
    %164 = tpu.matmul %144, %18, %cst_39 {dimension_numbers = #tpu.dot_dimension_numbers<[1], [0], [0], [1], [0, 0, 1, 1], [], []>} : vector<2x32xf32>, vector<32x128xf32>, vector<2x128xf32> -> vector<2x128xf32>
    %165 = arith.addf %162, %164 : vector<2x128xf32>
    %cst_40 = arith.constant dense<0.000000e+00> : vector<2x128xf32>
    %166 = tpu.matmul %159, %19, %cst_40 {dimension_numbers = #tpu.dot_dimension_numbers<[1], [0], [0], [1], [0, 0, 1, 1], [], []>} : vector<2x32xf32>, vector<32x128xf32>, vector<2x128xf32> -> vector<2x128xf32>
    %167 = arith.addf %163, %166 : vector<2x128xf32>
    %168 = arith.negf %165 : vector<2x128xf32>
    %169 = math.exp %168 : vector<2x128xf32>
    %cst_41 = arith.constant 1.000000e+00 : f32
    %170 = vector.broadcast %cst_41 : f32 to vector<2x128xf32>
    %171 = arith.addf %170, %169 : vector<2x128xf32>
    %172 = arith.divf %170, %171 : vector<2x128xf32>
    %173 = vector.extract_strided_slice %172 {offsets = [0, 0], sizes = [2, 32], strides = [1, 1]} : vector<2x128xf32> to vector<2x32xf32>
    %174 = vector.extract_strided_slice %172 {offsets = [0, 32], sizes = [2, 32], strides = [1, 1]} : vector<2x128xf32> to vector<2x32xf32>
    %175 = vector.extract_strided_slice %172 {offsets = [0, 96], sizes = [2, 32], strides = [1, 1]} : vector<2x128xf32> to vector<2x32xf32>
    %176 = vector.extract_strided_slice %165 {offsets = [0, 64], sizes = [2, 32], strides = [1, 1]} : vector<2x128xf32> to vector<2x32xf32>
    %177 = math.tanh %176 : vector<2x32xf32>
    %178 = arith.mulf %174, %142 : vector<2x32xf32>
    %179 = arith.mulf %173, %177 : vector<2x32xf32>
    %180 = arith.addf %178, %179 : vector<2x32xf32>
    %181 = math.tanh %180 : vector<2x32xf32>
    %182 = arith.mulf %175, %181 : vector<2x32xf32>
    %183 = arith.negf %167 : vector<2x128xf32>
    %184 = math.exp %183 : vector<2x128xf32>
    %cst_42 = arith.constant 1.000000e+00 : f32
    %185 = vector.broadcast %cst_42 : f32 to vector<2x128xf32>
    %186 = arith.addf %185, %184 : vector<2x128xf32>
    %187 = arith.divf %185, %186 : vector<2x128xf32>
    %188 = vector.extract_strided_slice %187 {offsets = [0, 0], sizes = [2, 32], strides = [1, 1]} : vector<2x128xf32> to vector<2x32xf32>
    %189 = vector.extract_strided_slice %187 {offsets = [0, 32], sizes = [2, 32], strides = [1, 1]} : vector<2x128xf32> to vector<2x32xf32>
    %190 = vector.extract_strided_slice %187 {offsets = [0, 96], sizes = [2, 32], strides = [1, 1]} : vector<2x128xf32> to vector<2x32xf32>
    %191 = vector.extract_strided_slice %167 {offsets = [0, 64], sizes = [2, 32], strides = [1, 1]} : vector<2x128xf32> to vector<2x32xf32>
    %192 = math.tanh %191 : vector<2x32xf32>
    %193 = arith.mulf %189, %157 : vector<2x32xf32>
    %194 = arith.mulf %188, %192 : vector<2x32xf32>
    %195 = arith.addf %193, %194 : vector<2x32xf32>
    %196 = math.tanh %195 : vector<2x32xf32>
    %197 = arith.mulf %190, %196 : vector<2x32xf32>
    %c8_43 = arith.constant 8 : index
    %c0_44 = arith.constant 0 : index
    %198 = vector.load %arg30[%c8_43, %c0_44] : memref<16x64xf32, #tpu.memory_space<vmem>>, vector<2x32xf32>
    tpu.vector_store %arg30[%c8_43, %c0_44], %182 {strides = array<i32>} : memref<16x64xf32, #tpu.memory_space<vmem>>, vector<2x32xf32>,
    %c6_45 = arith.constant 6 : index
    %c32_46 = arith.constant 32 : index
    %199 = vector.load %arg30[%c6_45, %c32_46] : memref<16x64xf32, #tpu.memory_space<vmem>>, vector<2x32xf32>
    tpu.vector_store %arg30[%c6_45, %c32_46], %197 {strides = array<i32>} : memref<16x64xf32, #tpu.memory_space<vmem>>, vector<2x32xf32>,
    %200 = vector.extract_strided_slice %12 {offsets = [10, 0], sizes = [2, 128], strides = [1, 1]} : vector<16x128xf32> to vector<2x128xf32>
    %201 = vector.extract_strided_slice %17 {offsets = [4, 0], sizes = [2, 128], strides = [1, 1]} : vector<16x128xf32> to vector<2x128xf32>
    %cst_47 = arith.constant dense<0.000000e+00> : vector<2x128xf32>
    %202 = tpu.matmul %182, %18, %cst_47 {dimension_numbers = #tpu.dot_dimension_numbers<[1], [0], [0], [1], [0, 0, 1, 1], [], []>} : vector<2x32xf32>, vector<32x128xf32>, vector<2x128xf32> -> vector<2x128xf32>
    %203 = arith.addf %200, %202 : vector<2x128xf32>
    %cst_48 = arith.constant dense<0.000000e+00> : vector<2x128xf32>
    %204 = tpu.matmul %197, %19, %cst_48 {dimension_numbers = #tpu.dot_dimension_numbers<[1], [0], [0], [1], [0, 0, 1, 1], [], []>} : vector<2x32xf32>, vector<32x128xf32>, vector<2x128xf32> -> vector<2x128xf32>
    %205 = arith.addf %201, %204 : vector<2x128xf32>
    %206 = arith.negf %203 : vector<2x128xf32>
    %207 = math.exp %206 : vector<2x128xf32>
    %cst_49 = arith.constant 1.000000e+00 : f32
    %208 = vector.broadcast %cst_49 : f32 to vector<2x128xf32>
    %209 = arith.addf %208, %207 : vector<2x128xf32>
    %210 = arith.divf %208, %209 : vector<2x128xf32>
    %211 = vector.extract_strided_slice %210 {offsets = [0, 0], sizes = [2, 32], strides = [1, 1]} : vector<2x128xf32> to vector<2x32xf32>
    %212 = vector.extract_strided_slice %210 {offsets = [0, 32], sizes = [2, 32], strides = [1, 1]} : vector<2x128xf32> to vector<2x32xf32>
    %213 = vector.extract_strided_slice %210 {offsets = [0, 96], sizes = [2, 32], strides = [1, 1]} : vector<2x128xf32> to vector<2x32xf32>
    %214 = vector.extract_strided_slice %203 {offsets = [0, 64], sizes = [2, 32], strides = [1, 1]} : vector<2x128xf32> to vector<2x32xf32>
    %215 = math.tanh %214 : vector<2x32xf32>
    %216 = arith.mulf %212, %180 : vector<2x32xf32>
    %217 = arith.mulf %211, %215 : vector<2x32xf32>
    %218 = arith.addf %216, %217 : vector<2x32xf32>
    %219 = math.tanh %218 : vector<2x32xf32>
    %220 = arith.mulf %213, %219 : vector<2x32xf32>
    %221 = arith.negf %205 : vector<2x128xf32>
    %222 = math.exp %221 : vector<2x128xf32>
    %cst_50 = arith.constant 1.000000e+00 : f32
    %223 = vector.broadcast %cst_50 : f32 to vector<2x128xf32>
    %224 = arith.addf %223, %222 : vector<2x128xf32>
    %225 = arith.divf %223, %224 : vector<2x128xf32>
    %226 = vector.extract_strided_slice %225 {offsets = [0, 0], sizes = [2, 32], strides = [1, 1]} : vector<2x128xf32> to vector<2x32xf32>
    %227 = vector.extract_strided_slice %225 {offsets = [0, 32], sizes = [2, 32], strides = [1, 1]} : vector<2x128xf32> to vector<2x32xf32>
    %228 = vector.extract_strided_slice %225 {offsets = [0, 96], sizes = [2, 32], strides = [1, 1]} : vector<2x128xf32> to vector<2x32xf32>
    %229 = vector.extract_strided_slice %205 {offsets = [0, 64], sizes = [2, 32], strides = [1, 1]} : vector<2x128xf32> to vector<2x32xf32>
    %230 = math.tanh %229 : vector<2x32xf32>
    %231 = arith.mulf %227, %195 : vector<2x32xf32>
    %232 = arith.mulf %226, %230 : vector<2x32xf32>
    %233 = arith.addf %231, %232 : vector<2x32xf32>
    %234 = math.tanh %233 : vector<2x32xf32>
    %235 = arith.mulf %228, %234 : vector<2x32xf32>
    %c10_51 = arith.constant 10 : index
    %c0_52 = arith.constant 0 : index
    %236 = vector.load %arg30[%c10_51, %c0_52] : memref<16x64xf32, #tpu.memory_space<vmem>>, vector<2x32xf32>
    tpu.vector_store %arg30[%c10_51, %c0_52], %220 {strides = array<i32>} : memref<16x64xf32, #tpu.memory_space<vmem>>, vector<2x32xf32>,
    %c4_53 = arith.constant 4 : index
    %c32_54 = arith.constant 32 : index
    %237 = vector.load %arg30[%c4_53, %c32_54] : memref<16x64xf32, #tpu.memory_space<vmem>>, vector<2x32xf32>
    tpu.vector_store %arg30[%c4_53, %c32_54], %235 {strides = array<i32>} : memref<16x64xf32, #tpu.memory_space<vmem>>, vector<2x32xf32>,
    %238 = vector.extract_strided_slice %12 {offsets = [12, 0], sizes = [2, 128], strides = [1, 1]} : vector<16x128xf32> to vector<2x128xf32>
    %239 = vector.extract_strided_slice %17 {offsets = [2, 0], sizes = [2, 128], strides = [1, 1]} : vector<16x128xf32> to vector<2x128xf32>
    %cst_55 = arith.constant dense<0.000000e+00> : vector<2x128xf32>
    %240 = tpu.matmul %220, %18, %cst_55 {dimension_numbers = #tpu.dot_dimension_numbers<[1], [0], [0], [1], [0, 0, 1, 1], [], []>} : vector<2x32xf32>, vector<32x128xf32>, vector<2x128xf32> -> vector<2x128xf32>
    %241 = arith.addf %238, %240 : vector<2x128xf32>
    %cst_56 = arith.constant dense<0.000000e+00> : vector<2x128xf32>
    %242 = tpu.matmul %235, %19, %cst_56 {dimension_numbers = #tpu.dot_dimension_numbers<[1], [0], [0], [1], [0, 0, 1, 1], [], []>} : vector<2x32xf32>, vector<32x128xf32>, vector<2x128xf32> -> vector<2x128xf32>
    %243 = arith.addf %239, %242 : vector<2x128xf32>
    %244 = arith.negf %241 : vector<2x128xf32>
    %245 = math.exp %244 : vector<2x128xf32>
    %cst_57 = arith.constant 1.000000e+00 : f32
    %246 = vector.broadcast %cst_57 : f32 to vector<2x128xf32>
    %247 = arith.addf %246, %245 : vector<2x128xf32>
    %248 = arith.divf %246, %247 : vector<2x128xf32>
    %249 = vector.extract_strided_slice %248 {offsets = [0, 0], sizes = [2, 32], strides = [1, 1]} : vector<2x128xf32> to vector<2x32xf32>
    %250 = vector.extract_strided_slice %248 {offsets = [0, 32], sizes = [2, 32], strides = [1, 1]} : vector<2x128xf32> to vector<2x32xf32>
    %251 = vector.extract_strided_slice %248 {offsets = [0, 96], sizes = [2, 32], strides = [1, 1]} : vector<2x128xf32> to vector<2x32xf32>
    %252 = vector.extract_strided_slice %241 {offsets = [0, 64], sizes = [2, 32], strides = [1, 1]} : vector<2x128xf32> to vector<2x32xf32>
    %253 = math.tanh %252 : vector<2x32xf32>
    %254 = arith.mulf %250, %218 : vector<2x32xf32>
    %255 = arith.mulf %249, %253 : vector<2x32xf32>
    %256 = arith.addf %254, %255 : vector<2x32xf32>
    %257 = math.tanh %256 : vector<2x32xf32>
    %258 = arith.mulf %251, %257 : vector<2x32xf32>
    %259 = arith.negf %243 : vector<2x128xf32>
    %260 = math.exp %259 : vector<2x128xf32>
    %cst_58 = arith.constant 1.000000e+00 : f32
    %261 = vector.broadcast %cst_58 : f32 to vector<2x128xf32>
    %262 = arith.addf %261, %260 : vector<2x128xf32>
    %263 = arith.divf %261, %262 : vector<2x128xf32>
    %264 = vector.extract_strided_slice %263 {offsets = [0, 0], sizes = [2, 32], strides = [1, 1]} : vector<2x128xf32> to vector<2x32xf32>
    %265 = vector.extract_strided_slice %263 {offsets = [0, 32], sizes = [2, 32], strides = [1, 1]} : vector<2x128xf32> to vector<2x32xf32>
    %266 = vector.extract_strided_slice %263 {offsets = [0, 96], sizes = [2, 32], strides = [1, 1]} : vector<2x128xf32> to vector<2x32xf32>
    %267 = vector.extract_strided_slice %243 {offsets = [0, 64], sizes = [2, 32], strides = [1, 1]} : vector<2x128xf32> to vector<2x32xf32>
    %268 = math.tanh %267 : vector<2x32xf32>
    %269 = arith.mulf %265, %233 : vector<2x32xf32>
    %270 = arith.mulf %264, %268 : vector<2x32xf32>
    %271 = arith.addf %269, %270 : vector<2x32xf32>
    %272 = math.tanh %271 : vector<2x32xf32>
    %273 = arith.mulf %266, %272 : vector<2x32xf32>
    %c12_59 = arith.constant 12 : index
    %c0_60 = arith.constant 0 : index
    %274 = vector.load %arg30[%c12_59, %c0_60] : memref<16x64xf32, #tpu.memory_space<vmem>>, vector<2x32xf32>
    tpu.vector_store %arg30[%c12_59, %c0_60], %258 {strides = array<i32>} : memref<16x64xf32, #tpu.memory_space<vmem>>, vector<2x32xf32>,
    %c2_61 = arith.constant 2 : index
    %c32_62 = arith.constant 32 : index
    %275 = vector.load %arg30[%c2_61, %c32_62] : memref<16x64xf32, #tpu.memory_space<vmem>>, vector<2x32xf32>
    tpu.vector_store %arg30[%c2_61, %c32_62], %273 {strides = array<i32>} : memref<16x64xf32, #tpu.memory_space<vmem>>, vector<2x32xf32>,
    %276 = vector.extract_strided_slice %12 {offsets = [14, 0], sizes = [2, 128], strides = [1, 1]} : vector<16x128xf32> to vector<2x128xf32>
    %277 = vector.extract_strided_slice %17 {offsets = [0, 0], sizes = [2, 128], strides = [1, 1]} : vector<16x128xf32> to vector<2x128xf32>
    %cst_63 = arith.constant dense<0.000000e+00> : vector<2x128xf32>
    %278 = tpu.matmul %258, %18, %cst_63 {dimension_numbers = #tpu.dot_dimension_numbers<[1], [0], [0], [1], [0, 0, 1, 1], [], []>} : vector<2x32xf32>, vector<32x128xf32>, vector<2x128xf32> -> vector<2x128xf32>
    %279 = arith.addf %276, %278 : vector<2x128xf32>
    %cst_64 = arith.constant dense<0.000000e+00> : vector<2x128xf32>
    %280 = tpu.matmul %273, %19, %cst_64 {dimension_numbers = #tpu.dot_dimension_numbers<[1], [0], [0], [1], [0, 0, 1, 1], [], []>} : vector<2x32xf32>, vector<32x128xf32>, vector<2x128xf32> -> vector<2x128xf32>
    %281 = arith.addf %277, %280 : vector<2x128xf32>
    %282 = arith.negf %279 : vector<2x128xf32>
    %283 = math.exp %282 : vector<2x128xf32>
    %cst_65 = arith.constant 1.000000e+00 : f32
    %284 = vector.broadcast %cst_65 : f32 to vector<2x128xf32>
    %285 = arith.addf %284, %283 : vector<2x128xf32>
    %286 = arith.divf %284, %285 : vector<2x128xf32>
    %287 = vector.extract_strided_slice %286 {offsets = [0, 0], sizes = [2, 32], strides = [1, 1]} : vector<2x128xf32> to vector<2x32xf32>
    %288 = vector.extract_strided_slice %286 {offsets = [0, 32], sizes = [2, 32], strides = [1, 1]} : vector<2x128xf32> to vector<2x32xf32>
    %289 = vector.extract_strided_slice %286 {offsets = [0, 96], sizes = [2, 32], strides = [1, 1]} : vector<2x128xf32> to vector<2x32xf32>
    %290 = vector.extract_strided_slice %279 {offsets = [0, 64], sizes = [2, 32], strides = [1, 1]} : vector<2x128xf32> to vector<2x32xf32>
    %291 = math.tanh %290 : vector<2x32xf32>
    %292 = arith.mulf %288, %256 : vector<2x32xf32>
    %293 = arith.mulf %287, %291 : vector<2x32xf32>
    %294 = arith.addf %292, %293 : vector<2x32xf32>
    %295 = math.tanh %294 : vector<2x32xf32>
    %296 = arith.mulf %289, %295 : vector<2x32xf32>
    %297 = arith.negf %281 : vector<2x128xf32>
    %298 = math.exp %297 : vector<2x128xf32>
    %cst_66 = arith.constant 1.000000e+00 : f32
    %299 = vector.broadcast %cst_66 : f32 to vector<2x128xf32>
    %300 = arith.addf %299, %298 : vector<2x128xf32>
    %301 = arith.divf %299, %300 : vector<2x128xf32>
    %302 = vector.extract_strided_slice %301 {offsets = [0, 0], sizes = [2, 32], strides = [1, 1]} : vector<2x128xf32> to vector<2x32xf32>
    %303 = vector.extract_strided_slice %301 {offsets = [0, 32], sizes = [2, 32], strides = [1, 1]} : vector<2x128xf32> to vector<2x32xf32>
    %304 = vector.extract_strided_slice %301 {offsets = [0, 96], sizes = [2, 32], strides = [1, 1]} : vector<2x128xf32> to vector<2x32xf32>
    %305 = vector.extract_strided_slice %281 {offsets = [0, 64], sizes = [2, 32], strides = [1, 1]} : vector<2x128xf32> to vector<2x32xf32>
    %306 = math.tanh %305 : vector<2x32xf32>
    %307 = arith.mulf %303, %271 : vector<2x32xf32>
    %308 = arith.mulf %302, %306 : vector<2x32xf32>
    %309 = arith.addf %307, %308 : vector<2x32xf32>
    %310 = math.tanh %309 : vector<2x32xf32>
    %311 = arith.mulf %304, %310 : vector<2x32xf32>
    %c14_67 = arith.constant 14 : index
    %c0_68 = arith.constant 0 : index
    %312 = vector.load %arg30[%c14_67, %c0_68] : memref<16x64xf32, #tpu.memory_space<vmem>>, vector<2x32xf32>
    tpu.vector_store %arg30[%c14_67, %c0_68], %296 {strides = array<i32>} : memref<16x64xf32, #tpu.memory_space<vmem>>, vector<2x32xf32>,
    %c0_69 = arith.constant 0 : index
    %c32_70 = arith.constant 32 : index
    %313 = vector.load %arg30[%c0_69, %c32_70] : memref<16x64xf32, #tpu.memory_space<vmem>>, vector<2x32xf32>
    tpu.vector_store %arg30[%c0_69, %c32_70], %311 {strides = array<i32>} : memref<16x64xf32, #tpu.memory_space<vmem>>, vector<2x32xf32>,
    %c0_71 = arith.constant 0 : index
    %c0_72 = arith.constant 0 : index
    %314 = vector.load %arg30[%c0_71, %c0_72] : memref<16x64xf32, #tpu.memory_space<vmem>>, vector<16x64xf32>
    %c0_73 = arith.constant 0 : index
    %c0_74 = arith.constant 0 : index
    %315 = vector.load %arg11[%c0_73, %c0_74] : memref<64x128xf32, #tpu.memory_space<vmem>>, vector<64x128xf32>
    %cst_75 = arith.constant dense<0.000000e+00> : vector<16x128xf32>
    %316 = tpu.matmul %314, %315, %cst_75 {dimension_numbers = #tpu.dot_dimension_numbers<[1], [0], [0], [1], [0, 0, 1, 1], [], []>} : vector<16x64xf32>, vector<64x128xf32>, vector<16x128xf32> -> vector<16x128xf32>
    %c0_76 = arith.constant 0 : index
    %c0_77 = arith.constant 0 : index
    %317 = vector.load %arg13[%c0_76, %c0_77] : memref<1x128xf32, #tpu.memory_space<vmem>>, vector<1x128xf32>
    %318 = vector.broadcast %317 : vector<1x128xf32> to vector<16x128xf32>
    %319 = arith.addf %316, %318 : vector<16x128xf32>
    %c0_78 = arith.constant 0 : index
    %c0_79 = arith.constant 0 : index
    %320 = vector.load %arg14[%c0_78, %c0_79] : memref<64x128xf32, #tpu.memory_space<vmem>>, vector<64x128xf32>
    %cst_80 = arith.constant dense<0.000000e+00> : vector<16x128xf32>
    %321 = tpu.matmul %314, %320, %cst_80 {dimension_numbers = #tpu.dot_dimension_numbers<[1], [0], [0], [1], [0, 0, 1, 1], [], []>} : vector<16x64xf32>, vector<64x128xf32>, vector<16x128xf32> -> vector<16x128xf32>
    %c0_81 = arith.constant 0 : index
    %c0_82 = arith.constant 0 : index
    %322 = vector.load %arg16[%c0_81, %c0_82] : memref<1x128xf32, #tpu.memory_space<vmem>>, vector<1x128xf32>
    %323 = vector.broadcast %322 : vector<1x128xf32> to vector<16x128xf32>
    %324 = arith.addf %321, %323 : vector<16x128xf32>
    %c0_83 = arith.constant 0 : index
    %c0_84 = arith.constant 0 : index
    %325 = vector.load %arg12[%c0_83, %c0_84] : memref<32x128xf32, #tpu.memory_space<vmem>>, vector<32x128xf32>
    %c0_85 = arith.constant 0 : index
    %c0_86 = arith.constant 0 : index
    %326 = vector.load %arg15[%c0_85, %c0_86] : memref<32x128xf32, #tpu.memory_space<vmem>>, vector<32x128xf32>
    %327 = vector.extract_strided_slice %319 {offsets = [0, 0], sizes = [2, 128], strides = [1, 1]} : vector<16x128xf32> to vector<2x128xf32>
    %328 = vector.extract_strided_slice %324 {offsets = [14, 0], sizes = [2, 128], strides = [1, 1]} : vector<16x128xf32> to vector<2x128xf32>
    %329 = arith.negf %327 : vector<2x128xf32>
    %330 = math.exp %329 : vector<2x128xf32>
    %cst_87 = arith.constant 1.000000e+00 : f32
    %331 = vector.broadcast %cst_87 : f32 to vector<2x128xf32>
    %332 = arith.addf %331, %330 : vector<2x128xf32>
    %333 = arith.divf %331, %332 : vector<2x128xf32>
    %334 = vector.extract_strided_slice %333 {offsets = [0, 0], sizes = [2, 32], strides = [1, 1]} : vector<2x128xf32> to vector<2x32xf32>
    %335 = vector.extract_strided_slice %333 {offsets = [0, 96], sizes = [2, 32], strides = [1, 1]} : vector<2x128xf32> to vector<2x32xf32>
    %336 = vector.extract_strided_slice %327 {offsets = [0, 64], sizes = [2, 32], strides = [1, 1]} : vector<2x128xf32> to vector<2x32xf32>
    %337 = math.tanh %336 : vector<2x32xf32>
    %338 = arith.mulf %334, %337 : vector<2x32xf32>
    %339 = math.tanh %338 : vector<2x32xf32>
    %340 = arith.mulf %335, %339 : vector<2x32xf32>
    %341 = arith.negf %328 : vector<2x128xf32>
    %342 = math.exp %341 : vector<2x128xf32>
    %cst_88 = arith.constant 1.000000e+00 : f32
    %343 = vector.broadcast %cst_88 : f32 to vector<2x128xf32>
    %344 = arith.addf %343, %342 : vector<2x128xf32>
    %345 = arith.divf %343, %344 : vector<2x128xf32>
    %346 = vector.extract_strided_slice %345 {offsets = [0, 0], sizes = [2, 32], strides = [1, 1]} : vector<2x128xf32> to vector<2x32xf32>
    %347 = vector.extract_strided_slice %345 {offsets = [0, 96], sizes = [2, 32], strides = [1, 1]} : vector<2x128xf32> to vector<2x32xf32>
    %348 = vector.extract_strided_slice %328 {offsets = [0, 64], sizes = [2, 32], strides = [1, 1]} : vector<2x128xf32> to vector<2x32xf32>
    %349 = math.tanh %348 : vector<2x32xf32>
    %350 = arith.mulf %346, %349 : vector<2x32xf32>
    %351 = math.tanh %350 : vector<2x32xf32>
    %352 = arith.mulf %347, %351 : vector<2x32xf32>
    %353 = vector.extract_strided_slice %319 {offsets = [2, 0], sizes = [2, 128], strides = [1, 1]} : vector<16x128xf32> to vector<2x128xf32>
    %354 = vector.extract_strided_slice %324 {offsets = [12, 0], sizes = [2, 128], strides = [1, 1]} : vector<16x128xf32> to vector<2x128xf32>
    %cst_89 = arith.constant dense<0.000000e+00> : vector<2x128xf32>
    %355 = tpu.matmul %340, %325, %cst_89 {dimension_numbers = #tpu.dot_dimension_numbers<[1], [0], [0], [1], [0, 0, 1, 1], [], []>} : vector<2x32xf32>, vector<32x128xf32>, vector<2x128xf32> -> vector<2x128xf32>
    %356 = arith.addf %353, %355 : vector<2x128xf32>
    %cst_90 = arith.constant dense<0.000000e+00> : vector<2x128xf32>
    %357 = tpu.matmul %352, %326, %cst_90 {dimension_numbers = #tpu.dot_dimension_numbers<[1], [0], [0], [1], [0, 0, 1, 1], [], []>} : vector<2x32xf32>, vector<32x128xf32>, vector<2x128xf32> -> vector<2x128xf32>
    %358 = arith.addf %354, %357 : vector<2x128xf32>
    %359 = arith.negf %356 : vector<2x128xf32>
    %360 = math.exp %359 : vector<2x128xf32>
    %cst_91 = arith.constant 1.000000e+00 : f32
    %361 = vector.broadcast %cst_91 : f32 to vector<2x128xf32>
    %362 = arith.addf %361, %360 : vector<2x128xf32>
    %363 = arith.divf %361, %362 : vector<2x128xf32>
    %364 = vector.extract_strided_slice %363 {offsets = [0, 0], sizes = [2, 32], strides = [1, 1]} : vector<2x128xf32> to vector<2x32xf32>
    %365 = vector.extract_strided_slice %363 {offsets = [0, 32], sizes = [2, 32], strides = [1, 1]} : vector<2x128xf32> to vector<2x32xf32>
    %366 = vector.extract_strided_slice %363 {offsets = [0, 96], sizes = [2, 32], strides = [1, 1]} : vector<2x128xf32> to vector<2x32xf32>
    %367 = vector.extract_strided_slice %356 {offsets = [0, 64], sizes = [2, 32], strides = [1, 1]} : vector<2x128xf32> to vector<2x32xf32>
    %368 = math.tanh %367 : vector<2x32xf32>
    %369 = arith.mulf %365, %338 : vector<2x32xf32>
    %370 = arith.mulf %364, %368 : vector<2x32xf32>
    %371 = arith.addf %369, %370 : vector<2x32xf32>
    %372 = math.tanh %371 : vector<2x32xf32>
    %373 = arith.mulf %366, %372 : vector<2x32xf32>
    %374 = arith.negf %358 : vector<2x128xf32>
    %375 = math.exp %374 : vector<2x128xf32>
    %cst_92 = arith.constant 1.000000e+00 : f32
    %376 = vector.broadcast %cst_92 : f32 to vector<2x128xf32>
    %377 = arith.addf %376, %375 : vector<2x128xf32>
    %378 = arith.divf %376, %377 : vector<2x128xf32>
    %379 = vector.extract_strided_slice %378 {offsets = [0, 0], sizes = [2, 32], strides = [1, 1]} : vector<2x128xf32> to vector<2x32xf32>
    %380 = vector.extract_strided_slice %378 {offsets = [0, 32], sizes = [2, 32], strides = [1, 1]} : vector<2x128xf32> to vector<2x32xf32>
    %381 = vector.extract_strided_slice %378 {offsets = [0, 96], sizes = [2, 32], strides = [1, 1]} : vector<2x128xf32> to vector<2x32xf32>
    %382 = vector.extract_strided_slice %358 {offsets = [0, 64], sizes = [2, 32], strides = [1, 1]} : vector<2x128xf32> to vector<2x32xf32>
    %383 = math.tanh %382 : vector<2x32xf32>
    %384 = arith.mulf %380, %350 : vector<2x32xf32>
    %385 = arith.mulf %379, %383 : vector<2x32xf32>
    %386 = arith.addf %384, %385 : vector<2x32xf32>
    %387 = math.tanh %386 : vector<2x32xf32>
    %388 = arith.mulf %381, %387 : vector<2x32xf32>
    %389 = vector.extract_strided_slice %319 {offsets = [4, 0], sizes = [2, 128], strides = [1, 1]} : vector<16x128xf32> to vector<2x128xf32>
    %390 = vector.extract_strided_slice %324 {offsets = [10, 0], sizes = [2, 128], strides = [1, 1]} : vector<16x128xf32> to vector<2x128xf32>
    %cst_93 = arith.constant dense<0.000000e+00> : vector<2x128xf32>
    %391 = tpu.matmul %373, %325, %cst_93 {dimension_numbers = #tpu.dot_dimension_numbers<[1], [0], [0], [1], [0, 0, 1, 1], [], []>} : vector<2x32xf32>, vector<32x128xf32>, vector<2x128xf32> -> vector<2x128xf32>
    %392 = arith.addf %389, %391 : vector<2x128xf32>
    %cst_94 = arith.constant dense<0.000000e+00> : vector<2x128xf32>
    %393 = tpu.matmul %388, %326, %cst_94 {dimension_numbers = #tpu.dot_dimension_numbers<[1], [0], [0], [1], [0, 0, 1, 1], [], []>} : vector<2x32xf32>, vector<32x128xf32>, vector<2x128xf32> -> vector<2x128xf32>
    %394 = arith.addf %390, %393 : vector<2x128xf32>
    %395 = arith.negf %392 : vector<2x128xf32>
    %396 = math.exp %395 : vector<2x128xf32>
    %cst_95 = arith.constant 1.000000e+00 : f32
    %397 = vector.broadcast %cst_95 : f32 to vector<2x128xf32>
    %398 = arith.addf %397, %396 : vector<2x128xf32>
    %399 = arith.divf %397, %398 : vector<2x128xf32>
    %400 = vector.extract_strided_slice %399 {offsets = [0, 0], sizes = [2, 32], strides = [1, 1]} : vector<2x128xf32> to vector<2x32xf32>
    %401 = vector.extract_strided_slice %399 {offsets = [0, 32], sizes = [2, 32], strides = [1, 1]} : vector<2x128xf32> to vector<2x32xf32>
    %402 = vector.extract_strided_slice %399 {offsets = [0, 96], sizes = [2, 32], strides = [1, 1]} : vector<2x128xf32> to vector<2x32xf32>
    %403 = vector.extract_strided_slice %392 {offsets = [0, 64], sizes = [2, 32], strides = [1, 1]} : vector<2x128xf32> to vector<2x32xf32>
    %404 = math.tanh %403 : vector<2x32xf32>
    %405 = arith.mulf %401, %371 : vector<2x32xf32>
    %406 = arith.mulf %400, %404 : vector<2x32xf32>
    %407 = arith.addf %405, %406 : vector<2x32xf32>
    %408 = math.tanh %407 : vector<2x32xf32>
    %409 = arith.mulf %402, %408 : vector<2x32xf32>
    %410 = arith.negf %394 : vector<2x128xf32>
    %411 = math.exp %410 : vector<2x128xf32>
    %cst_96 = arith.constant 1.000000e+00 : f32
    %412 = vector.broadcast %cst_96 : f32 to vector<2x128xf32>
    %413 = arith.addf %412, %411 : vector<2x128xf32>
    %414 = arith.divf %412, %413 : vector<2x128xf32>
    %415 = vector.extract_strided_slice %414 {offsets = [0, 0], sizes = [2, 32], strides = [1, 1]} : vector<2x128xf32> to vector<2x32xf32>
    %416 = vector.extract_strided_slice %414 {offsets = [0, 32], sizes = [2, 32], strides = [1, 1]} : vector<2x128xf32> to vector<2x32xf32>
    %417 = vector.extract_strided_slice %414 {offsets = [0, 96], sizes = [2, 32], strides = [1, 1]} : vector<2x128xf32> to vector<2x32xf32>
    %418 = vector.extract_strided_slice %394 {offsets = [0, 64], sizes = [2, 32], strides = [1, 1]} : vector<2x128xf32> to vector<2x32xf32>
    %419 = math.tanh %418 : vector<2x32xf32>
    %420 = arith.mulf %416, %386 : vector<2x32xf32>
    %421 = arith.mulf %415, %419 : vector<2x32xf32>
    %422 = arith.addf %420, %421 : vector<2x32xf32>
    %423 = math.tanh %422 : vector<2x32xf32>
    %424 = arith.mulf %417, %423 : vector<2x32xf32>
    %425 = vector.extract_strided_slice %319 {offsets = [6, 0], sizes = [2, 128], strides = [1, 1]} : vector<16x128xf32> to vector<2x128xf32>
    %426 = vector.extract_strided_slice %324 {offsets = [8, 0], sizes = [2, 128], strides = [1, 1]} : vector<16x128xf32> to vector<2x128xf32>
    %cst_97 = arith.constant dense<0.000000e+00> : vector<2x128xf32>
    %427 = tpu.matmul %409, %325, %cst_97 {dimension_numbers = #tpu.dot_dimension_numbers<[1], [0], [0], [1], [0, 0, 1, 1], [], []>} : vector<2x32xf32>, vector<32x128xf32>, vector<2x128xf32> -> vector<2x128xf32>
    %428 = arith.addf %425, %427 : vector<2x128xf32>
    %cst_98 = arith.constant dense<0.000000e+00> : vector<2x128xf32>
    %429 = tpu.matmul %424, %326, %cst_98 {dimension_numbers = #tpu.dot_dimension_numbers<[1], [0], [0], [1], [0, 0, 1, 1], [], []>} : vector<2x32xf32>, vector<32x128xf32>, vector<2x128xf32> -> vector<2x128xf32>
    %430 = arith.addf %426, %429 : vector<2x128xf32>
    %431 = arith.negf %428 : vector<2x128xf32>
    %432 = math.exp %431 : vector<2x128xf32>
    %cst_99 = arith.constant 1.000000e+00 : f32
    %433 = vector.broadcast %cst_99 : f32 to vector<2x128xf32>
    %434 = arith.addf %433, %432 : vector<2x128xf32>
    %435 = arith.divf %433, %434 : vector<2x128xf32>
    %436 = vector.extract_strided_slice %435 {offsets = [0, 0], sizes = [2, 32], strides = [1, 1]} : vector<2x128xf32> to vector<2x32xf32>
    %437 = vector.extract_strided_slice %435 {offsets = [0, 32], sizes = [2, 32], strides = [1, 1]} : vector<2x128xf32> to vector<2x32xf32>
    %438 = vector.extract_strided_slice %435 {offsets = [0, 96], sizes = [2, 32], strides = [1, 1]} : vector<2x128xf32> to vector<2x32xf32>
    %439 = vector.extract_strided_slice %428 {offsets = [0, 64], sizes = [2, 32], strides = [1, 1]} : vector<2x128xf32> to vector<2x32xf32>
    %440 = math.tanh %439 : vector<2x32xf32>
    %441 = arith.mulf %437, %407 : vector<2x32xf32>
    %442 = arith.mulf %436, %440 : vector<2x32xf32>
    %443 = arith.addf %441, %442 : vector<2x32xf32>
    %444 = math.tanh %443 : vector<2x32xf32>
    %445 = arith.mulf %438, %444 : vector<2x32xf32>
    %446 = arith.negf %430 : vector<2x128xf32>
    %447 = math.exp %446 : vector<2x128xf32>
    %cst_100 = arith.constant 1.000000e+00 : f32
    %448 = vector.broadcast %cst_100 : f32 to vector<2x128xf32>
    %449 = arith.addf %448, %447 : vector<2x128xf32>
    %450 = arith.divf %448, %449 : vector<2x128xf32>
    %451 = vector.extract_strided_slice %450 {offsets = [0, 0], sizes = [2, 32], strides = [1, 1]} : vector<2x128xf32> to vector<2x32xf32>
    %452 = vector.extract_strided_slice %450 {offsets = [0, 32], sizes = [2, 32], strides = [1, 1]} : vector<2x128xf32> to vector<2x32xf32>
    %453 = vector.extract_strided_slice %450 {offsets = [0, 96], sizes = [2, 32], strides = [1, 1]} : vector<2x128xf32> to vector<2x32xf32>
    %454 = vector.extract_strided_slice %430 {offsets = [0, 64], sizes = [2, 32], strides = [1, 1]} : vector<2x128xf32> to vector<2x32xf32>
    %455 = math.tanh %454 : vector<2x32xf32>
    %456 = arith.mulf %452, %422 : vector<2x32xf32>
    %457 = arith.mulf %451, %455 : vector<2x32xf32>
    %458 = arith.addf %456, %457 : vector<2x32xf32>
    %459 = math.tanh %458 : vector<2x32xf32>
    %460 = arith.mulf %453, %459 : vector<2x32xf32>
    %461 = vector.extract_strided_slice %319 {offsets = [8, 0], sizes = [2, 128], strides = [1, 1]} : vector<16x128xf32> to vector<2x128xf32>
    %462 = vector.extract_strided_slice %324 {offsets = [6, 0], sizes = [2, 128], strides = [1, 1]} : vector<16x128xf32> to vector<2x128xf32>
    %cst_101 = arith.constant dense<0.000000e+00> : vector<2x128xf32>
    %463 = tpu.matmul %445, %325, %cst_101 {dimension_numbers = #tpu.dot_dimension_numbers<[1], [0], [0], [1], [0, 0, 1, 1], [], []>} : vector<2x32xf32>, vector<32x128xf32>, vector<2x128xf32> -> vector<2x128xf32>
    %464 = arith.addf %461, %463 : vector<2x128xf32>
    %cst_102 = arith.constant dense<0.000000e+00> : vector<2x128xf32>
    %465 = tpu.matmul %460, %326, %cst_102 {dimension_numbers = #tpu.dot_dimension_numbers<[1], [0], [0], [1], [0, 0, 1, 1], [], []>} : vector<2x32xf32>, vector<32x128xf32>, vector<2x128xf32> -> vector<2x128xf32>
    %466 = arith.addf %462, %465 : vector<2x128xf32>
    %467 = arith.negf %464 : vector<2x128xf32>
    %468 = math.exp %467 : vector<2x128xf32>
    %cst_103 = arith.constant 1.000000e+00 : f32
    %469 = vector.broadcast %cst_103 : f32 to vector<2x128xf32>
    %470 = arith.addf %469, %468 : vector<2x128xf32>
    %471 = arith.divf %469, %470 : vector<2x128xf32>
    %472 = vector.extract_strided_slice %471 {offsets = [0, 0], sizes = [2, 32], strides = [1, 1]} : vector<2x128xf32> to vector<2x32xf32>
    %473 = vector.extract_strided_slice %471 {offsets = [0, 32], sizes = [2, 32], strides = [1, 1]} : vector<2x128xf32> to vector<2x32xf32>
    %474 = vector.extract_strided_slice %471 {offsets = [0, 96], sizes = [2, 32], strides = [1, 1]} : vector<2x128xf32> to vector<2x32xf32>
    %475 = vector.extract_strided_slice %464 {offsets = [0, 64], sizes = [2, 32], strides = [1, 1]} : vector<2x128xf32> to vector<2x32xf32>
    %476 = math.tanh %475 : vector<2x32xf32>
    %477 = arith.mulf %473, %443 : vector<2x32xf32>
    %478 = arith.mulf %472, %476 : vector<2x32xf32>
    %479 = arith.addf %477, %478 : vector<2x32xf32>
    %480 = math.tanh %479 : vector<2x32xf32>
    %481 = arith.mulf %474, %480 : vector<2x32xf32>
    %482 = arith.negf %466 : vector<2x128xf32>
    %483 = math.exp %482 : vector<2x128xf32>
    %cst_104 = arith.constant 1.000000e+00 : f32
    %484 = vector.broadcast %cst_104 : f32 to vector<2x128xf32>
    %485 = arith.addf %484, %483 : vector<2x128xf32>
    %486 = arith.divf %484, %485 : vector<2x128xf32>
    %487 = vector.extract_strided_slice %486 {offsets = [0, 0], sizes = [2, 32], strides = [1, 1]} : vector<2x128xf32> to vector<2x32xf32>
    %488 = vector.extract_strided_slice %486 {offsets = [0, 32], sizes = [2, 32], strides = [1, 1]} : vector<2x128xf32> to vector<2x32xf32>
    %489 = vector.extract_strided_slice %486 {offsets = [0, 96], sizes = [2, 32], strides = [1, 1]} : vector<2x128xf32> to vector<2x32xf32>
    %490 = vector.extract_strided_slice %466 {offsets = [0, 64], sizes = [2, 32], strides = [1, 1]} : vector<2x128xf32> to vector<2x32xf32>
    %491 = math.tanh %490 : vector<2x32xf32>
    %492 = arith.mulf %488, %458 : vector<2x32xf32>
    %493 = arith.mulf %487, %491 : vector<2x32xf32>
    %494 = arith.addf %492, %493 : vector<2x32xf32>
    %495 = math.tanh %494 : vector<2x32xf32>
    %496 = arith.mulf %489, %495 : vector<2x32xf32>
    %497 = vector.extract_strided_slice %319 {offsets = [10, 0], sizes = [2, 128], strides = [1, 1]} : vector<16x128xf32> to vector<2x128xf32>
    %498 = vector.extract_strided_slice %324 {offsets = [4, 0], sizes = [2, 128], strides = [1, 1]} : vector<16x128xf32> to vector<2x128xf32>
    %cst_105 = arith.constant dense<0.000000e+00> : vector<2x128xf32>
    %499 = tpu.matmul %481, %325, %cst_105 {dimension_numbers = #tpu.dot_dimension_numbers<[1], [0], [0], [1], [0, 0, 1, 1], [], []>} : vector<2x32xf32>, vector<32x128xf32>, vector<2x128xf32> -> vector<2x128xf32>
    %500 = arith.addf %497, %499 : vector<2x128xf32>
    %cst_106 = arith.constant dense<0.000000e+00> : vector<2x128xf32>
    %501 = tpu.matmul %496, %326, %cst_106 {dimension_numbers = #tpu.dot_dimension_numbers<[1], [0], [0], [1], [0, 0, 1, 1], [], []>} : vector<2x32xf32>, vector<32x128xf32>, vector<2x128xf32> -> vector<2x128xf32>
    %502 = arith.addf %498, %501 : vector<2x128xf32>
    %503 = arith.negf %500 : vector<2x128xf32>
    %504 = math.exp %503 : vector<2x128xf32>
    %cst_107 = arith.constant 1.000000e+00 : f32
    %505 = vector.broadcast %cst_107 : f32 to vector<2x128xf32>
    %506 = arith.addf %505, %504 : vector<2x128xf32>
    %507 = arith.divf %505, %506 : vector<2x128xf32>
    %508 = vector.extract_strided_slice %507 {offsets = [0, 0], sizes = [2, 32], strides = [1, 1]} : vector<2x128xf32> to vector<2x32xf32>
    %509 = vector.extract_strided_slice %507 {offsets = [0, 32], sizes = [2, 32], strides = [1, 1]} : vector<2x128xf32> to vector<2x32xf32>
    %510 = vector.extract_strided_slice %507 {offsets = [0, 96], sizes = [2, 32], strides = [1, 1]} : vector<2x128xf32> to vector<2x32xf32>
    %511 = vector.extract_strided_slice %500 {offsets = [0, 64], sizes = [2, 32], strides = [1, 1]} : vector<2x128xf32> to vector<2x32xf32>
    %512 = math.tanh %511 : vector<2x32xf32>
    %513 = arith.mulf %509, %479 : vector<2x32xf32>
    %514 = arith.mulf %508, %512 : vector<2x32xf32>
    %515 = arith.addf %513, %514 : vector<2x32xf32>
    %516 = math.tanh %515 : vector<2x32xf32>
    %517 = arith.mulf %510, %516 : vector<2x32xf32>
    %518 = arith.negf %502 : vector<2x128xf32>
    %519 = math.exp %518 : vector<2x128xf32>
    %cst_108 = arith.constant 1.000000e+00 : f32
    %520 = vector.broadcast %cst_108 : f32 to vector<2x128xf32>
    %521 = arith.addf %520, %519 : vector<2x128xf32>
    %522 = arith.divf %520, %521 : vector<2x128xf32>
    %523 = vector.extract_strided_slice %522 {offsets = [0, 0], sizes = [2, 32], strides = [1, 1]} : vector<2x128xf32> to vector<2x32xf32>
    %524 = vector.extract_strided_slice %522 {offsets = [0, 32], sizes = [2, 32], strides = [1, 1]} : vector<2x128xf32> to vector<2x32xf32>
    %525 = vector.extract_strided_slice %522 {offsets = [0, 96], sizes = [2, 32], strides = [1, 1]} : vector<2x128xf32> to vector<2x32xf32>
    %526 = vector.extract_strided_slice %502 {offsets = [0, 64], sizes = [2, 32], strides = [1, 1]} : vector<2x128xf32> to vector<2x32xf32>
    %527 = math.tanh %526 : vector<2x32xf32>
    %528 = arith.mulf %524, %494 : vector<2x32xf32>
    %529 = arith.mulf %523, %527 : vector<2x32xf32>
    %530 = arith.addf %528, %529 : vector<2x32xf32>
    %531 = math.tanh %530 : vector<2x32xf32>
    %532 = arith.mulf %525, %531 : vector<2x32xf32>
    %533 = vector.extract_strided_slice %319 {offsets = [12, 0], sizes = [2, 128], strides = [1, 1]} : vector<16x128xf32> to vector<2x128xf32>
    %534 = vector.extract_strided_slice %324 {offsets = [2, 0], sizes = [2, 128], strides = [1, 1]} : vector<16x128xf32> to vector<2x128xf32>
    %cst_109 = arith.constant dense<0.000000e+00> : vector<2x128xf32>
    %535 = tpu.matmul %517, %325, %cst_109 {dimension_numbers = #tpu.dot_dimension_numbers<[1], [0], [0], [1], [0, 0, 1, 1], [], []>} : vector<2x32xf32>, vector<32x128xf32>, vector<2x128xf32> -> vector<2x128xf32>
    %536 = arith.addf %533, %535 : vector<2x128xf32>
    %cst_110 = arith.constant dense<0.000000e+00> : vector<2x128xf32>
    %537 = tpu.matmul %532, %326, %cst_110 {dimension_numbers = #tpu.dot_dimension_numbers<[1], [0], [0], [1], [0, 0, 1, 1], [], []>} : vector<2x32xf32>, vector<32x128xf32>, vector<2x128xf32> -> vector<2x128xf32>
    %538 = arith.addf %534, %537 : vector<2x128xf32>
    %539 = arith.negf %536 : vector<2x128xf32>
    %540 = math.exp %539 : vector<2x128xf32>
    %cst_111 = arith.constant 1.000000e+00 : f32
    %541 = vector.broadcast %cst_111 : f32 to vector<2x128xf32>
    %542 = arith.addf %541, %540 : vector<2x128xf32>
    %543 = arith.divf %541, %542 : vector<2x128xf32>
    %544 = vector.extract_strided_slice %543 {offsets = [0, 0], sizes = [2, 32], strides = [1, 1]} : vector<2x128xf32> to vector<2x32xf32>
    %545 = vector.extract_strided_slice %543 {offsets = [0, 32], sizes = [2, 32], strides = [1, 1]} : vector<2x128xf32> to vector<2x32xf32>
    %546 = vector.extract_strided_slice %543 {offsets = [0, 96], sizes = [2, 32], strides = [1, 1]} : vector<2x128xf32> to vector<2x32xf32>
    %547 = vector.extract_strided_slice %536 {offsets = [0, 64], sizes = [2, 32], strides = [1, 1]} : vector<2x128xf32> to vector<2x32xf32>
    %548 = math.tanh %547 : vector<2x32xf32>
    %549 = arith.mulf %545, %515 : vector<2x32xf32>
    %550 = arith.mulf %544, %548 : vector<2x32xf32>
    %551 = arith.addf %549, %550 : vector<2x32xf32>
    %552 = math.tanh %551 : vector<2x32xf32>
    %553 = arith.mulf %546, %552 : vector<2x32xf32>
    %554 = arith.negf %538 : vector<2x128xf32>
    %555 = math.exp %554 : vector<2x128xf32>
    %cst_112 = arith.constant 1.000000e+00 : f32
    %556 = vector.broadcast %cst_112 : f32 to vector<2x128xf32>
    %557 = arith.addf %556, %555 : vector<2x128xf32>
    %558 = arith.divf %556, %557 : vector<2x128xf32>
    %559 = vector.extract_strided_slice %558 {offsets = [0, 0], sizes = [2, 32], strides = [1, 1]} : vector<2x128xf32> to vector<2x32xf32>
    %560 = vector.extract_strided_slice %558 {offsets = [0, 32], sizes = [2, 32], strides = [1, 1]} : vector<2x128xf32> to vector<2x32xf32>
    %561 = vector.extract_strided_slice %558 {offsets = [0, 96], sizes = [2, 32], strides = [1, 1]} : vector<2x128xf32> to vector<2x32xf32>
    %562 = vector.extract_strided_slice %538 {offsets = [0, 64], sizes = [2, 32], strides = [1, 1]} : vector<2x128xf32> to vector<2x32xf32>
    %563 = math.tanh %562 : vector<2x32xf32>
    %564 = arith.mulf %560, %530 : vector<2x32xf32>
    %565 = arith.mulf %559, %563 : vector<2x32xf32>
    %566 = arith.addf %564, %565 : vector<2x32xf32>
    %567 = math.tanh %566 : vector<2x32xf32>
    %568 = arith.mulf %561, %567 : vector<2x32xf32>
    %569 = vector.extract_strided_slice %319 {offsets = [14, 0], sizes = [2, 128], strides = [1, 1]} : vector<16x128xf32> to vector<2x128xf32>
    %570 = vector.extract_strided_slice %324 {offsets = [0, 0], sizes = [2, 128], strides = [1, 1]} : vector<16x128xf32> to vector<2x128xf32>
    %cst_113 = arith.constant dense<0.000000e+00> : vector<2x128xf32>
    %571 = tpu.matmul %553, %325, %cst_113 {dimension_numbers = #tpu.dot_dimension_numbers<[1], [0], [0], [1], [0, 0, 1, 1], [], []>} : vector<2x32xf32>, vector<32x128xf32>, vector<2x128xf32> -> vector<2x128xf32>
    %572 = arith.addf %569, %571 : vector<2x128xf32>
    %cst_114 = arith.constant dense<0.000000e+00> : vector<2x128xf32>
    %573 = tpu.matmul %568, %326, %cst_114 {dimension_numbers = #tpu.dot_dimension_numbers<[1], [0], [0], [1], [0, 0, 1, 1], [], []>} : vector<2x32xf32>, vector<32x128xf32>, vector<2x128xf32> -> vector<2x128xf32>
    %574 = arith.addf %570, %573 : vector<2x128xf32>
    %575 = arith.negf %572 : vector<2x128xf32>
    %576 = math.exp %575 : vector<2x128xf32>
    %cst_115 = arith.constant 1.000000e+00 : f32
    %577 = vector.broadcast %cst_115 : f32 to vector<2x128xf32>
    %578 = arith.addf %577, %576 : vector<2x128xf32>
    %579 = arith.divf %577, %578 : vector<2x128xf32>
    %580 = vector.extract_strided_slice %579 {offsets = [0, 0], sizes = [2, 32], strides = [1, 1]} : vector<2x128xf32> to vector<2x32xf32>
    %581 = vector.extract_strided_slice %579 {offsets = [0, 32], sizes = [2, 32], strides = [1, 1]} : vector<2x128xf32> to vector<2x32xf32>
    %582 = vector.extract_strided_slice %579 {offsets = [0, 96], sizes = [2, 32], strides = [1, 1]} : vector<2x128xf32> to vector<2x32xf32>
    %583 = vector.extract_strided_slice %572 {offsets = [0, 64], sizes = [2, 32], strides = [1, 1]} : vector<2x128xf32> to vector<2x32xf32>
    %584 = math.tanh %583 : vector<2x32xf32>
    %585 = arith.mulf %581, %551 : vector<2x32xf32>
    %586 = arith.mulf %580, %584 : vector<2x32xf32>
    %587 = arith.addf %585, %586 : vector<2x32xf32>
    %588 = math.tanh %587 : vector<2x32xf32>
    %589 = arith.mulf %582, %588 : vector<2x32xf32>
    %590 = arith.negf %574 : vector<2x128xf32>
    %591 = math.exp %590 : vector<2x128xf32>
    %cst_116 = arith.constant 1.000000e+00 : f32
    %592 = vector.broadcast %cst_116 : f32 to vector<2x128xf32>
    %593 = arith.addf %592, %591 : vector<2x128xf32>
    %594 = arith.divf %592, %593 : vector<2x128xf32>
    %595 = vector.extract_strided_slice %594 {offsets = [0, 0], sizes = [2, 32], strides = [1, 1]} : vector<2x128xf32> to vector<2x32xf32>
    %596 = vector.extract_strided_slice %594 {offsets = [0, 32], sizes = [2, 32], strides = [1, 1]} : vector<2x128xf32> to vector<2x32xf32>
    %597 = vector.extract_strided_slice %594 {offsets = [0, 96], sizes = [2, 32], strides = [1, 1]} : vector<2x128xf32> to vector<2x32xf32>
    %598 = vector.extract_strided_slice %574 {offsets = [0, 64], sizes = [2, 32], strides = [1, 1]} : vector<2x128xf32> to vector<2x32xf32>
    %599 = math.tanh %598 : vector<2x32xf32>
    %600 = arith.mulf %596, %566 : vector<2x32xf32>
    %601 = arith.mulf %595, %599 : vector<2x32xf32>
    %602 = arith.addf %600, %601 : vector<2x32xf32>
    %603 = math.tanh %602 : vector<2x32xf32>
    %604 = arith.mulf %597, %603 : vector<2x32xf32>
    %c0_117 = arith.constant 0 : index
    %c0_118 = arith.constant 0 : index
    %605 = vector.load %arg17[%c0_117, %c0_118] : memref<1x64xf32, #tpu.memory_space<vmem>>, vector<1x64xf32>
    %606 = vector.extract_strided_slice %605 {offsets = [0, 0], sizes = [1, 32], strides = [1, 1]} : vector<1x64xf32> to vector<1x32xf32>
    %607 = vector.extract_strided_slice %605 {offsets = [0, 32], sizes = [1, 32], strides = [1, 1]} : vector<1x64xf32> to vector<1x32xf32>
    %c0_119 = arith.constant 0 : index
    %c0_120 = arith.constant 0 : index
    %608 = vector.load %arg18[%c0_119, %c0_120] : memref<1x1xf32, #tpu.memory_space<vmem>>, vector<1x1xf32>
    %609 = vector.extract %608[0, 0] : f32 from vector<1x1xf32>
    %c0_121 = arith.constant 0 : index
    %c0_122 = arith.constant 0 : index
    %610 = vector.load %arg1[%c0_121, %c0_122] : memref<16x1xf32, #tpu.memory_space<vmem>>, vector<16x1xf32>
    %611 = vector.broadcast %606 : vector<1x32xf32> to vector<2x32xf32>
    %612 = arith.mulf %340, %611 : vector<2x32xf32>
    %cst_123 = arith.constant dense<0.000000e+00> : vector<2xf32>
    %613 = vector.multi_reduction <add>, %612, %cst_123 [1] : vector<2x32xf32> to vector<2xf32>
    %614 = vector.shape_cast %613 : vector<2xf32> to vector<2x1xf32>
    %615 = vector.broadcast %607 : vector<1x32xf32> to vector<2x32xf32>
    %616 = arith.mulf %604, %615 : vector<2x32xf32>
    %cst_124 = arith.constant dense<0.000000e+00> : vector<2xf32>
    %617 = vector.multi_reduction <add>, %616, %cst_124 [1] : vector<2x32xf32> to vector<2xf32>
    %618 = vector.shape_cast %617 : vector<2xf32> to vector<2x1xf32>
    %619 = arith.addf %614, %618 : vector<2x1xf32>
    %620 = vector.broadcast %609 : f32 to vector<2x1xf32>
    %621 = arith.addf %619, %620 : vector<2x1xf32>
    %622 = math.tanh %621 : vector<2x1xf32>
    %623 = vector.extract_strided_slice %610 {offsets = [0, 0], sizes = [2, 1], strides = [1, 1]} : vector<16x1xf32> to vector<2x1xf32>
    %cst_125 = arith.constant 0.000000e+00 : f32
    %624 = vector.broadcast %cst_125 : f32 to vector<2x1xf32>
    %625 = arith.cmpf oeq, %623, %624 : vector<2x1xf32>
    %cst_126 = arith.constant -1.000000e+09 : f32
    %626 = vector.broadcast %cst_126 : f32 to vector<2x1xf32>
    %627 = arith.select %625, %626, %622 : vector<2x1xi1>, vector<2x1xf32>
    %628 = vector.broadcast %606 : vector<1x32xf32> to vector<2x32xf32>
    %629 = arith.mulf %373, %628 : vector<2x32xf32>
    %cst_127 = arith.constant dense<0.000000e+00> : vector<2xf32>
    %630 = vector.multi_reduction <add>, %629, %cst_127 [1] : vector<2x32xf32> to vector<2xf32>
    %631 = vector.shape_cast %630 : vector<2xf32> to vector<2x1xf32>
    %632 = vector.broadcast %607 : vector<1x32xf32> to vector<2x32xf32>
    %633 = arith.mulf %568, %632 : vector<2x32xf32>
    %cst_128 = arith.constant dense<0.000000e+00> : vector<2xf32>
    %634 = vector.multi_reduction <add>, %633, %cst_128 [1] : vector<2x32xf32> to vector<2xf32>
    %635 = vector.shape_cast %634 : vector<2xf32> to vector<2x1xf32>
    %636 = arith.addf %631, %635 : vector<2x1xf32>
    %637 = vector.broadcast %609 : f32 to vector<2x1xf32>
    %638 = arith.addf %636, %637 : vector<2x1xf32>
    %639 = math.tanh %638 : vector<2x1xf32>
    %640 = vector.extract_strided_slice %610 {offsets = [2, 0], sizes = [2, 1], strides = [1, 1]} : vector<16x1xf32> to vector<2x1xf32>
    %cst_129 = arith.constant 0.000000e+00 : f32
    %641 = vector.broadcast %cst_129 : f32 to vector<2x1xf32>
    %642 = arith.cmpf oeq, %640, %641 : vector<2x1xf32>
    %cst_130 = arith.constant -1.000000e+09 : f32
    %643 = vector.broadcast %cst_130 : f32 to vector<2x1xf32>
    %644 = arith.select %642, %643, %639 : vector<2x1xi1>, vector<2x1xf32>
    %645 = vector.broadcast %606 : vector<1x32xf32> to vector<2x32xf32>
    %646 = arith.mulf %409, %645 : vector<2x32xf32>
    %cst_131 = arith.constant dense<0.000000e+00> : vector<2xf32>
    %647 = vector.multi_reduction <add>, %646, %cst_131 [1] : vector<2x32xf32> to vector<2xf32>
    %648 = vector.shape_cast %647 : vector<2xf32> to vector<2x1xf32>
    %649 = vector.broadcast %607 : vector<1x32xf32> to vector<2x32xf32>
    %650 = arith.mulf %532, %649 : vector<2x32xf32>
    %cst_132 = arith.constant dense<0.000000e+00> : vector<2xf32>
    %651 = vector.multi_reduction <add>, %650, %cst_132 [1] : vector<2x32xf32> to vector<2xf32>
    %652 = vector.shape_cast %651 : vector<2xf32> to vector<2x1xf32>
    %653 = arith.addf %648, %652 : vector<2x1xf32>
    %654 = vector.broadcast %609 : f32 to vector<2x1xf32>
    %655 = arith.addf %653, %654 : vector<2x1xf32>
    %656 = math.tanh %655 : vector<2x1xf32>
    %657 = vector.extract_strided_slice %610 {offsets = [4, 0], sizes = [2, 1], strides = [1, 1]} : vector<16x1xf32> to vector<2x1xf32>
    %cst_133 = arith.constant 0.000000e+00 : f32
    %658 = vector.broadcast %cst_133 : f32 to vector<2x1xf32>
    %659 = arith.cmpf oeq, %657, %658 : vector<2x1xf32>
    %cst_134 = arith.constant -1.000000e+09 : f32
    %660 = vector.broadcast %cst_134 : f32 to vector<2x1xf32>
    %661 = arith.select %659, %660, %656 : vector<2x1xi1>, vector<2x1xf32>
    %662 = vector.broadcast %606 : vector<1x32xf32> to vector<2x32xf32>
    %663 = arith.mulf %445, %662 : vector<2x32xf32>
    %cst_135 = arith.constant dense<0.000000e+00> : vector<2xf32>
    %664 = vector.multi_reduction <add>, %663, %cst_135 [1] : vector<2x32xf32> to vector<2xf32>
    %665 = vector.shape_cast %664 : vector<2xf32> to vector<2x1xf32>
    %666 = vector.broadcast %607 : vector<1x32xf32> to vector<2x32xf32>
    %667 = arith.mulf %496, %666 : vector<2x32xf32>
    %cst_136 = arith.constant dense<0.000000e+00> : vector<2xf32>
    %668 = vector.multi_reduction <add>, %667, %cst_136 [1] : vector<2x32xf32> to vector<2xf32>
    %669 = vector.shape_cast %668 : vector<2xf32> to vector<2x1xf32>
    %670 = arith.addf %665, %669 : vector<2x1xf32>
    %671 = vector.broadcast %609 : f32 to vector<2x1xf32>
    %672 = arith.addf %670, %671 : vector<2x1xf32>
    %673 = math.tanh %672 : vector<2x1xf32>
    %674 = vector.extract_strided_slice %610 {offsets = [6, 0], sizes = [2, 1], strides = [1, 1]} : vector<16x1xf32> to vector<2x1xf32>
    %cst_137 = arith.constant 0.000000e+00 : f32
    %675 = vector.broadcast %cst_137 : f32 to vector<2x1xf32>
    %676 = arith.cmpf oeq, %674, %675 : vector<2x1xf32>
    %cst_138 = arith.constant -1.000000e+09 : f32
    %677 = vector.broadcast %cst_138 : f32 to vector<2x1xf32>
    %678 = arith.select %676, %677, %673 : vector<2x1xi1>, vector<2x1xf32>
    %679 = vector.broadcast %606 : vector<1x32xf32> to vector<2x32xf32>
    %680 = arith.mulf %481, %679 : vector<2x32xf32>
    %cst_139 = arith.constant dense<0.000000e+00> : vector<2xf32>
    %681 = vector.multi_reduction <add>, %680, %cst_139 [1] : vector<2x32xf32> to vector<2xf32>
    %682 = vector.shape_cast %681 : vector<2xf32> to vector<2x1xf32>
    %683 = vector.broadcast %607 : vector<1x32xf32> to vector<2x32xf32>
    %684 = arith.mulf %460, %683 : vector<2x32xf32>
    %cst_140 = arith.constant dense<0.000000e+00> : vector<2xf32>
    %685 = vector.multi_reduction <add>, %684, %cst_140 [1] : vector<2x32xf32> to vector<2xf32>
    %686 = vector.shape_cast %685 : vector<2xf32> to vector<2x1xf32>
    %687 = arith.addf %682, %686 : vector<2x1xf32>
    %688 = vector.broadcast %609 : f32 to vector<2x1xf32>
    %689 = arith.addf %687, %688 : vector<2x1xf32>
    %690 = math.tanh %689 : vector<2x1xf32>
    %691 = vector.extract_strided_slice %610 {offsets = [8, 0], sizes = [2, 1], strides = [1, 1]} : vector<16x1xf32> to vector<2x1xf32>
    %cst_141 = arith.constant 0.000000e+00 : f32
    %692 = vector.broadcast %cst_141 : f32 to vector<2x1xf32>
    %693 = arith.cmpf oeq, %691, %692 : vector<2x1xf32>
    %cst_142 = arith.constant -1.000000e+09 : f32
    %694 = vector.broadcast %cst_142 : f32 to vector<2x1xf32>
    %695 = arith.select %693, %694, %690 : vector<2x1xi1>, vector<2x1xf32>
    %696 = vector.broadcast %606 : vector<1x32xf32> to vector<2x32xf32>
    %697 = arith.mulf %517, %696 : vector<2x32xf32>
    %cst_143 = arith.constant dense<0.000000e+00> : vector<2xf32>
    %698 = vector.multi_reduction <add>, %697, %cst_143 [1] : vector<2x32xf32> to vector<2xf32>
    %699 = vector.shape_cast %698 : vector<2xf32> to vector<2x1xf32>
    %700 = vector.broadcast %607 : vector<1x32xf32> to vector<2x32xf32>
    %701 = arith.mulf %424, %700 : vector<2x32xf32>
    %cst_144 = arith.constant dense<0.000000e+00> : vector<2xf32>
    %702 = vector.multi_reduction <add>, %701, %cst_144 [1] : vector<2x32xf32> to vector<2xf32>
    %703 = vector.shape_cast %702 : vector<2xf32> to vector<2x1xf32>
    %704 = arith.addf %699, %703 : vector<2x1xf32>
    %705 = vector.broadcast %609 : f32 to vector<2x1xf32>
    %706 = arith.addf %704, %705 : vector<2x1xf32>
    %707 = math.tanh %706 : vector<2x1xf32>
    %708 = vector.extract_strided_slice %610 {offsets = [10, 0], sizes = [2, 1], strides = [1, 1]} : vector<16x1xf32> to vector<2x1xf32>
    %cst_145 = arith.constant 0.000000e+00 : f32
    %709 = vector.broadcast %cst_145 : f32 to vector<2x1xf32>
    %710 = arith.cmpf oeq, %708, %709 : vector<2x1xf32>
    %cst_146 = arith.constant -1.000000e+09 : f32
    %711 = vector.broadcast %cst_146 : f32 to vector<2x1xf32>
    %712 = arith.select %710, %711, %707 : vector<2x1xi1>, vector<2x1xf32>
    %713 = vector.broadcast %606 : vector<1x32xf32> to vector<2x32xf32>
    %714 = arith.mulf %553, %713 : vector<2x32xf32>
    %cst_147 = arith.constant dense<0.000000e+00> : vector<2xf32>
    %715 = vector.multi_reduction <add>, %714, %cst_147 [1] : vector<2x32xf32> to vector<2xf32>
    %716 = vector.shape_cast %715 : vector<2xf32> to vector<2x1xf32>
    %717 = vector.broadcast %607 : vector<1x32xf32> to vector<2x32xf32>
    %718 = arith.mulf %388, %717 : vector<2x32xf32>
    %cst_148 = arith.constant dense<0.000000e+00> : vector<2xf32>
    %719 = vector.multi_reduction <add>, %718, %cst_148 [1] : vector<2x32xf32> to vector<2xf32>
    %720 = vector.shape_cast %719 : vector<2xf32> to vector<2x1xf32>
    %721 = arith.addf %716, %720 : vector<2x1xf32>
    %722 = vector.broadcast %609 : f32 to vector<2x1xf32>
    %723 = arith.addf %721, %722 : vector<2x1xf32>
    %724 = math.tanh %723 : vector<2x1xf32>
    %725 = vector.extract_strided_slice %610 {offsets = [12, 0], sizes = [2, 1], strides = [1, 1]} : vector<16x1xf32> to vector<2x1xf32>
    %cst_149 = arith.constant 0.000000e+00 : f32
    %726 = vector.broadcast %cst_149 : f32 to vector<2x1xf32>
    %727 = arith.cmpf oeq, %725, %726 : vector<2x1xf32>
    %cst_150 = arith.constant -1.000000e+09 : f32
    %728 = vector.broadcast %cst_150 : f32 to vector<2x1xf32>
    %729 = arith.select %727, %728, %724 : vector<2x1xi1>, vector<2x1xf32>
    %730 = vector.broadcast %606 : vector<1x32xf32> to vector<2x32xf32>
    %731 = arith.mulf %589, %730 : vector<2x32xf32>
    %cst_151 = arith.constant dense<0.000000e+00> : vector<2xf32>
    %732 = vector.multi_reduction <add>, %731, %cst_151 [1] : vector<2x32xf32> to vector<2xf32>
    %733 = vector.shape_cast %732 : vector<2xf32> to vector<2x1xf32>
    %734 = vector.broadcast %607 : vector<1x32xf32> to vector<2x32xf32>
    %735 = arith.mulf %352, %734 : vector<2x32xf32>
    %cst_152 = arith.constant dense<0.000000e+00> : vector<2xf32>
    %736 = vector.multi_reduction <add>, %735, %cst_152 [1] : vector<2x32xf32> to vector<2xf32>
    %737 = vector.shape_cast %736 : vector<2xf32> to vector<2x1xf32>
    %738 = arith.addf %733, %737 : vector<2x1xf32>
    %739 = vector.broadcast %609 : f32 to vector<2x1xf32>
    %740 = arith.addf %738, %739 : vector<2x1xf32>
    %741 = math.tanh %740 : vector<2x1xf32>
    %742 = vector.extract_strided_slice %610 {offsets = [14, 0], sizes = [2, 1], strides = [1, 1]} : vector<16x1xf32> to vector<2x1xf32>
    %cst_153 = arith.constant 0.000000e+00 : f32
    %743 = vector.broadcast %cst_153 : f32 to vector<2x1xf32>
    %744 = arith.cmpf oeq, %742, %743 : vector<2x1xf32>
    %cst_154 = arith.constant -1.000000e+09 : f32
    %745 = vector.broadcast %cst_154 : f32 to vector<2x1xf32>
    %746 = arith.select %744, %745, %741 : vector<2x1xi1>, vector<2x1xf32>
    %747 = arith.maximumf %627, %644 : vector<2x1xf32>
    %748 = arith.maximumf %747, %661 : vector<2x1xf32>
    %749 = arith.maximumf %748, %678 : vector<2x1xf32>
    %750 = arith.maximumf %749, %695 : vector<2x1xf32>
    %751 = arith.maximumf %750, %712 : vector<2x1xf32>
    %752 = arith.maximumf %751, %729 : vector<2x1xf32>
    %753 = arith.maximumf %752, %746 : vector<2x1xf32>
    %754 = arith.subf %627, %753 : vector<2x1xf32>
    %755 = math.exp %754 : vector<2x1xf32>
    %756 = arith.subf %644, %753 : vector<2x1xf32>
    %757 = math.exp %756 : vector<2x1xf32>
    %758 = arith.subf %661, %753 : vector<2x1xf32>
    %759 = math.exp %758 : vector<2x1xf32>
    %760 = arith.subf %678, %753 : vector<2x1xf32>
    %761 = math.exp %760 : vector<2x1xf32>
    %762 = arith.subf %695, %753 : vector<2x1xf32>
    %763 = math.exp %762 : vector<2x1xf32>
    %764 = arith.subf %712, %753 : vector<2x1xf32>
    %765 = math.exp %764 : vector<2x1xf32>
    %766 = arith.subf %729, %753 : vector<2x1xf32>
    %767 = math.exp %766 : vector<2x1xf32>
    %768 = arith.subf %746, %753 : vector<2x1xf32>
    %769 = math.exp %768 : vector<2x1xf32>
    %770 = arith.addf %755, %757 : vector<2x1xf32>
    %771 = arith.addf %770, %759 : vector<2x1xf32>
    %772 = arith.addf %771, %761 : vector<2x1xf32>
    %773 = arith.addf %772, %763 : vector<2x1xf32>
    %774 = arith.addf %773, %765 : vector<2x1xf32>
    %775 = arith.addf %774, %767 : vector<2x1xf32>
    %776 = arith.addf %775, %769 : vector<2x1xf32>
    %cst_155 = arith.constant 1.000000e+00 : f32
    %777 = vector.broadcast %cst_155 : f32 to vector<2x1xf32>
    %778 = arith.divf %777, %776 : vector<2x1xf32>
    %779 = vector.broadcast %755 : vector<2x1xf32> to vector<2x32xf32>
    %780 = arith.mulf %779, %340 : vector<2x32xf32>
    %781 = vector.broadcast %755 : vector<2x1xf32> to vector<2x32xf32>
    %782 = arith.mulf %781, %604 : vector<2x32xf32>
    %783 = vector.broadcast %757 : vector<2x1xf32> to vector<2x32xf32>
    %784 = arith.mulf %783, %373 : vector<2x32xf32>
    %785 = arith.addf %780, %784 : vector<2x32xf32>
    %786 = vector.broadcast %757 : vector<2x1xf32> to vector<2x32xf32>
    %787 = arith.mulf %786, %568 : vector<2x32xf32>
    %788 = arith.addf %782, %787 : vector<2x32xf32>
    %789 = vector.broadcast %759 : vector<2x1xf32> to vector<2x32xf32>
    %790 = arith.mulf %789, %409 : vector<2x32xf32>
    %791 = arith.addf %785, %790 : vector<2x32xf32>
    %792 = vector.broadcast %759 : vector<2x1xf32> to vector<2x32xf32>
    %793 = arith.mulf %792, %532 : vector<2x32xf32>
    %794 = arith.addf %788, %793 : vector<2x32xf32>
    %795 = vector.broadcast %761 : vector<2x1xf32> to vector<2x32xf32>
    %796 = arith.mulf %795, %445 : vector<2x32xf32>
    %797 = arith.addf %791, %796 : vector<2x32xf32>
    %798 = vector.broadcast %761 : vector<2x1xf32> to vector<2x32xf32>
    %799 = arith.mulf %798, %496 : vector<2x32xf32>
    %800 = arith.addf %794, %799 : vector<2x32xf32>
    %801 = vector.broadcast %763 : vector<2x1xf32> to vector<2x32xf32>
    %802 = arith.mulf %801, %481 : vector<2x32xf32>
    %803 = arith.addf %797, %802 : vector<2x32xf32>
    %804 = vector.broadcast %763 : vector<2x1xf32> to vector<2x32xf32>
    %805 = arith.mulf %804, %460 : vector<2x32xf32>
    %806 = arith.addf %800, %805 : vector<2x32xf32>
    %807 = vector.broadcast %765 : vector<2x1xf32> to vector<2x32xf32>
    %808 = arith.mulf %807, %517 : vector<2x32xf32>
    %809 = arith.addf %803, %808 : vector<2x32xf32>
    %810 = vector.broadcast %765 : vector<2x1xf32> to vector<2x32xf32>
    %811 = arith.mulf %810, %424 : vector<2x32xf32>
    %812 = arith.addf %806, %811 : vector<2x32xf32>
    %813 = vector.broadcast %767 : vector<2x1xf32> to vector<2x32xf32>
    %814 = arith.mulf %813, %553 : vector<2x32xf32>
    %815 = arith.addf %809, %814 : vector<2x32xf32>
    %816 = vector.broadcast %767 : vector<2x1xf32> to vector<2x32xf32>
    %817 = arith.mulf %816, %388 : vector<2x32xf32>
    %818 = arith.addf %812, %817 : vector<2x32xf32>
    %819 = vector.broadcast %769 : vector<2x1xf32> to vector<2x32xf32>
    %820 = arith.mulf %819, %589 : vector<2x32xf32>
    %821 = arith.addf %815, %820 : vector<2x32xf32>
    %822 = vector.broadcast %769 : vector<2x1xf32> to vector<2x32xf32>
    %823 = arith.mulf %822, %352 : vector<2x32xf32>
    %824 = arith.addf %818, %823 : vector<2x32xf32>
    %825 = vector.broadcast %778 : vector<2x1xf32> to vector<2x32xf32>
    %826 = arith.mulf %821, %825 : vector<2x32xf32>
    %827 = vector.broadcast %778 : vector<2x1xf32> to vector<2x32xf32>
    %828 = arith.mulf %824, %827 : vector<2x32xf32>
    %c0_156 = arith.constant 0 : index
    %c0_157 = arith.constant 0 : index
    %829 = vector.load %arg2[%c0_156, %c0_157] : memref<2x8xf32, #tpu.memory_space<vmem>>, vector<2x8xf32>
    %c0_158 = arith.constant 0 : index
    %c0_159 = arith.constant 0 : index
    %830 = vector.load %arg19[%c0_158, %c0_159] : memref<8x64xf32, #tpu.memory_space<vmem>>, vector<8x64xf32>
    %cst_160 = arith.constant dense<0.000000e+00> : vector<2x64xf32>
    %831 = tpu.matmul %829, %830, %cst_160 {dimension_numbers = #tpu.dot_dimension_numbers<[1], [0], [0], [1], [0, 0, 1, 1], [], []>} : vector<2x8xf32>, vector<8x64xf32>, vector<2x64xf32> -> vector<2x64xf32>
    %c0_161 = arith.constant 0 : index
    %c0_162 = arith.constant 0 : index
    %832 = vector.load %arg20[%c0_161, %c0_162] : memref<1x64xf32, #tpu.memory_space<vmem>>, vector<1x64xf32>
    %833 = vector.broadcast %832 : vector<1x64xf32> to vector<2x64xf32>
    %834 = arith.addf %831, %833 : vector<2x64xf32>
    %cst_163 = arith.constant 0.000000e+00 : f32
    %835 = vector.broadcast %cst_163 : f32 to vector<2x64xf32>
    %836 = arith.maximumf %834, %835 : vector<2x64xf32>
    %c0_164 = arith.constant 0 : index
    %c0_165 = arith.constant 0 : index
    %837 = vector.load %arg3[%c0_164, %c0_165] : memref<2x1xf32, #tpu.memory_space<vmem>>, vector<2x1xf32>
    %c0_166 = arith.constant 0 : index
    %c0_167 = arith.constant 0 : index
    %838 = vector.load %arg21[%c0_166, %c0_167] : memref<1x16xf32, #tpu.memory_space<vmem>>, vector<1x16xf32>
    %839 = vector.broadcast %837 : vector<2x1xf32> to vector<2x16xf32>
    %840 = vector.broadcast %838 : vector<1x16xf32> to vector<2x16xf32>
    %841 = arith.mulf %839, %840 : vector<2x16xf32>
    %c0_168 = arith.constant 0 : index
    %c0_169 = arith.constant 0 : index
    %842 = vector.load %arg22[%c0_168, %c0_169] : memref<1x16xf32, #tpu.memory_space<vmem>>, vector<1x16xf32>
    %843 = vector.broadcast %842 : vector<1x16xf32> to vector<2x16xf32>
    %844 = arith.addf %841, %843 : vector<2x16xf32>
    %cst_170 = arith.constant 0.000000e+00 : f32
    %845 = vector.broadcast %cst_170 : f32 to vector<2x16xf32>
    %846 = arith.maximumf %844, %845 : vector<2x16xf32>
    %c0_171 = arith.constant 0 : index
    %c0_172 = arith.constant 0 : index
    %847 = vector.load %arg23[%c0_171, %c0_172] : memref<64x128xf32, #tpu.memory_space<vmem>>, vector<64x128xf32>
    %848 = vector.extract_strided_slice %847 {offsets = [0, 0], sizes = [32, 128], strides = [1, 1]} : vector<64x128xf32> to vector<32x128xf32>
    %cst_173 = arith.constant dense<0.000000e+00> : vector<2x128xf32>
    %849 = tpu.matmul %826, %848, %cst_173 {dimension_numbers = #tpu.dot_dimension_numbers<[1], [0], [0], [1], [0, 0, 1, 1], [], []>} : vector<2x32xf32>, vector<32x128xf32>, vector<2x128xf32> -> vector<2x128xf32>
    %850 = vector.extract_strided_slice %847 {offsets = [32, 0], sizes = [32, 128], strides = [1, 1]} : vector<64x128xf32> to vector<32x128xf32>
    %cst_174 = arith.constant dense<0.000000e+00> : vector<2x128xf32>
    %851 = tpu.matmul %828, %850, %cst_174 {dimension_numbers = #tpu.dot_dimension_numbers<[1], [0], [0], [1], [0, 0, 1, 1], [], []>} : vector<2x32xf32>, vector<32x128xf32>, vector<2x128xf32> -> vector<2x128xf32>
    %852 = arith.addf %849, %851 : vector<2x128xf32>
    %c0_175 = arith.constant 0 : index
    %c0_176 = arith.constant 0 : index
    %853 = vector.load %arg24[%c0_175, %c0_176] : memref<64x128xf32, #tpu.memory_space<vmem>>, vector<64x128xf32>
    %cst_177 = arith.constant dense<0.000000e+00> : vector<2x128xf32>
    %854 = tpu.matmul %836, %853, %cst_177 {dimension_numbers = #tpu.dot_dimension_numbers<[1], [0], [0], [1], [0, 0, 1, 1], [], []>} : vector<2x64xf32>, vector<64x128xf32>, vector<2x128xf32> -> vector<2x128xf32>
    %855 = arith.addf %852, %854 : vector<2x128xf32>
    %c0_178 = arith.constant 0 : index
    %c0_179 = arith.constant 0 : index
    %856 = vector.load %arg25[%c0_178, %c0_179] : memref<16x128xf32, #tpu.memory_space<vmem>>, vector<16x128xf32>
    %cst_180 = arith.constant dense<0.000000e+00> : vector<2x128xf32>
    %857 = tpu.matmul %846, %856, %cst_180 {dimension_numbers = #tpu.dot_dimension_numbers<[1], [0], [0], [1], [0, 0, 1, 1], [], []>} : vector<2x16xf32>, vector<16x128xf32>, vector<2x128xf32> -> vector<2x128xf32>
    %858 = arith.addf %855, %857 : vector<2x128xf32>
    %c0_181 = arith.constant 0 : index
    %c0_182 = arith.constant 0 : index
    %859 = vector.load %arg26[%c0_181, %c0_182] : memref<1x128xf32, #tpu.memory_space<vmem>>, vector<1x128xf32>
    %860 = vector.broadcast %859 : vector<1x128xf32> to vector<2x128xf32>
    %861 = arith.addf %858, %860 : vector<2x128xf32>
    %cst_183 = arith.constant 0.000000e+00 : f32
    %862 = vector.broadcast %cst_183 : f32 to vector<2x128xf32>
    %863 = arith.maximumf %861, %862 : vector<2x128xf32>
    %c0_184 = arith.constant 0 : index
    %c0_185 = arith.constant 0 : index
    %864 = vector.load %arg27[%c0_184, %c0_185] : memref<128x2xf32, #tpu.memory_space<vmem>>, vector<128x2xf32>
    %cst_186 = arith.constant dense<0.000000e+00> : vector<2x2xf32>
    %865 = tpu.matmul %863, %864, %cst_186 {dimension_numbers = #tpu.dot_dimension_numbers<[1], [0], [0], [1], [0, 0, 1, 1], [], []>} : vector<2x128xf32>, vector<128x2xf32>, vector<2x2xf32> -> vector<2x2xf32>
    %c0_187 = arith.constant 0 : index
    %c0_188 = arith.constant 0 : index
    %866 = vector.load %arg28[%c0_187, %c0_188] : memref<1x2xf32, #tpu.memory_space<vmem>>, vector<1x2xf32>
    %867 = vector.broadcast %866 : vector<1x2xf32> to vector<2x2xf32>
    %868 = arith.addf %865, %867 : vector<2x2xf32>
    %c0_189 = arith.constant 0 : index
    %c0_190 = arith.constant 0 : index
    %869 = vector.load %arg29[%c0_189, %c0_190] : memref<2x2xf32, #tpu.memory_space<vmem>>, vector<2x2xf32>
    tpu.vector_store %arg29[%c0_189, %c0_190], %868 {strides = array<i32>} : memref<2x2xf32, #tpu.memory_space<vmem>>, vector<2x2xf32>,
    return
  }
}

</mosaic_0001>

<bundles_post_ra>
// kernel: forward_pallas.1
= control target key start
LH: loop header
LB: loop body
LE: loop exit
PB: predicated region body
PF: predicated region fallthrough
CT: control target
= control target key end

     0   :  { %s6541_s6 = smov 1   ;;  %s6542_s10 = smov 2   ;;  %s7614_s0 = inlined_call_operand.smem [shape: u32[30], index: -1, kind: input, shape index: {}] }
   0x1   :  { %s6600_s5 = sld [smem:[%s7614_s0]]   ;;  %s6543_s14 = smov 3  }
   0x2   :  { %s6605_s9 = sld [smem:[%s7614_s0 + %s6541_s6]]   ;;  %s6544_s18 = smov 4  }
   0x3   :  { %s6610_s13 = sld [smem:[%s7614_s0 + %s6542_s10]]   ;;  %s6545_s22 = smov 5  }
   0x4   :  { %s6615_s17 = sld [smem:[%s7614_s0 + %s6543_s14]]   ;;  %s6546_s26 = smov 6  }
   0x5   :  { %s6620_s21 = sld [smem:[%s7614_s0 + %s6544_s18]]   ;;  %s6547_s30 = smov 7  }
   0x6   :  { %s6625_s25 = sld [smem:[%s7614_s0 + %s6545_s22]]   ;;  %s6548_s4 = smov 8  }
   0x7   :  { %s6630_s29 = sld [smem:[%s7614_s0 + %s6546_s26]]   ;;  %s6549_s10 = smov 9  }
   0x8   :  { %7622 = sst [smem:[#allocation33_spill]] %s6605_s9  ;;  %s6550_s15 = smov 10  }
   0x9   :  { %7623 = sst [smem:[#allocation34_spill]] %s6610_s13  ;;  %s6551_s20 = smov 11  }
   0xa   :  { %7624 = sst [smem:[#allocation35_spill]] %s6615_s17  ;;  %s6552_s26 = smov 12  }
   0xb   :  { %s6635_s3 = sld [smem:[%s7614_s0 + %s6547_s30]]   ;;  %s6553_s1 = smov 13  }
   0xc   :  { %s6640_s8 = sld [smem:[%s7614_s0 + %s6548_s4]]   ;;  %s6554_s7 = smov 14  }
   0xd   :  { %s6645_s14 = sld [smem:[%s7614_s0 + %s6549_s10]]   ;;  %s6556_s22 = smov 16  }
   0xe   :  { %s6650_s19 = sld [smem:[%s7614_s0 + %s6550_s15]]   ;;  %s6555_s15 = smov 15  }
   0xf   :  { %s6655_s24 = sld [smem:[%s7614_s0 + %s6551_s20]]   ;;  %s6557_s28 = smov 17  }
  0x10   :  { %s6660_s30 = sld [smem:[%s7614_s0 + %s6552_s26]]   ;;  %s6559_s16 = smov 19  }
  0x11   :  { %s6665_s6 = sld [smem:[%s7614_s0 + %s6553_s1]]   ;;  %s6560_s23 = smov 20  }
  0x12   :  { %s6670_s12 = sld [smem:[%s7614_s0 + %s6554_s7]]   ;;  %s6558_s7 = smov 18  }
  0x13   :  { %s6675_s20 = sld [smem:[%s7614_s0 + %s6555_s15]]   ;;  %s6561_s1 = smov 21  }
  0x14   :  { %s6680_s27 = sld [smem:[%s7614_s0 + %s6556_s22]]   ;;  %s6562_s10 = smov 22  }
  0x15   :  { %7625 = sst [smem:[#allocation36_spill]] %s6655_s24  ;;  %s6567_s15 = smov 27  }
  0x16   :  { %s6685_s4 = sld [smem:[%s7614_s0 + %s6557_s28]]  }
  0x17   :  { %s4820_s17 = sld [smem:[%s7614_s0 + %s6558_s7]]  }
  0x18   :  { %7626 = sst [smem:[#allocation37_spill]] %s6670_s12 }
  0x19   :  { %7627 = sst [smem:[#allocation38_spill]] %s6675_s20 }
  0x1a   :  { %s6693_s9 = sld [smem:[%s7614_s0 + %s6559_s16]]   ;;  %s6563_s16 = smov 23  }
  0x1b   :  { %s6698_s13 = sld [smem:[%s7614_s0 + %s6560_s23]]   ;;  %s6564_s23 = smov 24  }
  0x1c   :  { %s6703_s20 = sld [smem:[%s7614_s0 + %s6561_s1]]   ;;  %s6565_s1 = smov 25  }
  0x1d   :  { %s6708_s12 = sld [smem:[%s7614_s0 + %s6562_s10]]   ;;  %v64_v0 = vstv %s4820_s17  ;;  %s6566_s10 = smov 26  }
  0x1e   :  { %s6718_s24 = sld [smem:[%s7614_s0 + %s6564_s23]]   ;;  %65 = vst [vmem:[#allocation3] sm:$0x1] %v64_v0  ;;  %s6568_s17 = smov 28  }
  0x1f   :  { %s6723_s7 = sld [smem:[%s7614_s0 + %s6565_s1]]   ;;  %s6569_s1 = smov 29  }
  0x20   :  { %7628 = sst [smem:[#allocation39_spill]] %s6693_s9 }
  0x21   :  { %s6713_s9 = sld [smem:[%s7614_s0 + %s6563_s16]]  }
  0x22   :  { %7629 = sst [smem:[#allocation40_spill]] %s6703_s20 }
  0x23   :  { %s6728_s16 = sld [smem:[%s7614_s0 + %s6566_s10]]  }
  0x24   :  { %7631 = sst [smem:[#allocation42_spill]] %s6718_s24 }
  0x25   :  { %7632 = sst [smem:[#allocation43_spill]] %s6723_s7 }
  0x26   :  { %s6733_s23 = sld [smem:[%s7614_s0 + %s6567_s15]]  }
  0x27   :  { %7630 = sst [smem:[#allocation41_spill]] %s6713_s9 }
  0x28   :  { %s6738_s28 = sld [smem:[%s7614_s0 + %s6568_s17]]  }
  0x29   :  { %s6743_s24 = sld [smem:[%s7614_s0 + %s6569_s1]]  }
  0x2a   :  { %66 = vsyncpa [#allocation5], 0 }
  0x2b   :  { %67 = vsyncpa [#allocation8], 0 }
  0x2c   :  { %68 = vsyncpa [#allocation11], 0 }
  0x2d   :  { %69 = vsyncpa [#allocation14], 0 }
  0x2e   :  { %70 = vsyncpa [#allocation17], 0 }
  0x2f   :  { %71 = vsyncpa [#allocation20], 0 }
  0x30   :  { %72 = vsyncpa [#allocation23], 0 }
  0x31   :  { %73 = vsyncpa [#allocation6], 0  ;;  %s6570_s9 = smov [#allocation7]   ;;  %s6239_s10 = scalar_lea.hbm %s6640_s8, 512 }
  0x32   :  { %s103_s20 = sshll.u32 %s6570_s9, 4  ;;  %p6240_p0 = scmp.ne.s32.totalorder %s6640_s8, %s6239_s10  ;;  %s104_s20 = int_to_ptr.vmem [resolvable:$true] %s103_s20 }
  0x33   :  { %p6243_p1 = scmp.lt.u32.totalorder %s6239_s10, %s6640_s8 }
  0x35   :  { %p6245_p2 = pnand %p6243_p1, %p6240_p0 }
  0x37   :  { %6248 = shalt.err (!%p6245_p2)
}
  0x38   :  { %s6249_s0 = scalar_lea.vmem %s104_s20, 512  ;;  %p6254_p4 = scmp.lt.s32.totalorder %s104_s20, %s104_s20 }
  0x39   :  { %p6250_p3 = scmp.ne.s32.totalorder %s104_s20, %s6249_s0  ;;  %p6255_p5 = scmp.lt.s32.totalorder %s6249_s0, %s6249_s0 }
  0x3b   :  { %p6256_p6 = por %p6255_p5, %p6254_p4 }
  0x3d   :  { %p6257_p7 = pnand %p6256_p6, %p6250_p3 }
  0x3f   :  { %6260 = shalt.err (!%p6257_p7)
}
  0x40   :  { %s6571_s7 = smov 128   ;;  %s6572_s11 = smov 8  }
  0x41   :  { %109 = dma.hbm_to_vmem [thread:$0]  %s6640_s8, 512, %s104_s20, [#allocation8], %s6571_s7, %s6571_s7, %s6572_s11  }
  0x42   :  { %s6573_s15 = smov [#allocation10]   ;;  %s6574_s17 = smov [#allocation13]  }
  0x43   :  { %s128_s18 = sshll.u32 %s6573_s15, 4  ;;  %s152_s22 = sshll.u32 %s6574_s17, 4  ;;  %s129_s18 = int_to_ptr.vmem [resolvable:$true] %s128_s18  ;;  %s153_s22 = int_to_ptr.vmem [resolvable:$true] %s152_s22 }
  0x44   :  { %s6261_s26 = scalar_lea.hbm %s6650_s19, 16 }
  0x45   :  { %p6262_p8 = scmp.ne.s32.totalorder %s6650_s19, %s6261_s26  ;;  %p6265_p9 = scmp.lt.u32.totalorder %s6261_s26, %s6650_s19 }
  0x47   :  { %p6267_p10 = pnand %p6265_p9, %p6262_p8 }
  0x49   :  { %6270 = shalt.err (!%p6267_p10)
}
  0x4a   :  { %s6271_s1 = scalar_lea.vmem %s129_s18, 16  ;;  %s6275_s2 = scalar_lea.vmem %s129_s18, 32 }
  0x4b   :  { %p6272_p11 = scmp.ne.s32.totalorder %s129_s18, %s6271_s1  ;;  %p6276_p12 = scmp.lt.s32.totalorder %s129_s18, %s129_s18 }
  0x4c   :  { %p6277_p13 = scmp.lt.s32.totalorder %s6275_s2, %s6271_s1 }
  0x4e   :  { %p6278_p0 = por %p6277_p13, %p6276_p12 }
  0x50   :  { %p6279_p1 = pnand %p6278_p0, %p6272_p11 }
  0x52   :  { %6282 = shalt.err (!%p6279_p1)
}
  0x53   :  { %131 = dma.hbm_to_vmem [thread:$0]  %s6650_s19, 16, %s129_s18, [#allocation11]  }
  0x54   :  { %s6283_s8 = scalar_lea.hbm %s6665_s6, 16 }
  0x55   :  { %p6284_p2 = scmp.ne.s32.totalorder %s6665_s6, %s6283_s8  ;;  %p6287_p3 = scmp.lt.u32.totalorder %s6283_s8, %s6665_s6 }
  0x57   :  { %p6289_p4 = pnand %p6287_p3, %p6284_p2 }
  0x59   :  { %6292 = shalt.err (!%p6289_p4)
}
  0x5a   :  { %s6293_s9 = scalar_lea.vmem %s153_s22, 16  ;;  %s6297_s20 = scalar_lea.vmem %s153_s22, 32 }
  0x5b   :  { %p6294_p5 = scmp.ne.s32.totalorder %s153_s22, %s6293_s9  ;;  %p6298_p6 = scmp.lt.s32.totalorder %s153_s22, %s153_s22 }
  0x5c   :  { %p6299_p7 = scmp.lt.s32.totalorder %s6297_s20, %s6293_s9 }
  0x5e   :  { %p6300_p8 = por %p6299_p7, %p6298_p6 }
  0x60   :  { %p6301_p9 = pnand %p6300_p8, %p6294_p5 }
  0x62   :  { %6304 = shalt.err (!%p6301_p9)
}
  0x63   :  { %155 = dma.hbm_to_vmem [thread:$0]  %s6665_s6, 16, %s153_s22, [#allocation14]  }
  0x64   :  { %s6575_s19 = smov [#allocation16]   ;;  %s6576_s0 = smov [#allocation19]  }
  0x65   :  { %s176_s10 = sshll.u32 %s6575_s19, 4  ;;  %s202_s15 = sshll.u32 %s6576_s0, 4  ;;  %s177_s10 = int_to_ptr.vmem [resolvable:$true] %s176_s10  ;;  %s203_s15 = int_to_ptr.vmem [resolvable:$true] %s202_s15 }
  0x66   :  { %s6305_s18 = scalar_lea.hbm %s6685_s4, 16 }
  0x67   :  { %p6306_p10 = scmp.ne.s32.totalorder %s6685_s4, %s6305_s18  ;;  %p6309_p11 = scmp.lt.u32.totalorder %s6305_s18, %s6685_s4 }
  0x69   :  { %p6311_p12 = pnand %p6309_p11, %p6306_p10 }
  0x6b   :  { %6314 = shalt.err (!%p6311_p12)
}
  0x6c   :  { %s6315_s17 = scalar_lea.vmem %s177_s10, 16  ;;  %s6319_s26 = scalar_lea.vmem %s177_s10, 32 }
  0x6d   :  { %p6316_p13 = scmp.ne.s32.totalorder %s177_s10, %s6315_s17  ;;  %p6320_p0 = scmp.lt.s32.totalorder %s177_s10, %s177_s10 }
  0x6e   :  { %p6321_p1 = scmp.lt.s32.totalorder %s6319_s26, %s6315_s17 }
  0x70   :  { %p6322_p2 = por %p6321_p1, %p6320_p0 }
  0x72   :  { %p6323_p3 = pnand %p6322_p2, %p6316_p13 }
  0x74   :  { %6326 = shalt.err (!%p6323_p3)
}
  0x75   :  { %179 = dma.hbm_to_vmem [thread:$0]  %s6685_s4, 16, %s177_s10, [#allocation17]  }
  0x76   :  { %s6327_s6 = scalar_lea.hbm %s6708_s12, 16 }
  0x77   :  { %p6328_p4 = scmp.ne.s32.totalorder %s6708_s12, %s6327_s6  ;;  %p6331_p5 = scmp.lt.u32.totalorder %s6327_s6, %s6708_s12 }
  0x79   :  { %p6333_p6 = pnand %p6331_p5, %p6328_p4 }
  0x7b   :  { %6336 = shalt.err (!%p6333_p6)
}
  0x7c   :  { %s6337_s22 = scalar_lea.vmem %s203_s15, 16  ;;  %s6341_s1 = scalar_lea.vmem %s203_s15, 32 }
  0x7d   :  { %p6338_p7 = scmp.ne.s32.totalorder %s203_s15, %s6337_s22  ;;  %p6342_p8 = scmp.lt.s32.totalorder %s203_s15, %s203_s15 }
  0x7e   :  { %p6343_p9 = scmp.lt.s32.totalorder %s6341_s1, %s6337_s22 }
  0x80   :  { %p6344_p10 = por %p6343_p9, %p6342_p8 }
  0x82   :  { %p6345_p11 = pnand %p6344_p10, %p6338_p7 }
  0x84   :  { %6348 = shalt.err (!%p6345_p11)
}
  0x85   :  { %205 = dma.hbm_to_vmem [thread:$0]  %s6708_s12, 16, %s203_s15, [#allocation20]  }
  0x86   :  { %s6577_s4 = smov [#allocation4]   ;;  %s6578_s8 = smov [#allocation9]  }
  0x87   :  { %s94_s2 = sshll.u32 %s6577_s4, 4  ;;  %s115_s9 = sshll.u32 %s6578_s8, 4  ;;  %s95_s2 = int_to_ptr.vmem [resolvable:$true] %s94_s2  ;;  %s116_s9 = int_to_ptr.vmem [resolvable:$true] %s115_s9 }
  0x88   :  { %s6349_s20 = scalar_lea.hbm %s6635_s3, 16 }
  0x89   :  { %p6350_p12 = scmp.ne.s32.totalorder %s6635_s3, %s6349_s20  ;;  %p6353_p13 = scmp.lt.u32.totalorder %s6349_s20, %s6635_s3 }
  0x8b   :  { %p6355_p0 = pnand %p6353_p13, %p6350_p12 }
  0x8d   :  { %6358 = shalt.err (!%p6355_p0)
}
  0x8e   :  { %s6359_s19 = scalar_lea.vmem %s95_s2, 16  ;;  %s6363_s10 = scalar_lea.vmem %s95_s2, 32 }
  0x8f   :  { %p6360_p1 = scmp.ne.s32.totalorder %s95_s2, %s6359_s19  ;;  %p6364_p2 = scmp.lt.s32.totalorder %s95_s2, %s95_s2 }
  0x90   :  { %p6365_p3 = scmp.lt.s32.totalorder %s6363_s10, %s6359_s19 }
  0x92   :  { %p6366_p4 = por %p6365_p3, %p6364_p2 }
  0x94   :  { %p6367_p5 = pnand %p6366_p4, %p6360_p1 }
  0x96   :  { %6370 = shalt.err (!%p6367_p5)
}
  0x97   :  { %97 = dma.hbm_to_vmem [thread:$0]  %s6635_s3, 16, %s95_s2, [#allocation5]  }
  0x98   :  { %s6371_s12 = scalar_lea.hbm %s6645_s14, 512 }
  0x99   :  { %p6372_p6 = scmp.ne.s32.totalorder %s6645_s14, %s6371_s12  ;;  %p6375_p7 = scmp.lt.u32.totalorder %s6371_s12, %s6645_s14 }
  0x9b   :  { %p6377_p8 = pnand %p6375_p7, %p6372_p6 }
  0x9d   :  { %6380 = shalt.err (!%p6377_p8)
}
  0x9e   :  { %s6381_s0 = scalar_lea.vmem %s116_s9, 512  ;;  %p6386_p10 = scmp.lt.s32.totalorder %s116_s9, %s116_s9 }
  0x9f   :  { %p6382_p9 = scmp.ne.s32.totalorder %s116_s9, %s6381_s0  ;;  %p6387_p11 = scmp.lt.s32.totalorder %s6381_s0, %s6381_s0 }
  0xa1   :  { %p6388_p12 = por %p6387_p11, %p6386_p10 }
  0xa3   :  { %p6389_p13 = pnand %p6388_p12, %p6382_p9 }
  0xa5   :  { %6392 = shalt.err (!%p6389_p13)
}
  0xa6   :  { %121 = dma.hbm_to_vmem [thread:$0]  %s6645_s14, 512, %s116_s9, [#allocation8], %s6571_s7, %s6571_s7, %s6572_s11  }
  0xa7   :  { %s6579_s3 = smov [#allocation12]   ;;  %s6580_s18 = smov [#allocation15]  }
  0xa8   :  { %s139_s15 = sshll.u32 %s6579_s3, 4  ;;  %s166_s17 = sshll.u32 %s6580_s18, 4  ;;  %s140_s15 = int_to_ptr.vmem [resolvable:$true] %s139_s15  ;;  %s167_s17 = int_to_ptr.vmem [resolvable:$true] %s166_s17 }
  0xa9   :  { %s6393_s26 = scalar_lea.hbm %s6660_s30, 512 }
  0xaa   :  { %p6394_p0 = scmp.ne.s32.totalorder %s6660_s30, %s6393_s26  ;;  %p6397_p1 = scmp.lt.u32.totalorder %s6393_s26, %s6660_s30 }
  0xac   :  { %p6399_p2 = pnand %p6397_p1, %p6394_p0 }
  0xae   :  { %6402 = shalt.err (!%p6399_p2)
}
  0xaf   :  { %s6403_s6 = scalar_lea.vmem %s140_s15, 512  ;;  %p6408_p4 = scmp.lt.s32.totalorder %s140_s15, %s140_s15 }
  0xb0   :  { %p6404_p3 = scmp.ne.s32.totalorder %s140_s15, %s6403_s6  ;;  %p6409_p5 = scmp.lt.s32.totalorder %s6403_s6, %s6403_s6 }
  0xb2   :  { %p6410_p6 = por %p6409_p5, %p6408_p4 }
  0xb4   :  { %p6411_p7 = pnand %p6410_p6, %p6404_p3 }
  0xb6   :  { %6414 = shalt.err (!%p6411_p7)
}
  0xb7   :  { %145 = dma.hbm_to_vmem [thread:$0]  %s6660_s30, 512, %s140_s15, [#allocation11], %s6571_s7, %s6571_s7, %s6572_s11  }
  0xb8   :  { %s6415_s14 = scalar_lea.hbm %s6680_s27, 16 }
  0xb9   :  { %p6416_p8 = scmp.ne.s32.totalorder %s6680_s27, %s6415_s14  ;;  %p6419_p9 = scmp.lt.u32.totalorder %s6415_s14, %s6680_s27 }
  0xbb   :  { %p6421_p10 = pnand %p6419_p9, %p6416_p8 }
  0xbd   :  { %6424 = shalt.err (!%p6421_p10)
}
  0xbe   :  { %s6425_s22 = scalar_lea.vmem %s167_s17, 16  ;;  %s6429_s1 = scalar_lea.vmem %s167_s17, 32 }
  0xbf   :  { %p6426_p11 = scmp.ne.s32.totalorder %s167_s17, %s6425_s22  ;;  %p6430_p12 = scmp.lt.s32.totalorder %s167_s17, %s167_s17 }
  0xc0   :  { %p6431_p13 = scmp.lt.s32.totalorder %s6429_s1, %s6425_s22 }
  0xc2   :  { %p6432_p0 = por %p6431_p13, %p6430_p12 }
  0xc4   :  { %p6433_p1 = pnand %p6432_p0, %p6426_p11 }
  0xc6   :  { %6436 = shalt.err (!%p6433_p1)
}
  0xc7   :  { %169 = dma.hbm_to_vmem [thread:$0]  %s6680_s27, 16, %s167_s17, [#allocation14]  }
  0xc8   :  { %s6581_s30 = smov [#allocation18]   ;;  %s6582_s11 = smov [#allocation21]  }
  0xc9   :  { %s190_s7 = sshll.u32 %s6581_s30, 4  ;;  %s218_s4 = sshll.u32 %s6582_s11, 4  ;;  %s191_s7 = int_to_ptr.vmem [resolvable:$true] %s190_s7  ;;  %s219_s4 = int_to_ptr.vmem [resolvable:$true] %s218_s4 }
  0xca   :  { %s6437_s2 = scalar_lea.hbm %s6698_s13, 16 }
  0xcb   :  { %p6438_p2 = scmp.ne.s32.totalorder %s6698_s13, %s6437_s2  ;;  %p6441_p3 = scmp.lt.u32.totalorder %s6437_s2, %s6698_s13 }
  0xcd   :  { %p6443_p4 = pnand %p6441_p3, %p6438_p2 }
  0xcf   :  { %6446 = shalt.err (!%p6443_p4)
}
  0xd0   :  { %s6447_s8 = scalar_lea.vmem %s191_s7, 16  ;;  %s6451_s9 = scalar_lea.vmem %s191_s7, 32 }
  0xd1   :  { %p6448_p5 = scmp.ne.s32.totalorder %s191_s7, %s6447_s8  ;;  %p6452_p6 = scmp.lt.s32.totalorder %s191_s7, %s191_s7 }
  0xd2   :  { %p6453_p7 = scmp.lt.s32.totalorder %s6451_s9, %s6447_s8 }
  0xd4   :  { %p6454_p8 = por %p6453_p7, %p6452_p6 }
  0xd6   :  { %p6455_p9 = pnand %p6454_p8, %p6448_p5 }
  0xd8   :  { %6458 = shalt.err (!%p6455_p9)
}
  0xd9   :  { %193 = dma.hbm_to_vmem [thread:$0]  %s6698_s13, 16, %s191_s7, [#allocation17]  }
  0xda   :  { %s6459_s27 = scalar_lea.hbm %s6728_s16, 16 }
  0xdb   :  { %p6460_p10 = scmp.ne.s32.totalorder %s6728_s16, %s6459_s27  ;;  %p6463_p11 = scmp.lt.u32.totalorder %s6459_s27, %s6728_s16 }
  0xdd   :  { %p6465_p12 = pnand %p6463_p11, %p6460_p10 }
  0xdf   :  { %6468 = shalt.err (!%p6465_p12)
}
  0xe0   :  { %s6469_s20 = scalar_lea.vmem %s219_s4, 16  ;;  %s6473_s19 = scalar_lea.vmem %s219_s4, 32 }
  0xe1   :  { %p6470_p13 = scmp.ne.s32.totalorder %s219_s4, %s6469_s20  ;;  %p6474_p0 = scmp.lt.s32.totalorder %s219_s4, %s219_s4 }
  0xe2   :  { %p6475_p1 = scmp.lt.s32.totalorder %s6473_s19, %s6469_s20 }
  0xe4   :  { %p6476_p2 = por %p6475_p1, %p6474_p0 }
  0xe6   :  { %p6477_p3 = pnand %p6476_p2, %p6470_p13 }
  0xe8   :  { %6480 = shalt.err (!%p6477_p3)
}
  0xe9   :  { %221 = dma.hbm_to_vmem [thread:$0]  %s6728_s16, 16, %s219_s4, [#allocation20]  }
  0xea   :  { %s6583_s13 = smov [#allocation22]   ;;  %s6481_s12 = scalar_lea.hbm %s6738_s28, 16 }
  0xeb   :  { %s230_s10 = sshll.u32 %s6583_s13, 4  ;;  %p6482_p4 = scmp.ne.s32.totalorder %s6738_s28, %s6481_s12  ;;  %s231_s10 = int_to_ptr.vmem [resolvable:$true] %s230_s10 }
  0xec   :  { %p6485_p5 = scmp.lt.u32.totalorder %s6481_s12, %s6738_s28 }
  0xee   :  { %p6487_p6 = pnand %p6485_p5, %p6482_p4 }
  0xf0   :  { %6490 = shalt.err (!%p6487_p6)
}
  0xf1   :  { %s6491_s0 = scalar_lea.vmem %s231_s10, 16  ;;  %s6495_s3 = scalar_lea.vmem %s231_s10, 32 }
  0xf2   :  { %p6492_p7 = scmp.ne.s32.totalorder %s231_s10, %s6491_s0  ;;  %p6496_p8 = scmp.lt.s32.totalorder %s231_s10, %s231_s10 }
  0xf3   :  { %p6497_p9 = scmp.lt.s32.totalorder %s6495_s3, %s6491_s0 }
  0xf5   :  { %p6498_p10 = por %p6497_p9, %p6496_p8 }
  0xf7   :  { %p6499_p11 = pnand %p6498_p10, %p6492_p7 }
  0xf9   :  { %6502 = shalt.err (!%p6499_p11)
}
  0xfa   :  { %233 = dma.hbm_to_vmem [thread:$0]  %s6738_s28, 16, %s231_s10, [#allocation23]  }
  0xfb   :  { %6525 = dma.done.wait [#allocation5], 16  }
  0xfc   :  { %6526 = vsyncadd [#allocation5], 4294967280 }
  0xfd   :  { %6527 = dma.done.wait [#allocation8], 1024  }
  0xfe   :  { %6528 = vsyncadd [#allocation8], 4294966272 }
  0xff   :  { %6529 = dma.done.wait [#allocation11], 528  }
 0x100   :  { %6530 = vsyncadd [#allocation11], 4294966768 }
 0x101   :  { %6531 = dma.done.wait [#allocation14], 32  }
 0x102   :  { %6532 = vsyncadd [#allocation14], 4294967264 }
 0x103   :  { %6533 = dma.done.wait [#allocation17], 32  }
 0x104   :  { %6534 = vsyncadd [#allocation17], 4294967264 }
 0x105   :  { %6535 = dma.done.wait [#allocation20], 32  }
 0x106   :  { %6536 = vsyncadd [#allocation20], 4294967264 }
 0x107   :  { %6537 = dma.done.wait [#allocation23], 16  }
 0x108   :  { %6538 = vsyncadd [#allocation23], 4294967280  ;;  %v6584_v1 = vmov 0   ;;  %v270_v2 = vld [vmem:[%s6600_s5] sm:$0xff]  ;;  %v287_v4 = vld [vmem:[%s6620_s21 + $0x8] sm:$0xff]  ;;  %vm300_vm0 = vcmask 1041408   ;;  %v272_v17 = vlaneseq }
 0x109   :  { %5947 = vset.pattern.permute.xlu0 %v6584_v1  ;;  %5948 = vset.pattern.permute.xlu1 %v6584_v1  ;;  %v286_v3 = vld [vmem:[%s6620_s21] sm:$0xff]  ;;  %v288_v5 = vld [vmem:[%s6620_s21 + $0x10] sm:$0xff]  ;;  %v289_v6 = vld [vmem:[%s6620_s21 + $0x18] sm:$0xff]  ;;  %vm293_vm1 = vcmask 408576   ;;  %v6585_v20 = vmov 0.0   ;;  %vm390_vm4 = vcmask 261120  }
 0x10a   :  { %275 = vperm.xlu0 %5947, %v270_v2   ;;  %v271_v7 = vld [vmem:[%s6600_s5 + $0x8] sm:$0xff]  ;;  %v5615_v8 = vpack.c.bf16 %v287_v4, %v286_v3  ;;  %v5619_v9 = vpack.c.bf16 %v289_v6, %v288_v5  ;;  %v290_v10 = vld [vmem:[%s6620_s21 + $0x20] sm:$0xff]  ;;  %v292_v13 = vld [vmem:[%s6620_s21 + $0x30] sm:$0x3]  ;;  %v273_v18 = vand.u32 127, %v272_v17  ;;  %s6586_s5 = smov 64  }
 0x10b   :  { %v291_v11 = vld [vmem:[%s6620_s21 + $0x28] sm:$0xff]  ;;  %v379_v14 = vld [vmem:[%s6625_s25] sm:$0xff]  ;;  %v381_v22 = vld [vmem:[%s6625_s25 + $0x10] sm:$0xff]  ;;  %v6587_v62 = vmov 0.0|0.0   ;;  %vm6588_vm5 = vmmov 0   ;;  %s6589_s21 = smov 96  }
 0x10c   :  { %5616 = vmatprep.subr.bf16.mxu1 %v5615_v8  ;;  %v5623_v12 = vpack.c.bf16 %v291_v11, %v290_v10  ;;  %v380_v15 = vld [vmem:[%s6625_s25 + $0x8] sm:$0xff]  ;;  %v382_v23 = vld [vmem:[%s6625_s25 + $0x18] sm:$0xff]  ;;  %v4837_v35 = vld [vmem:[#allocation4] ss:$0 sm:$0xff]  ;;  %5643 = vmatprep.subr.bf16.mxu0 %v6587_v62  ;;  %s6590_s25 = smov 32   ;;  %vm606_vm6 = vcmask 254976  }
 0x10d   :  { %5618 = vmatpush3.bf16.msra.mxu1 %v5615_v8  ;;  %v5627_v16 = vpack.c.bf16 %v380_v15, %v379_v14  ;;  %v5631_v25 = vpack.c.bf16 %v382_v23, %v381_v22  ;;  %v472_v27 = vld [vmem:[#allocation7] sm:$0xff]  ;;  %v473_v28 = vld [vmem:[#allocation7 + $0x8] sm:$0xff]  ;;  %v474_v30 = vld [vmem:[#allocation7 + $0x10] sm:$0xff]  ;;  %5189 = vmatprep.mubr.msk.f32.mxu0 %vm6588_vm5, %v6585_v20  ;;  %s7634_s16 = sld [smem:[#allocation37_spill]]  ;;  %vm831_vm7 = vcmask 257026   ;;  %vm1276_vm8 = vcmask 261126  }
 0x10e   :  { %278 = vperm.xlu0 %5947, %v271_v7   ;;  %5620 = vmatprep.subr.bf16.mxu1 %v5619_v9  ;;  %v5635_v29 = vpack.c.bf16 %v473_v28, %v472_v27  ;;  %v475_v31 = vld [vmem:[#allocation7 + $0x18] sm:$0xff]  ;;  %v4840_v39 = vld [vmem:[#allocation10] ss:$0 sm:$0xff]  ;;  %v563_v60 = vld [vmem:[#allocation9 + $0x8] sm:$0xff]  ;;  %vm1055_vm9 = vcmask 259076   ;;  %vm837_vm10 = vcmask 521476  }
 0x10f   :  { %v5639_v34 = vpack.c.bf16 %v475_v31, %v474_v30  ;;  %v562_v59 = vld [vmem:[#allocation9] sm:$0xff]  ;;  %v558_v61 = vld [vmem:[%s6630_s29] sm:$0xff]  ;;  %v559_v0 = vld [vmem:[%s6630_s29 + $0x8] sm:$0xff]  ;;  %vm612_vm11 = vcmask 523526   ;;  %vm1282_vm12 = vcmask 517376   ;;  %vm1061_vm13 = vcmask 519426  }
 0x110   :  { %v6843_v63 = vpack.c.bf16 %v563_v60, %v562_v59  ;;  %v564_v1 = vld [vmem:[#allocation9 + $0x10] sm:$0xff]  ;;  %v565_v2 = vld [vmem:[#allocation9 + $0x18] sm:$0xff]  ;;  %v6847_v3 = vpack.c.bf16 %v559_v0, %v558_v61  ;;  %v561_v5 = vld [vmem:[%s6630_s29 + $0x18] sm:$0xff]  ;;  %vm2179_vm14 = vcmask 523264   ;;  %s7635_s28 = sld [smem:[#allocation38_spill]]  ;;  %s7636_s15 = sld [smem:[#allocation39_spill]] }
 0x111   :  { %5622 = vmatpush3.bf16.msra.mxu1 %v5619_v9  ;;  %v560_v4 = vld [vmem:[%s6630_s29 + $0x10] sm:$0xff]  ;;  %v6856_v6 = vpack.c.bf16 %v565_v2, %v564_v1  ;;  %s7633_s29 = sld [smem:[#allocation36_spill]]  ;;  %s7637_s18 = sld [smem:[#allocation34_spill]]  ;;  %vm4263_vm15 = vcmask 64512  }
 0x112   :  { %5624 = vmatprep.subr.bf16.mxu1 %v5623_v12  ;;  %5645 = vmatpush3.bf16.msra.mxu0 %v6847_v3  ;;  %v6860_v7 = vpack.c.bf16 %v561_v5, %v560_v4  ;;  %s7638_s26 = sld [smem:[#allocation33_spill]]  ;;  %s7639_s6 = sld [smem:[#allocation35_spill]] }
 0x113   :  { %5646 = vmatprep.subr.bf16.mxu0 %v6587_v62  ;;  %s7640_s14 = sld [smem:[#allocation41_spill]]  ;;  %s7641_s22 = sld [smem:[#allocation42_spill]] }
 0x114   :  { %s7642_s1 = sld [smem:[#allocation40_spill]]  ;;  %s7643_s30 = sld [smem:[#allocation43_spill]] }
 0x115   :  { %5626 = vmatpush3.bf16.msra.mxu1 %v5623_v12  ;;  %s6591_s7 = smov [#allocation24]  }
 0x116   :  { %5154 = vmatprep.subr.msk.mxu1 %vm300_vm0, %v292_v13  ;;  %5648 = vmatpush3.bf16.msra.mxu0 %v6860_v7 }
 0x117   :  { %5655 = vmatprep.subr.bf16.mxu0 %v6587_v62 }
 0x119   :  { %5155 = vmatpush3.msk.msra.mxu1 %vm300_vm0, %v292_v13 }
 0x11a   :  { %5628 = vmatprep.subr.bf16.mxu1 %v5627_v16 }
 0x189   :  { %v276_v19 = vpop.permute.xlu0 %275 }
 0x18a   :  { %vm280_vm2 = vcmp.eq.s32.totalorder %v273_v18, %v276_v19 }
 0x18b   :  { %v4832_v21 = vsel %vm280_vm2, 1.0, %v6585_v20  ;;  %vm4603_vm2 = vcmask 130048  }
 0x18c   :  { %5156 = vmatprep.mubr.msk.f32.mxu1 %vm293_vm1, %v4832_v21 }
 0x18d   :  { %v279_v24 = vpop.permute.xlu0 %278 }
 0x18e   :  { %vm281_vm3 = vcmp.eq.s32.totalorder %v273_v18, %v279_v24 }
 0x18f   :  { %v4833_v26 = vsel %vm281_vm3, 1.0, %v6585_v20  ;;  %vm4780_vm3 = vcmask 9216  }
 0x190   :  { %5157 = vmatmul.mubr.msk.f32.vlgmr.msra.gmra.mrb[0].mxu1 %vm293_vm1, %v4833_v26 }
 0x191   :  { %5630 = vmatpush3.bf16.msra.mxu1 %v5627_v16 }
 0x192   :  { %5632 = vmatprep.subr.bf16.mxu1 %v5631_v25 }
 0x195   :  { %5634 = vmatpush3.bf16.msra.mxu1 %v5631_v25 }
 0x196   :  { %5636 = vmatprep.subr.bf16.mxu1 %v5635_v29 }
 0x263   :  { %v5158_v32 = vpop.f32.mrb[0].mxu1 }
 0x264   :  { %v370_v33 = vpop.f32.mrb[1].mxu1 }
 0x265   :  { %5167 = vmatprep.mubr.msk.f32.mxu1 %vm390_vm4, %v370_v33 }
 0x266   :  { %5168 = vmatmul.mubr.msk.f32.vlgmr.msra.gmra.mrb[2].mxu1 %vm390_vm4, %v5158_v32 }
 0x267   :  { %5638 = vmatpush3.bf16.msra.mxu1 %v5635_v29  ;;  %5178 = vmatprep.mubr.msk.f32.mxu1 %vm390_vm4, %v370_v33 }
 0x268   :  { %5640 = vmatprep.subr.bf16.mxu1 %v5639_v34 }
 0x26b   :  { %5642 = vmatpush3.bf16.msra.mxu1 %v5639_v34 }
 0x26c   :  { %5649 = vmatprep.subr.bf16.mxu1 %v6587_v62 }
 0x26e   :  { %5179 = vmatmul.mubr.msk.f32.vlgmr.msra.gmra.mrb[4].mxu1 %vm390_vm4, %v5158_v32 }
 0x26f   :  { %5200 = vmatprep.mubr.msk.f32.mxu1 %vm6588_vm5, %v6585_v20  ;;  %5651 = vmatpush3.bf16.msra.mxu1 %v6843_v63 }
 0x270   :  { %5652 = vmatprep.subr.bf16.mxu1 %v6587_v62 }
 0x273   :  { %5654 = vmatpush3.bf16.msra.mxu1 %v6856_v6 }
 0x274   :  { %5661 = vmatprep.subr.bf16.mxu1 %v6587_v62 }
 0x339   :  { %v5169_v36 = vpop.f32.mrb[2].mxu1 }
 0x33a   :  { %v6821_v37 = vadd.f32 %v5169_v36, %v4837_v35  ;;  %v463_v38 = vpop.f32.mrb[3].mxu1 }
 0x33b   :  { %v6827_v44 = vadd.f32 %v4837_v35, %v463_v38 }
 0x33d   :  { %v4843_v48 = vmul.f32 -1.442695, %v6827_v44 }
 0x341   :  { %v5180_v40 = vpop.f32.mrb[4].mxu1 }
 0x342   :  { %v6823_v41 = vadd.f32 %v5180_v40, %v4840_v39  ;;  %v549_v42 = vpop.f32.mrb[5].mxu1 }
 0x343   :  { %v6825_v43 = vadd.f32 %v4840_v39, %v549_v42 }
 0x344   :  { %5949 = vtanh.f32 %v6823_v41  ;;  %v4844_v47 = vmul.f32 -1.442695, %v6823_v41 }
 0x345   :  { %5951 = vtanh.f32 %v6827_v44 }
 0x346   :  { %5953 = vpow2.f32 %v4844_v47 }
 0x347   :  { %5955 = vpow2.f32 %v4843_v48 }
 0x34e   :  { %v5950_v45 = vpop.eup %5949 }
 0x34f   :  { %592 = vrot.lane.b32.xlu1 %v5950_v45, %s6586_s5  ;;  %v5952_v46 = vpop.eup %5951 }
 0x350   :  { %v5954_v49 = vpop.eup %5953 }
 0x351   :  { %v587_v50 = vadd.f32 1.0, %v5954_v49  ;;  %v5956_v51 = vpop.eup %5955 }
 0x352   :  { %v569_v52 = vadd.f32 1.0, %v5956_v51 }
 0x353   :  { %574 = vrot.lane.b32.xlu1 %v5952_v46, %s6586_s5  ;;  %5957 = vrcp.f32 %v587_v50 }
 0x354   :  { %5959 = vrcp.f32 %v569_v52 }
 0x35d   :  { %v5958_v53 = vpop.eup %5957 }
 0x35e   :  { %v5960_v56 = vpop.eup %5959 }
 0x3c1   :  { %v593_v54 = vpop.permute.xlu1 %592 }
 0x3c2   :  { %v6835_v55 = vmul.f32 %v5958_v53, %v593_v54 }
 0x3c4   :  { %5961 = vtanh.f32 %v6835_v55  ;;  %v806_v28 = vrot.slane %v6835_v55, 2 }
 0x3c5   :  { %v575_v57 = vpop.permute.xlu1 %574 }
 0x3c6   :  { %v6838_v58 = vmul.f32 %v5960_v56, %v575_v57 }
 0x3c8   :  { %5963 = vtanh.f32 %v6838_v58  ;;  %v777_v29 = vrot.slane %v6838_v58, 6 }
 0x3ce   :  { %v5962_v8 = vpop.eup %5961 }
 0x3cf   :  { %598 = vrot.lane.b32.xlu0 %v5962_v8, %s6589_s21 }
 0x3d2   :  { %v5964_v9 = vpop.eup %5963 }
 0x3d3   :  { %580 = vrot.lane.b32.xlu1 %v5964_v9, %s6589_s21 }
 0x441   :  { %v599_v10 = vpop.permute.xlu0 %598 }
 0x442   :  { %v6869_v11 = vmul.f32 %v5958_v53, %v599_v10 }
 0x444   :  { %v690_v12 = vrot.slane %v6869_v11, 6 }
 0x445   :  { %v581_v13 = vpop.permute.xlu1 %580 }
 0x446   :  { %v583_v14 = vmul.f32 %v5960_v56, %v581_v13  ;;  %691 = vrot.lane.b32.xlu1 %v690_v12, %s6590_s25 }
 0x448   :  { %603 = vrot.lane.b32.xlu0 %v583_v14, %s6590_s25 }
 0x4b8   :  { %v692_v15 = vpop.permute.xlu1 %691 }
 0x4b9   :  { %5201 = vmatmul.mubr.msk.f32.vlgmr.msra.gmra.mrb[6].mxu1 %vm390_vm4, %v692_v15 }
 0x4ba   :  { %v604_v16 = vpop.permute.xlu0 %603  ;;  %5663 = vmatpush3.bf16.msra.mxu1 %v6843_v63  ;;  %5222 = vmatprep.mubr.msk.f32.mxu1 %vm6588_vm5, %v6585_v20 }
 0x4bb   :  { %607 = vst.msk [vmem:[#allocation2] sm:$0x3] %vm606_vm6, %v604_v16  ;;  %5190 = vmatmul.mubr.msk.f32.vlgmr.msra.gmra.mrb[0].mxu0 %vm390_vm4, %v604_v16  ;;  %5664 = vmatprep.subr.bf16.mxu1 %v6587_v62 }
 0x4bc   :  { %5657 = vmatpush3.bf16.msra.mxu0 %v6847_v3  ;;  %5211 = vmatprep.mubr.msk.f32.mxu0 %vm6588_vm5, %v6585_v20 }
 0x4bd   :  { %5658 = vmatprep.subr.bf16.mxu0 %v6587_v62 }
 0x4be   :  { %5666 = vmatpush3.bf16.msra.mxu1 %v6856_v6 }
 0x4bf   :  { %5673 = vmatprep.subr.bf16.mxu1 %v6587_v62 }
 0x4c0   :  { %5660 = vmatpush3.bf16.msra.mxu0 %v6860_v7 }
 0x4c1   :  { %5667 = vmatprep.subr.bf16.mxu0 %v6587_v62 }
 0x58c   :  { %v761_v17 = vpop.f32.mrb[6].mxu1 }
 0x58d   :  { %v766_v18 = vrot.slane %v761_v17, 4  ;;  %v5202_v19 = vpop.f32.mrb[7].mxu1 }
 0x58e   :  { %v682_v21 = vpop.f32.mrb[0].mxu0 }
 0x58f   :  { %v768_v22 = vadd.f32 %v766_v18, %v6823_v41  ;;  %v687_v23 = vrot.slane %v682_v21, 6  ;;  %v5191_v24 = vpop.f32.mrb[1].mxu0 }
 0x591   :  { %5965 = vtanh.f32 %v768_v22  ;;  %v689_v25 = vadd.f32 %v687_v23, %v6827_v44  ;;  %v4848_v30 = vmul.f32 -1.442695, %v768_v22 }
 0x593   :  { %5967 = vtanh.f32 %v689_v25  ;;  %v4847_v31 = vmul.f32 -1.442695, %v689_v25 }
 0x594   :  { %5969 = vpow2.f32 %v4848_v30 }
 0x595   :  { %5971 = vpow2.f32 %v4847_v31 }
 0x59b   :  { %v5966_v26 = vpop.eup %5965 }
 0x59c   :  { %812 = vrot.lane.b32.xlu1 %v5966_v26, %s6586_s5 }
 0x59d   :  { %v5968_v27 = vpop.eup %5967 }
 0x59e   :  { %783 = vrot.lane.b32.xlu0 %v5968_v27, %s6586_s5  ;;  %v5970_v32 = vpop.eup %5969 }
 0x59f   :  { %v5972_v33 = vpop.eup %5971  ;;  %v801_v34 = vadd.f32 1.0, %v5970_v32 }
 0x5a0   :  { %807 = vrot.lane.b32.xlu1 %v806_v28, %s6590_s25  ;;  %v772_v35 = vadd.f32 1.0, %v5972_v33 }
 0x5a1   :  { %5973 = vrcp.f32 %v801_v34 }
 0x5a2   :  { %778 = vrot.lane.b32.xlu0 %v777_v29, %s6590_s25  ;;  %5975 = vrcp.f32 %v772_v35 }
 0x5ab   :  { %v5974_v36 = vpop.eup %5973 }
 0x5ac   :  { %v5976_v40 = vpop.eup %5975 }
 0x60e   :  { %v813_v38 = vpop.permute.xlu1 %812 }
 0x60f   :  { %v815_v39 = vmul.f32 %v5974_v36, %v813_v38 }
 0x610   :  { %v784_v42 = vpop.permute.xlu0 %783 }
 0x611   :  { %817 = vrot.lane.b32.xlu1 %v815_v39, %s6590_s25  ;;  %v786_v45 = vmul.f32 %v5976_v40, %v784_v42 }
 0x612   :  { %v808_v46 = vpop.permute.xlu1 %807 }
 0x613   :  { %788 = vrot.lane.b32.xlu0 %v786_v45, %s6590_s25  ;;  %v810_v47 = vmul.f32 %v5974_v36, %v808_v46 }
 0x614   :  { %v779_v48 = vpop.permute.xlu0 %778 }
 0x615   :  { %v781_v51 = vmul.f32 %v5976_v40, %v779_v48 }
 0x683   :  { %v818_v49 = vpop.permute.xlu1 %817 }
 0x684   :  { %v6899_v50 = vadd.f32 %v818_v49, %v810_v47 }
 0x685   :  { %v789_v52 = vpop.permute.xlu0 %788 }
 0x686   :  { %5977 = vtanh.f32 %v6899_v50  ;;  %v6902_v53 = vadd.f32 %v789_v52, %v781_v51  ;;  %v1032_v29 = vrot.slane %v6899_v50, 2 }
 0x688   :  { %5979 = vtanh.f32 %v6902_v53  ;;  %v1005_v31 = vrot.slane %v6902_v53, 6 }
 0x690   :  { %v5978_v54 = vpop.eup %5977 }
 0x691   :  { %823 = vrot.lane.b32.xlu1 %v5978_v54, %s6586_s5 }
 0x692   :  { %v5980_v55 = vpop.eup %5979 }
 0x693   :  { %794 = vrot.lane.b32.xlu0 %v5980_v55, %s6586_s5 }
 0x703   :  { %v824_v56 = vpop.permute.xlu1 %823 }
 0x704   :  { %v6907_v57 = vmul.f32 %v5974_v36, %v824_v56 }
 0x705   :  { %v795_v59 = vpop.permute.xlu0 %794 }
 0x706   :  { %v918_v58 = vrot.slane %v6907_v57, 4  ;;  %v6910_v60 = vmul.f32 %v5976_v40, %v795_v59 }
 0x708   :  { %919 = vrot.lane.b32.xlu1 %v918_v58, %s6590_s25  ;;  %v839_v61 = vrot.slane %v6910_v60, 2 }
 0x70a   :  { %840 = vrot.lane.b32.xlu0 %v839_v61, %s6590_s25 }
 0x77a   :  { %v920_v0 = vpop.permute.xlu1 %919 }
 0x77b   :  { %5223 = vmatmul.mubr.msk.f32.vlgmr.msra.gmra.mrb[8].mxu1 %vm390_vm4, %v920_v0 }
 0x77c   :  { %5675 = vmatpush3.bf16.msra.mxu1 %v6843_v63  ;;  %5244 = vmatprep.mubr.msk.f32.mxu1 %vm6588_vm5, %v6585_v20  ;;  %v841_v1 = vpop.permute.xlu0 %840 }
 0x77d   :  { %5676 = vmatprep.subr.bf16.mxu1 %v6587_v62  ;;  %5212 = vmatmul.mubr.msk.f32.vlgmr.msra.gmra.mrb[2].mxu0 %vm390_vm4, %v841_v1 }
 0x77e   :  { %5669 = vmatpush3.bf16.msra.mxu0 %v6847_v3  ;;  %5233 = vmatprep.mubr.msk.f32.mxu0 %vm6588_vm5, %v6585_v20 }
 0x77f   :  { %5670 = vmatprep.subr.bf16.mxu0 %v6587_v62 }
 0x780   :  { %5678 = vmatpush3.bf16.msra.mxu1 %v6856_v6 }
 0x781   :  { %5685 = vmatprep.subr.bf16.mxu1 %v6587_v62 }
 0x782   :  { %5672 = vmatpush3.bf16.msra.mxu0 %v6860_v7 }
 0x783   :  { %5679 = vmatprep.subr.bf16.mxu0 %v6587_v62 }
 0x84e   :  { %v989_v2 = vpop.f32.mrb[8].mxu1 }
 0x84f   :  { %v994_v4 = vrot.slane %v989_v2, 6  ;;  %v5224_v5 = vpop.f32.mrb[9].mxu1 }
 0x850   :  { %v910_v9 = vpop.f32.mrb[2].mxu0 }
 0x851   :  { %v996_v8 = vadd.f32 %v994_v4, %v6823_v41  ;;  %v915_v10 = vrot.slane %v910_v9, 4  ;;  %v5213_v12 = vpop.f32.mrb[3].mxu0 }
 0x853   :  { %5981 = vtanh.f32 %v996_v8  ;;  %v917_v13 = vadd.f32 %v915_v10, %v6827_v44  ;;  %v4852_v16 = vmul.f32 -1.442695, %v996_v8 }
 0x855   :  { %5983 = vtanh.f32 %v917_v13  ;;  %v4851_v17 = vmul.f32 -1.442695, %v917_v13 }
 0x856   :  { %5985 = vpow2.f32 %v4852_v16 }
 0x857   :  { %5987 = vpow2.f32 %v4851_v17 }
 0x85d   :  { %v5982_v14 = vpop.eup %5981 }
 0x85e   :  { %1036 = vrot.lane.b32.xlu1 %v5982_v14, %s6586_s5 }
 0x85f   :  { %v5984_v15 = vpop.eup %5983 }
 0x860   :  { %1009 = vrot.lane.b32.xlu0 %v5984_v15, %s6586_s5  ;;  %v5986_v18 = vpop.eup %5985 }
 0x861   :  { %v5988_v19 = vpop.eup %5987  ;;  %v1027_v21 = vadd.f32 1.0, %v5986_v18 }
 0x862   :  { %v1000_v22 = vadd.f32 1.0, %v5988_v19 }
 0x863   :  { %5989 = vrcp.f32 %v1027_v21 }
 0x864   :  { %5991 = vrcp.f32 %v1000_v22 }
 0x86d   :  { %v5990_v23 = vpop.eup %5989 }
 0x86e   :  { %v5992_v26 = vpop.eup %5991  ;;  %v1034_v30 = vmul.f32 %v5990_v23, %v1032_v29 }
 0x86f   :  { %v1007_v34 = vmul.f32 %v5992_v26, %v1005_v31 }
 0x8d0   :  { %v1037_v24 = vpop.permute.xlu1 %1036 }
 0x8d1   :  { %v1039_v25 = vmul.f32 %v5990_v23, %v1037_v24 }
 0x8d2   :  { %v1010_v27 = vpop.permute.xlu0 %1009 }
 0x8d3   :  { %1041 = vrot.lane.b32.xlu1 %v1039_v25, %s6590_s25  ;;  %v1012_v28 = vmul.f32 %v5992_v26, %v1010_v27 }
 0x8d5   :  { %1014 = vrot.lane.b32.xlu0 %v1012_v28, %s6590_s25 }
 0x945   :  { %v1042_v32 = vpop.permute.xlu1 %1041 }
 0x946   :  { %v6937_v33 = vadd.f32 %v1042_v32, %v1034_v30 }
 0x947   :  { %v1015_v35 = vpop.permute.xlu0 %1014 }
 0x948   :  { %5993 = vtanh.f32 %v6937_v33  ;;  %v6940_v36 = vadd.f32 %v1015_v35, %v1007_v34  ;;  %v1253_v14 = vrot.slane %v6937_v33, 2 }
 0x94a   :  { %5995 = vtanh.f32 %v6940_v36  ;;  %v1226_v18 = vrot.slane %v6940_v36, 6 }
 0x952   :  { %v5994_v38 = vpop.eup %5993 }
 0x953   :  { %1047 = vrot.lane.b32.xlu1 %v5994_v38, %s6586_s5 }
 0x954   :  { %v5996_v39 = vpop.eup %5995 }
 0x955   :  { %1020 = vrot.lane.b32.xlu0 %v5996_v39, %s6586_s5 }
 0x9c5   :  { %v1048_v40 = vpop.permute.xlu1 %1047 }
 0x9c6   :  { %v6945_v42 = vmul.f32 %v5990_v23, %v1048_v40 }
 0x9c7   :  { %v1021_v46 = vpop.permute.xlu0 %1020 }
 0x9c8   :  { %v1142_v45 = vrot.slane %v6945_v42, 2  ;;  %v6948_v47 = vmul.f32 %v5992_v26, %v1021_v46 }
 0x9ca   :  { %1143 = vrot.lane.b32.xlu1 %v1142_v45, %s6590_s25  ;;  %v1063_v48 = vrot.slane %v6948_v47, 4 }
 0x9cc   :  { %1064 = vrot.lane.b32.xlu0 %v1063_v48, %s6590_s25 }
 0xa3c   :  { %v1144_v49 = vpop.permute.xlu1 %1143 }
 0xa3d   :  { %5245 = vmatmul.mubr.msk.f32.vlgmr.msra.gmra.mrb[10].mxu1 %vm390_vm4, %v1144_v49 }
 0xa3e   :  { %5687 = vmatpush3.bf16.msra.mxu1 %v6843_v63  ;;  %5266 = vmatprep.mubr.msk.f32.mxu1 %vm6588_vm5, %v6585_v20  ;;  %v1065_v50 = vpop.permute.xlu0 %1064 }
 0xa3f   :  { %5688 = vmatprep.subr.bf16.mxu1 %v6587_v62  ;;  %5234 = vmatmul.mubr.msk.f32.vlgmr.msra.gmra.mrb[4].mxu0 %vm390_vm4, %v1065_v50 }
 0xa40   :  { %5681 = vmatpush3.bf16.msra.mxu0 %v6847_v3  ;;  %5255 = vmatprep.mubr.msk.f32.mxu0 %vm6588_vm5, %v6585_v20 }
 0xa41   :  { %5682 = vmatprep.subr.bf16.mxu0 %v6587_v62 }
 0xa42   :  { %5690 = vmatpush3.bf16.msra.mxu1 %v6856_v6 }
 0xa43   :  { %5697 = vmatprep.subr.bf16.mxu1 %v6587_v62 }
 0xa44   :  { %5684 = vmatpush3.bf16.msra.mxu0 %v6860_v7 }
 0xa45   :  { %5691 = vmatprep.subr.bf16.mxu0 %v6587_v62 }
 0xb10   :  { %v1213_v51 = vpop.f32.mrb[10].mxu1 }
 0xb11   :  { %v1217_v52 = vadd.f32 %v1213_v51, %v6823_v41  ;;  %v5246_v53 = vpop.f32.mrb[11].mxu1 }
 0xb12   :  { %v1134_v54 = vpop.f32.mrb[4].mxu0 }
 0xb13   :  { %5997 = vtanh.f32 %v1217_v52  ;;  %v1139_v55 = vrot.slane %v1134_v54, 2  ;;  %v5235_v56 = vpop.f32.mrb[5].mxu0  ;;  %v4856_v0 = vmul.f32 -1.442695, %v1217_v52 }
 0xb15   :  { %v1141_v58 = vadd.f32 %v1139_v55, %v6827_v44 }
 0xb17   :  { %5999 = vtanh.f32 %v1141_v58  ;;  %v4855_v1 = vmul.f32 -1.442695, %v1141_v58 }
 0xb18   :  { %6001 = vpow2.f32 %v4856_v0 }
 0xb19   :  { %6003 = vpow2.f32 %v4855_v1 }
 0xb1d   :  { %v5998_v59 = vpop.eup %5997 }
 0xb1e   :  { %1257 = vrot.lane.b32.xlu0 %v5998_v59, %s6586_s5 }
 0xb21   :  { %v6000_v61 = vpop.eup %5999 }
 0xb22   :  { %1230 = vrot.lane.b32.xlu1 %v6000_v61, %s6586_s5  ;;  %v6002_v2 = vpop.eup %6001 }
 0xb23   :  { %v1248_v41 = vadd.f32 1.0, %v6002_v2  ;;  %v6004_v4 = vpop.eup %6003 }
 0xb24   :  { %v1221_v5 = vadd.f32 1.0, %v6004_v4 }
 0xb25   :  { %6005 = vrcp.f32 %v1248_v41 }
 0xb26   :  { %6007 = vrcp.f32 %v1221_v5 }
 0xb2f   :  { %v6006_v8 = vpop.eup %6005 }
 0xb30   :  { %v6008_v10 = vpop.eup %6007  ;;  %v1255_v15 = vmul.f32 %v6006_v8, %v1253_v14 }
 0xb31   :  { %v1228_v19 = vmul.f32 %v6008_v10, %v1226_v18 }
 0xb90   :  { %v1258_v9 = vpop.permute.xlu0 %1257 }
 0xb91   :  { %v1260_v44 = vmul.f32 %v6006_v8, %v1258_v9 }
 0xb93   :  { %1262 = vrot.lane.b32.xlu0 %v1260_v44, %s6590_s25 }
 0xb94   :  { %v1231_v12 = vpop.permute.xlu1 %1230 }
 0xb95   :  { %v1233_v13 = vmul.f32 %v6008_v10, %v1231_v12 }
 0xb97   :  { %1235 = vrot.lane.b32.xlu1 %v1233_v13, %s6590_s25 }
 0xc05   :  { %v1263_v16 = vpop.permute.xlu0 %1262 }
 0xc06   :  { %v6974_v17 = vadd.f32 %v1263_v16, %v1255_v15 }
 0xc08   :  { %6009 = vtanh.f32 %v6974_v17  ;;  %v1473_v61 = vrot.slane %v6974_v17, 2 }
 0xc09   :  { %v1236_v21 = vpop.permute.xlu1 %1235 }
 0xc0a   :  { %v6978_v22 = vadd.f32 %v1236_v21, %v1228_v19 }
 0xc0c   :  { %6011 = vtanh.f32 %v6978_v22  ;;  %v1446_v41 = vrot.slane %v6978_v22, 6 }
 0xc12   :  { %v6010_v23 = vpop.eup %6009 }
 0xc13   :  { %1268 = vrot.lane.b32.xlu0 %v6010_v23, %s6586_s5 }
 0xc16   :  { %v6012_v24 = vpop.eup %6011 }
 0xc17   :  { %1241 = vrot.lane.b32.xlu1 %v6012_v24, %s6586_s5 }
 0xc85   :  { %v1269_v25 = vpop.permute.xlu0 %1268 }
 0xc86   :  { %v6983_v26 = vmul.f32 %v6006_v8, %v1269_v25 }
 0xc88   :  { %1360 = vrot.lane.b32.xlu0 %v6983_v26, %s6590_s25 }
 0xc89   :  { %v1242_v27 = vpop.permute.xlu1 %1241 }
 0xc8a   :  { %v6987_v28 = vmul.f32 %v6008_v10, %v1242_v27 }
 0xc8c   :  { %v1284_v29 = vrot.slane %v6987_v28, 6 }
 0xc8e   :  { %1285 = vrot.lane.b32.xlu1 %v1284_v29, %s6590_s25 }
 0xcfa   :  { %v1361_v30 = vpop.permute.xlu0 %1360 }
 0xcfb   :  { %5267 = vmatmul.mubr.msk.f32.vlgmr.msra.gmra.mrb[12].mxu1 %vm390_vm4, %v1361_v30 }
 0xcfc   :  { %5699 = vmatpush3.bf16.msra.mxu1 %v6843_v63  ;;  %5288 = vmatprep.mubr.msk.f32.mxu1 %vm6588_vm5, %v6585_v20 }
 0xcfd   :  { %5700 = vmatprep.subr.bf16.mxu1 %v6587_v62 }
 0xd00   :  { %5702 = vmatpush3.bf16.msra.mxu1 %v6856_v6  ;;  %v1286_v31 = vpop.permute.xlu1 %1285 }
 0xd01   :  { %5709 = vmatprep.subr.bf16.mxu1 %v6587_v62  ;;  %5256 = vmatmul.mubr.msk.f32.vlgmr.msra.gmra.mrb[6].mxu0 %vm390_vm4, %v1286_v31 }
 0xd02   :  { %5693 = vmatpush3.bf16.msra.mxu0 %v6847_v3  ;;  %5277 = vmatprep.mubr.msk.f32.mxu0 %vm6588_vm5, %v6585_v20 }
 0xd03   :  { %5694 = vmatprep.subr.bf16.mxu0 %v6587_v62 }
 0xd06   :  { %5696 = vmatpush3.bf16.msra.mxu0 %v6860_v7 }
 0xd07   :  { %5703 = vmatprep.subr.bf16.mxu0 %v6587_v62 }
 0xdce   :  { %v1430_v32 = vpop.f32.mrb[12].mxu1 }
 0xdcf   :  { %v1435_v33 = vrot.slane %v1430_v32, 2  ;;  %v5268_v34 = vpop.f32.mrb[13].mxu1 }
 0xdd1   :  { %v1437_v35 = vadd.f32 %v1435_v33, %v6825_v43 }
 0xdd3   :  { %6013 = vtanh.f32 %v1437_v35  ;;  %v4860_v46 = vmul.f32 -1.442695, %v1437_v35 }
 0xdd4   :  { %v1355_v36 = vpop.f32.mrb[6].mxu0 }
 0xdd5   :  { %v1359_v38 = vadd.f32 %v1355_v36, %v6821_v37  ;;  %v5257_v39 = vpop.f32.mrb[7].mxu0 }
 0xdd7   :  { %6015 = vtanh.f32 %v1359_v38  ;;  %v4859_v48 = vmul.f32 -1.442695, %v1359_v38 }
 0xdd8   :  { %6017 = vpow2.f32 %v4860_v46 }
 0xdd9   :  { %6019 = vpow2.f32 %v4859_v48 }
 0xddd   :  { %v6014_v40 = vpop.eup %6013 }
 0xdde   :  { %1477 = vrot.lane.b32.xlu0 %v6014_v40, %s6586_s5 }
 0xde1   :  { %v6016_v45 = vpop.eup %6015 }
 0xde2   :  { %1450 = vrot.lane.b32.xlu1 %v6016_v45, %s6586_s5  ;;  %v6018_v49 = vpop.eup %6017 }
 0xde3   :  { %v1468_v50 = vadd.f32 1.0, %v6018_v49  ;;  %v6020_v51 = vpop.eup %6019 }
 0xde4   :  { %v1441_v52 = vadd.f32 1.0, %v6020_v51 }
 0xde5   :  { %6021 = vrcp.f32 %v1468_v50 }
 0xde6   :  { %6023 = vrcp.f32 %v1441_v52 }
 0xdef   :  { %v6022_v53 = vpop.eup %6021 }
 0xdf0   :  { %v6024_v56 = vpop.eup %6023  ;;  %v1475_v0 = vmul.f32 %v6022_v53, %v1473_v61 }
 0xdf1   :  { %v1448_v4 = vmul.f32 %v6024_v56, %v1446_v41 }
 0xe50   :  { %v1478_v54 = vpop.permute.xlu0 %1477 }
 0xe51   :  { %v1480_v55 = vmul.f32 %v6022_v53, %v1478_v54 }
 0xe53   :  { %1482 = vrot.lane.b32.xlu0 %v1480_v55, %s6590_s25 }
 0xe54   :  { %v1451_v58 = vpop.permute.xlu1 %1450 }
 0xe55   :  { %v1453_v59 = vmul.f32 %v6024_v56, %v1451_v58 }
 0xe57   :  { %1455 = vrot.lane.b32.xlu1 %v1453_v59, %s6590_s25 }
 0xec5   :  { %v1483_v1 = vpop.permute.xlu0 %1482 }
 0xec6   :  { %v7012_v2 = vadd.f32 %v1483_v1, %v1475_v0 }
 0xec8   :  { %6025 = vtanh.f32 %v7012_v2  ;;  %v1692_v49 = vrot.slane %v7012_v2, 2 }
 0xec9   :  { %v1456_v5 = vpop.permute.xlu1 %1455 }
 0xeca   :  { %v7016_v8 = vadd.f32 %v1456_v5, %v1448_v4 }
 0xecc   :  { %6027 = vtanh.f32 %v7016_v8  ;;  %v1665_v51 = vrot.slane %v7016_v8, 6 }
 0xed2   :  { %v6026_v9 = vpop.eup %6025 }
 0xed3   :  { %1488 = vrot.lane.b32.xlu0 %v6026_v9, %s6586_s5 }
 0xed6   :  { %v6028_v44 = vpop.eup %6027 }
 0xed7   :  { %1461 = vrot.lane.b32.xlu1 %v6028_v44, %s6586_s5 }
 0xf45   :  { %v1489_v10 = vpop.permute.xlu0 %1488 }
 0xf46   :  { %v7021_v12 = vmul.f32 %v6022_v53, %v1489_v10 }
 0xf48   :  { %v1578_v13 = vrot.slane %v7021_v12, 6 }
 0xf49   :  { %v1462_v14 = vpop.permute.xlu1 %1461 }
 0xf4a   :  { %1579 = vrot.lane.b32.xlu1 %v1578_v13, %s6590_s25  ;;  %v1464_v15 = vmul.f32 %v6024_v56, %v1462_v14 }
 0xf4c   :  { %1493 = vrot.lane.b32.xlu0 %v1464_v15, %s6590_s25 }
 0xfbc   :  { %v1580_v16 = vpop.permute.xlu1 %1579 }
 0xfbd   :  { %5289 = vmatmul.mubr.msk.f32.vlgmr.msra.gmra.mrb[14].mxu1 %vm390_vm4, %v1580_v16 }
 0xfbe   :  { %5711 = vmatpush3.bf16.msra.mxu1 %v6843_v63  ;;  %5310 = vmatprep.mubr.msk.f32.mxu1 %vm6588_vm5, %v6585_v20  ;;  %v7030_v17 = vpop.permute.xlu0 %1493 }
 0xfbf   :  { %5712 = vmatprep.subr.bf16.mxu1 %v6587_v62  ;;  %5278 = vmatmul.mubr.msk.f32.vlgmr.msra.gmra.mrb[8].mxu0 %vm390_vm4, %v7030_v17 }
 0xfc0   :  { %5705 = vmatpush3.bf16.msra.mxu0 %v6847_v3  ;;  %5299 = vmatprep.mubr.msk.f32.mxu0 %vm6588_vm5, %v6585_v20 }
 0xfc1   :  { %5706 = vmatprep.subr.bf16.mxu0 %v6587_v62 }
 0xfc2   :  { %5714 = vmatpush3.bf16.msra.mxu1 %v6856_v6 }
 0xfc3   :  { %5721 = vmatprep.subr.bf16.mxu1 %v6587_v62 }
 0xfc4   :  { %5708 = vmatpush3.bf16.msra.mxu0 %v6860_v7 }
 0xfc5   :  { %5715 = vmatprep.subr.bf16.mxu0 %v6587_v62 }
0x1090   :  { %v1649_v18 = vpop.f32.mrb[14].mxu1 }
0x1091   :  { %v1654_v19 = vrot.slane %v1649_v18, 4  ;;  %v5290_v21 = vpop.f32.mrb[15].mxu1 }
0x1092   :  { %v1570_v23 = vpop.f32.mrb[8].mxu0 }
0x1093   :  { %v1656_v22 = vadd.f32 %v1654_v19, %v6825_v43  ;;  %v1575_v24 = vrot.slane %v1570_v23, 6  ;;  %v5279_v25 = vpop.f32.mrb[9].mxu0 }
0x1095   :  { %6029 = vtanh.f32 %v1656_v22  ;;  %v1577_v27 = vadd.f32 %v1575_v24, %v6821_v37  ;;  %v4864_v31 = vmul.f32 -1.442695, %v1656_v22 }
0x1097   :  { %6031 = vtanh.f32 %v1577_v27  ;;  %v4863_v32 = vmul.f32 -1.442695, %v1577_v27 }
0x1098   :  { %6033 = vpow2.f32 %v4864_v31 }
0x1099   :  { %6035 = vpow2.f32 %v4863_v32 }
0x109f   :  { %v6030_v29 = vpop.eup %6029 }
0x10a0   :  { %1696 = vrot.lane.b32.xlu1 %v6030_v29, %s6586_s5 }
0x10a1   :  { %v6032_v30 = vpop.eup %6031 }
0x10a2   :  { %1669 = vrot.lane.b32.xlu0 %v6032_v30, %s6586_s5  ;;  %v6034_v33 = vpop.eup %6033 }
0x10a3   :  { %v6036_v34 = vpop.eup %6035  ;;  %v1687_v35 = vadd.f32 1.0, %v6034_v33 }
0x10a4   :  { %v1660_v36 = vadd.f32 1.0, %v6036_v34 }
0x10a5   :  { %6037 = vrcp.f32 %v1687_v35 }
0x10a6   :  { %6039 = vrcp.f32 %v1660_v36 }
0x10af   :  { %v6038_v38 = vpop.eup %6037 }
0x10b0   :  { %v6040_v45 = vpop.eup %6039  ;;  %v1694_v50 = vmul.f32 %v6038_v38, %v1692_v49 }
0x10b1   :  { %v1667_v54 = vmul.f32 %v6040_v45, %v1665_v51 }
0x1112   :  { %v1697_v39 = vpop.permute.xlu1 %1696 }
0x1113   :  { %v1699_v40 = vmul.f32 %v6038_v38, %v1697_v39 }
0x1114   :  { %v1670_v46 = vpop.permute.xlu0 %1669 }
0x1115   :  { %1701 = vrot.lane.b32.xlu1 %v1699_v40, %s6590_s25  ;;  %v1672_v48 = vmul.f32 %v6040_v45, %v1670_v46 }
0x1117   :  { %1674 = vrot.lane.b32.xlu0 %v1672_v48, %s6590_s25 }
0x1187   :  { %v1702_v52 = vpop.permute.xlu1 %1701 }
0x1188   :  { %v7051_v53 = vadd.f32 %v1702_v52, %v1694_v50 }
0x1189   :  { %v1675_v55 = vpop.permute.xlu0 %1674 }
0x118a   :  { %6041 = vtanh.f32 %v7051_v53  ;;  %v7054_v56 = vadd.f32 %v1675_v55, %v1667_v54  ;;  %v1914_v32 = vrot.slane %v7051_v53, 2 }
0x118c   :  { %6043 = vtanh.f32 %v7054_v56  ;;  %v1887_v34 = vrot.slane %v7054_v56, 6 }
0x1194   :  { %v6042_v58 = vpop.eup %6041 }
0x1195   :  { %1707 = vrot.lane.b32.xlu1 %v6042_v58, %s6586_s5 }
0x1196   :  { %v6044_v59 = vpop.eup %6043 }
0x1197   :  { %1680 = vrot.lane.b32.xlu0 %v6044_v59, %s6586_s5 }
0x1207   :  { %v1708_v61 = vpop.permute.xlu1 %1707 }
0x1208   :  { %v7059_v0 = vmul.f32 %v6038_v38, %v1708_v61 }
0x1209   :  { %v1681_v2 = vpop.permute.xlu0 %1680 }
0x120a   :  { %v1800_v1 = vrot.slane %v7059_v0, 4  ;;  %v7062_v41 = vmul.f32 %v6040_v45, %v1681_v2 }
0x120c   :  { %1801 = vrot.lane.b32.xlu1 %v1800_v1, %s6590_s25  ;;  %v1721_v4 = vrot.slane %v7062_v41, 2 }
0x120e   :  { %1722 = vrot.lane.b32.xlu0 %v1721_v4, %s6590_s25 }
0x127e   :  { %v1802_v5 = vpop.permute.xlu1 %1801 }
0x127f   :  { %5311 = vmatmul.mubr.msk.f32.vlgmr.msra.gmra.mrb[16].mxu1 %vm390_vm4, %v1802_v5 }
0x1280   :  { %5723 = vmatpush3.bf16.msra.mxu1 %v6843_v63  ;;  %5332 = vmatprep.mubr.msk.f32.mxu1 %vm6588_vm5, %v6585_v20  ;;  %v1723_v8 = vpop.permute.xlu0 %1722 }
0x1281   :  { %5724 = vmatprep.subr.bf16.mxu1 %v6587_v62  ;;  %5300 = vmatmul.mubr.msk.f32.vlgmr.msra.gmra.mrb[10].mxu0 %vm390_vm4, %v1723_v8 }
0x1282   :  { %5717 = vmatpush3.bf16.msra.mxu0 %v6847_v3  ;;  %5321 = vmatprep.mubr.msk.f32.mxu0 %vm6588_vm5, %v6585_v20 }
0x1283   :  { %5718 = vmatprep.subr.bf16.mxu0 %v6587_v62 }
0x1284   :  { %5726 = vmatpush3.bf16.msra.mxu1 %v6856_v6 }
0x1286   :  { %5720 = vmatpush3.bf16.msra.mxu0 %v6860_v7 }
0x1352   :  { %v1871_v63 = vpop.f32.mrb[16].mxu1 }
0x1353   :  { %v1876_v9 = vrot.slane %v1871_v63, 6  ;;  %v5312_v44 = vpop.f32.mrb[17].mxu1 }
0x1354   :  { %v1792_v13 = vpop.f32.mrb[10].mxu0 }
0x1355   :  { %v1878_v10 = vadd.f32 %v1876_v9, %v6825_v43  ;;  %v1797_v14 = vrot.slane %v1792_v13, 4  ;;  %v5301_v15 = vpop.f32.mrb[11].mxu0 }
0x1357   :  { %6045 = vtanh.f32 %v1878_v10  ;;  %v1799_v3 = vadd.f32 %v1797_v14, %v6821_v37  ;;  %v4868_v18 = vmul.f32 -1.442695, %v1878_v10 }
0x1359   :  { %6047 = vtanh.f32 %v1799_v3  ;;  %v4867_v7 = vmul.f32 -1.442695, %v1799_v3 }
0x135a   :  { %6049 = vpow2.f32 %v4868_v18 }
0x135b   :  { %6051 = vpow2.f32 %v4867_v7 }
0x1361   :  { %v6046_v16 = vpop.eup %6045 }
0x1362   :  { %1918 = vrot.lane.b32.xlu1 %v6046_v16, %s6586_s5 }
0x1363   :  { %v6048_v6 = vpop.eup %6047 }
0x1364   :  { %1891 = vrot.lane.b32.xlu0 %v6048_v6, %s6586_s5  ;;  %v6050_v19 = vpop.eup %6049 }
0x1365   :  { %v6052_v21 = vpop.eup %6051  ;;  %v1909_v22 = vadd.f32 1.0, %v6050_v19 }
0x1366   :  { %v1882_v23 = vadd.f32 1.0, %v6052_v21 }
0x1367   :  { %6053 = vrcp.f32 %v1909_v22 }
0x1368   :  { %6055 = vrcp.f32 %v1882_v23 }
0x1371   :  { %v6054_v24 = vpop.eup %6053 }
0x1372   :  { %v6056_v29 = vpop.eup %6055  ;;  %v1916_v33 = vmul.f32 %v6054_v24, %v1914_v32 }
0x1373   :  { %v1889_v38 = vmul.f32 %v6056_v29, %v1887_v34  ;;  %v2169_v34 = vld [vmem:[%s7633_s29 + $0x28] sm:$0xff] }
0x13d4   :  { %v1919_v25 = vpop.permute.xlu1 %1918 }
0x13d5   :  { %v1921_v27 = vmul.f32 %v6054_v24, %v1919_v25 }
0x13d6   :  { %v1892_v30 = vpop.permute.xlu0 %1891 }
0x13d7   :  { %1923 = vrot.lane.b32.xlu1 %v1921_v27, %s6590_s25  ;;  %v1894_v31 = vmul.f32 %v6056_v29, %v1892_v30  ;;  %v2164_v30 = vld [vmem:[%s7633_s29] sm:$0xff] }
0x13d9   :  { %1896 = vrot.lane.b32.xlu0 %v1894_v31, %s6590_s25  ;;  %v2261_v31 = vld [vmem:[%s7634_s16] sm:$0xff] }
0x1449   :  { %v1924_v35 = vpop.permute.xlu1 %1923 }
0x144a   :  { %v1926_v36 = vadd.f32 %v1924_v35, %v1916_v33  ;;  %v2265_v35 = vld [vmem:[%s7634_s16 + $0x20] sm:$0xff] }
0x144b   :  { %v1897_v39 = vpop.permute.xlu0 %1896 }
0x144c   :  { %6057 = vtanh.f32 %v1926_v36  ;;  %v1899_v40 = vadd.f32 %v1897_v39, %v1889_v38  ;;  %v2133_v18 = vrot.slane %v1926_v36, 2  ;;  %v2266_v38 = vld [vmem:[%s7634_s16 + $0x28] sm:$0xff]  ;;  %v2170_v39 = vld [vmem:[%s7633_s29 + $0x30] sm:$0xff] }
0x144e   :  { %6059 = vtanh.f32 %v1899_v40  ;;  %v2106_v22 = vrot.slane %v1899_v40, 6  ;;  %v2171_v40 = vld [vmem:[%s7633_s29 + $0x38] sm:$0xff] }
0x1456   :  { %v6058_v45 = vpop.eup %6057 }
0x1457   :  { %1929 = vrot.lane.b32.xlu1 %v6058_v45, %s6586_s5  ;;  %v5739_v45 = vpack.c.bf16 %v2171_v40, %v2170_v39 }
0x1458   :  { %v6060_v46 = vpop.eup %6059 }
0x1459   :  { %1902 = vrot.lane.b32.xlu0 %v6060_v46, %s6586_s5  ;;  %v2267_v46 = vld [vmem:[%s7634_s16 + $0x30] sm:$0xff] }
0x14c9   :  { %v1930_v48 = vpop.permute.xlu1 %1929 }
0x14ca   :  { %v7089_v49 = vmul.f32 %v6054_v24, %v1930_v48  ;;  %v2268_v48 = vld [vmem:[%s7634_s16 + $0x38] sm:$0xff] }
0x14cb   :  { %v1903_v51 = vpop.permute.xlu0 %1902 }
0x14cc   :  { %v2022_v50 = vrot.slane %v7089_v49, 2  ;;  %v7092_v52 = vmul.f32 %v6056_v29, %v1903_v51 }
0x14ce   :  { %2023 = vrot.lane.b32.xlu1 %v2022_v50, %s6590_s25  ;;  %v1943_v53 = vrot.slane %v7092_v52, 4 }
0x14d0   :  { %1944 = vrot.lane.b32.xlu0 %v1943_v53, %s6590_s25 }
0x1540   :  { %v2024_v54 = vpop.permute.xlu1 %2023 }
0x1541   :  { %5333 = vmatmul.mubr.msk.f32.vlgmr.msra.gmra.mrb[18].mxu1 %vm390_vm4, %v2024_v54 }
0x1542   :  { %v1945_v55 = vpop.permute.xlu0 %1944 }
0x1543   :  { %5322 = vmatmul.mubr.msk.f32.vlgmr.msra.gmra.mrb[12].mxu0 %vm390_vm4, %v1945_v55 }
0x1614   :  { %v2093_v56 = vpop.f32.mrb[18].mxu1 }
0x1615   :  { %v2097_v58 = vadd.f32 %v2093_v56, %v6825_v43  ;;  %v5334_v59 = vpop.f32.mrb[19].mxu1 }
0x1616   :  { %v2014_v61 = vpop.f32.mrb[12].mxu0 }
0x1617   :  { %6061 = vtanh.f32 %v2097_v58  ;;  %v2019_v1 = vrot.slane %v2014_v61, 2  ;;  %v5323_v2 = vpop.f32.mrb[13].mxu0  ;;  %v4872_v63 = vmul.f32 -1.442695, %v2097_v58 }
0x1619   :  { %v2021_v4 = vadd.f32 %v2019_v1, %v6821_v37 }
0x161b   :  { %6063 = vtanh.f32 %v2021_v4  ;;  %v4871_v9 = vmul.f32 -1.442695, %v2021_v4 }
0x161c   :  { %6065 = vpow2.f32 %v4872_v63 }
0x161d   :  { %6067 = vpow2.f32 %v4871_v9 }
0x1621   :  { %v6062_v5 = vpop.eup %6061 }
0x1622   :  { %2137 = vrot.lane.b32.xlu0 %v6062_v5, %s6586_s5 }
0x1625   :  { %v6064_v8 = vpop.eup %6063 }
0x1626   :  { %2110 = vrot.lane.b32.xlu1 %v6064_v8, %s6586_s5  ;;  %v6066_v44 = vpop.eup %6065 }
0x1627   :  { %v2128_v43 = vadd.f32 1.0, %v6066_v44  ;;  %v6068_v10 = vpop.eup %6067 }
0x1628   :  { %v2101_v13 = vadd.f32 1.0, %v6068_v10  ;;  %v4873_v10 = vld [vmem:[#allocation13] ss:$0 sm:$0xff] }
0x1629   :  { %6069 = vrcp.f32 %v2128_v43 }
0x162a   :  { %6071 = vrcp.f32 %v2101_v13  ;;  %v4876_v13 = vld [vmem:[#allocation15] ss:$0 sm:$0xff] }
0x1633   :  { %v7103_v14 = vpop.eup %6069 }
0x1634   :  { %v7107_v3 = vpop.eup %6071  ;;  %v2135_v7 = vmul.f32 %v7103_v14, %v2133_v18 }
0x1635   :  { %v2108_v23 = vmul.f32 %v7107_v3, %v2106_v22 }
0x1694   :  { %v2138_v37 = vpop.permute.xlu0 %2137 }
0x1695   :  { %v2140_v15 = vmul.f32 %v7103_v14, %v2138_v37 }
0x1697   :  { %2142 = vrot.lane.b32.xlu0 %v2140_v15, %s6590_s25 }
0x1698   :  { %v2111_v16 = vpop.permute.xlu1 %2110 }
0x1699   :  { %v2113_v6 = vmul.f32 %v7107_v3, %v2111_v16 }
0x169b   :  { %2115 = vrot.lane.b32.xlu1 %v2113_v6, %s6590_s25 }
0x1709   :  { %v2143_v19 = vpop.permute.xlu0 %2142 }
0x170a   :  { %v2145_v21 = vadd.f32 %v2143_v19, %v2135_v7 }
0x170c   :  { %6073 = vtanh.f32 %v2145_v21 }
0x170d   :  { %v2116_v24 = vpop.permute.xlu1 %2115 }
0x170e   :  { %v2118_v25 = vadd.f32 %v2116_v24, %v2108_v23 }
0x1710   :  { %6075 = vtanh.f32 %v2118_v25 }
0x1716   :  { %v6074_v27 = vpop.eup %6073 }
0x1717   :  { %2148 = vrot.lane.b32.xlu0 %v6074_v27, %s6586_s5 }
0x171a   :  { %v6076_v29 = vpop.eup %6075 }
0x171b   :  { %828 = vrot.lane.b32.xlu0 %v6910_v60, %s6590_s25  ;;  %2121 = vrot.lane.b32.xlu1 %v6076_v29, %s6586_s5  ;;  %v2165_v60 = vld [vmem:[%s7633_s29 + $0x8] sm:$0xff] }
0x171f   :  { %1273 = vrot.lane.b32.xlu0 %v6987_v28, %s6590_s25  ;;  %1052 = vrot.lane.b32.xlu1 %v6948_v47, %s6590_s25  ;;  %v5727_v47 = vpack.c.bf16 %v2165_v60, %v2164_v30  ;;  %v2262_v28 = vld [vmem:[%s7634_s16 + $0x8] sm:$0xff] }
0x1720   :  { %v5743_v32 = vpack.c.bf16 %v2262_v28, %v2261_v31 }
0x1721   :  { %5728 = vmatprep.subr.bf16.mxu0 %v5727_v47 }
0x1722   :  { %5744 = vmatprep.subr.bf16.mxu1 %v5743_v32  ;;  %5730 = vmatpush3.bf16.msra.mxu0 %v5727_v47 }
0x1723   :  { %834 = vrot.lane.b32.xlu0 %v6907_v57, %s6586_s5  ;;  %609 = vrot.lane.b32.xlu1 %v6869_v11, %s6586_s5  ;;  %v2166_v11 = vld [vmem:[%s7633_s29 + $0x10] sm:$0xff]  ;;  %v2167_v57 = vld [vmem:[%s7633_s29 + $0x18] sm:$0xff] }
0x1724   :  { %5746 = vmatpush3.bf16.msra.mxu1 %v5743_v32 }
0x1727   :  { %1279 = vrot.lane.b32.xlu0 %v6983_v26, %s6586_s5  ;;  %1058 = vrot.lane.b32.xlu1 %v6945_v42, %s6586_s5  ;;  %v2263_v42 = vld [vmem:[%s7634_s16 + $0x10] sm:$0xff]  ;;  %v5731_v26 = vpack.c.bf16 %v2167_v57, %v2166_v11  ;;  %v2352_v57 = vld [vmem:[#allocation12 + $0x8] sm:$0xff] }
0x1728   :  { %v2351_v11 = vld [vmem:[#allocation12] sm:$0xff] }
0x1729   :  { %5732 = vmatprep.subr.bf16.mxu0 %v5731_v26 }
0x172a   :  { %5734 = vmatpush3.bf16.msra.mxu0 %v5731_v26  ;;  %v7200_v26 = vpack.c.bf16 %v2352_v57, %v2351_v11 }
0x172b   :  { %1717 = vrot.lane.b32.xlu0 %v7059_v0, %s6586_s5  ;;  %1498 = vrot.lane.b32.xlu1 %v7021_v12, %s6586_s5  ;;  %v2264_v0 = vld [vmem:[%s7634_s16 + $0x18] sm:$0xff]  ;;  %v2168_v12 = vld [vmem:[%s7633_s29 + $0x20] sm:$0xff] }
0x172c   :  { %v5747_v33 = vpack.c.bf16 %v2264_v0, %v2263_v42  ;;  %v5735_v36 = vpack.c.bf16 %v2169_v34, %v2168_v12  ;;  %v2355_v42 = vld [vmem:[%s7635_s28] sm:$0xff]  ;;  %v2356_v0 = vld [vmem:[%s7635_s28 + $0x8] sm:$0xff] }
0x172d   :  { %v2354_v12 = vld [vmem:[#allocation12 + $0x18] sm:$0xff]  ;;  %v7203_v34 = vpack.c.bf16 %v2356_v0, %v2355_v42 }
0x172e   :  { %5748 = vmatprep.subr.bf16.mxu1 %v5747_v33  ;;  %5736 = vmatprep.subr.bf16.mxu0 %v5735_v36 }
0x172f   :  { %1939 = vrot.lane.b32.xlu1 %v7089_v49, %s6586_s5  ;;  %5750 = vmatpush3.bf16.msra.mxu1 %v5747_v33  ;;  %v5755_v49 = vpack.c.bf16 %v2268_v48, %v2267_v46  ;;  %v2353_v33 = vld [vmem:[#allocation12 + $0x10] sm:$0xff] }
0x1730   :  { %5738 = vmatpush3.bf16.msra.mxu0 %v5735_v36  ;;  %v2358_v36 = vld [vmem:[%s7635_s28 + $0x18] sm:$0xff] }
0x1731   :  { %5740 = vmatprep.subr.bf16.mxu0 %v5739_v45 }
0x1733   :  { %1712 = vrot.lane.b32.xlu1 %v7062_v41, %s6590_s25  ;;  %v5751_v41 = vpack.c.bf16 %v2266_v38, %v2265_v35  ;;  %v2357_v35 = vld [vmem:[%s7635_s28 + $0x10] sm:$0xff]  ;;  %v7208_v38 = vpack.c.bf16 %v2354_v12, %v2353_v33 }
0x1734   :  { %5742 = vmatpush3.bf16.msra.mxu0 %v5739_v45 }
0x1735   :  { %5752 = vmatprep.subr.bf16.mxu1 %v5751_v41  ;;  %5759 = vmatprep.subr.bf16.mxu0 %v6587_v62 }
0x1736   :  { %5754 = vmatpush3.bf16.msra.mxu1 %v5751_v41  ;;  %v7212_v41 = vpack.c.bf16 %v2358_v36, %v2357_v35 }
0x1737   :  { %5756 = vmatprep.subr.bf16.mxu1 %v5755_v49 }
0x173a   :  { %5758 = vmatpush3.bf16.msra.mxu1 %v5755_v49 }
0x173b   :  { %5765 = vmatprep.subr.bf16.mxu1 %v6587_v62 }
0x1789   :  { %v2149_v50 = vpop.permute.xlu0 %2148 }
0x178a   :  { %v2151_v51 = vmul.f32 %v7103_v14, %v2149_v50 }
0x178c   :  { %2158 = vrot.lane.b32.xlu0 %v2151_v51, %s6586_s5 }
0x178d   :  { %v829_v53 = vpop.permute.xlu0 %828  ;;  %v2122_v54 = vpop.permute.xlu1 %2121 }
0x178e   :  { %832 = vst.msk [vmem:[#allocation2] sm:$0xc] %vm831_vm7, %v829_v53  ;;  %v2124_v55 = vmul.f32 %v7107_v3, %v2122_v54 }
0x1790   :  { %1934 = vrot.lane.b32.xlu0 %v7092_v52, %s6590_s25  ;;  %2153 = vrot.lane.b32.xlu1 %v2124_v55, %s6590_s25 }
0x1791   :  { %v1274_v56 = vpop.permute.xlu0 %1273  ;;  %v1053_v58 = vpop.permute.xlu1 %1052 }
0x1792   :  { %1277 = vst.msk [vmem:[#allocation2] sm:$0xc0] %vm1276_vm8, %v1274_v56 }
0x1793   :  { %1056 = vst.msk [vmem:[#allocation2] sm:$0x30] %vm1055_vm9, %v1053_v58 }
0x1795   :  { %v835_v59 = vpop.permute.xlu0 %834  ;;  %v610_v61 = vpop.permute.xlu1 %609 }
0x1796   :  { %838 = vst.msk [vmem:[#allocation2 + $0x8] sm:$0x30] %vm837_vm10, %v835_v59 }
0x1797   :  { %613 = vst.msk [vmem:[#allocation2 + $0x8] sm:$0xc0] %vm612_vm11, %v610_v61 }
0x1799   :  { %v1280_v1 = vpop.permute.xlu0 %1279  ;;  %v1059_v2 = vpop.permute.xlu1 %1058 }
0x179a   :  { %1283 = vst.msk [vmem:[#allocation2 + $0x8] sm:$0x3] %vm1282_vm12, %v1280_v1 }
0x179b   :  { %1062 = vst.msk [vmem:[#allocation2 + $0x8] sm:$0xc] %vm1061_vm13, %v1059_v2 }
0x179c   :  { %1496 = vst.msk [vmem:[#allocation2 + $0x8] sm:$0x3] %vm606_vm6, %v7030_v17 }
0x179d   :  { %v1718_v52 = vpop.permute.xlu0 %1717  ;;  %v1499_v4 = vpop.permute.xlu1 %1498 }
0x179e   :  { %1720 = vst.msk [vmem:[#allocation2] sm:$0x30] %vm837_vm10, %v1718_v52 }
0x179f   :  { %1501 = vst.msk [vmem:[#allocation2] sm:$0xc0] %vm612_vm11, %v1499_v4 }
0x17a1   :  { %v1940_v5 = vpop.permute.xlu1 %1939 }
0x17a2   :  { %1942 = vst.msk [vmem:[#allocation2] sm:$0xc] %vm1061_vm13, %v1940_v5 }
0x17a5   :  { %v1713_v8 = vpop.permute.xlu1 %1712 }
0x17a6   :  { %1715 = vst.msk [vmem:[#allocation2 + $0x8] sm:$0xc] %vm831_vm7, %v1713_v8 }
0x17fe   :  { %v2159_v63 = vpop.permute.xlu0 %2158 }
0x17ff   :  { %2161 = vst.msk [vmem:[#allocation2] sm:$0x3] %vm1282_vm12, %v2159_v63 }
0x1802   :  { %v1935_v9 = vpop.permute.xlu0 %1934  ;;  %v2154_v44 = vpop.permute.xlu1 %2153 }
0x1803   :  { %1937 = vst.msk [vmem:[#allocation2 + $0x8] sm:$0x30] %vm1055_vm9, %v1935_v9 }
0x1804   :  { %2156 = vst.msk [vmem:[#allocation2 + $0x8] sm:$0xc0] %vm1276_vm8, %v2154_v44 }
0x1806   :  { %v2162_v17 = vld [vmem:[#allocation2] sm:$0xff] }
0x1807   :  { %5351 = vmatprep.mubr.msk.f32.mxu0 %vm2179_vm14, %v2162_v17  ;;  %5370 = vmatprep.mubr.msk.f32.mxu1 %vm2179_vm14, %v2162_v17 }
0x180b   :  { %v2163_v43 = vld [vmem:[#allocation2 + $0x8] sm:$0xff] }
0x180c   :  { %5352 = vmatmul.mubr.msk.f32.vlgmr.msra.gmra.mrb[14].mxu0 %vm2179_vm14, %v2163_v43  ;;  %5371 = vmatmul.mubr.msk.f32.vlgmr.msra.gmra.mrb[20].mxu1 %vm2179_vm14, %v2163_v43 }
0x180d   :  { %5381 = vmatprep.mubr.msk.f32.mxu0 %vm6588_vm5, %v6585_v20  ;;  %5392 = vmatprep.mubr.msk.f32.mxu1 %vm6588_vm5, %v6585_v20 }
0x180e   :  { %5761 = vmatpush3.bf16.msra.mxu0 %v7200_v26  ;;  %5767 = vmatpush3.bf16.msra.mxu1 %v7203_v34 }
0x180f   :  { %5762 = vmatprep.subr.bf16.mxu0 %v6587_v62  ;;  %5768 = vmatprep.subr.bf16.mxu1 %v6587_v62 }
0x1812   :  { %5764 = vmatpush3.bf16.msra.mxu0 %v7208_v38  ;;  %5770 = vmatpush3.bf16.msra.mxu1 %v7212_v41 }
0x1813   :  { %5771 = vmatprep.subr.bf16.mxu0 %v6587_v62  ;;  %5777 = vmatprep.subr.bf16.mxu1 %v6587_v62 }
0x18df   :  { %v5353_v14 = vpop.f32.mrb[14].mxu0  ;;  %v5372_v37 = vpop.f32.mrb[20].mxu1 }
0x18e0   :  { %v7179_v15 = vadd.f32 %v5353_v14, %v4873_v10  ;;  %v7181_v3 = vadd.f32 %v5372_v37, %v4876_v13  ;;  %v2252_v16 = vpop.f32.mrb[15].mxu0  ;;  %v2342_v6 = vpop.f32.mrb[21].mxu1 }
0x18e1   :  { %v7183_v18 = vadd.f32 %v4873_v10, %v2252_v16  ;;  %v7185_v7 = vadd.f32 %v4876_v13, %v2342_v6 }
0x18e2   :  { %6077 = vtanh.f32 %v7181_v3  ;;  %v4880_v22 = vmul.f32 -1.442695, %v7181_v3 }
0x18e3   :  { %6079 = vtanh.f32 %v7183_v18  ;;  %v4879_v23 = vmul.f32 -1.442695, %v7183_v18 }
0x18e4   :  { %6081 = vpow2.f32 %v4880_v22 }
0x18e5   :  { %6083 = vpow2.f32 %v4879_v23 }
0x18ec   :  { %v6078_v19 = vpop.eup %6077 }
0x18ed   :  { %v6080_v21 = vpop.eup %6079  ;;  %2385 = vrot.lane.b32.xlu0 %v6078_v19, %s6586_s5 }
0x18ee   :  { %2367 = vrot.lane.b32.xlu1 %v6080_v21, %s6586_s5  ;;  %v6082_v24 = vpop.eup %6081 }
0x18ef   :  { %v6084_v25 = vpop.eup %6083  ;;  %v2380_v27 = vadd.f32 1.0, %v6082_v24 }
0x18f0   :  { %v2362_v29 = vadd.f32 1.0, %v6084_v25 }
0x18f1   :  { %6085 = vrcp.f32 %v2380_v27 }
0x18f2   :  { %6087 = vrcp.f32 %v2362_v29 }
0x18fb   :  { %v6086_v30 = vpop.eup %6085 }
0x18fc   :  { %v6088_v31 = vpop.eup %6087 }
0x195f   :  { %v2386_v60 = vpop.permute.xlu0 %2385 }
0x1960   :  { %v7193_v47 = vmul.f32 %v6086_v30, %v2386_v60  ;;  %v2368_v28 = vpop.permute.xlu1 %2367 }
0x1961   :  { %v7195_v32 = vmul.f32 %v6088_v31, %v2368_v28 }
0x1962   :  { %6089 = vtanh.f32 %v7193_v47  ;;  %v2591_v5 = vrot.slane %v7193_v47, 2 }
0x1963   :  { %6091 = vtanh.f32 %v7195_v32  ;;  %v2562_v8 = vrot.slane %v7195_v32, 6 }
0x196c   :  { %v6090_v39 = vpop.eup %6089 }
0x196d   :  { %v6092_v40 = vpop.eup %6091  ;;  %2391 = vrot.lane.b32.xlu0 %v6090_v39, %s6589_s21 }
0x196e   :  { %2373 = vrot.lane.b32.xlu1 %v6092_v40, %s6589_s21 }
0x19df   :  { %v2392_v45 = vpop.permute.xlu0 %2391 }
0x19e0   :  { %v7221_v46 = vmul.f32 %v6086_v30, %v2392_v45  ;;  %v2374_v48 = vpop.permute.xlu1 %2373 }
0x19e1   :  { %v7223_v49 = vmul.f32 %v6088_v31, %v2374_v48 }
0x19e2   :  { %v2475_v50 = vrot.slane %v7221_v46, 6 }
0x19e3   :  { %2396 = vrot.lane.b32.xlu1 %v7223_v49, %s6590_s25 }
0x19e4   :  { %2476 = vrot.lane.b32.xlu0 %v2475_v50, %s6590_s25 }
0x1a55   :  { %v2397_v51 = vpop.permute.xlu1 %2396 }
0x1a56   :  { %5382 = vmatmul.mubr.msk.f32.vlgmr.msra.gmra.mrb[16].mxu0 %vm390_vm4, %v2397_v51  ;;  %v2477_v53 = vpop.permute.xlu0 %2476 }
0x1a57   :  { %5393 = vmatmul.mubr.msk.f32.vlgmr.msra.gmra.mrb[22].mxu1 %vm390_vm4, %v2477_v53  ;;  %5773 = vmatpush3.bf16.msra.mxu0 %v7200_v26 }
0x1a58   :  { %5779 = vmatpush3.bf16.msra.mxu1 %v7203_v34  ;;  %5414 = vmatprep.mubr.msk.f32.mxu1 %vm6588_vm5, %v6585_v20 }
0x1a59   :  { %5780 = vmatprep.subr.bf16.mxu1 %v6587_v62  ;;  %5774 = vmatprep.subr.bf16.mxu0 %v6587_v62 }
0x1a5a   :  { %5403 = vmatprep.mubr.msk.f32.mxu0 %vm6588_vm5, %v6585_v20 }
0x1a5b   :  { %5776 = vmatpush3.bf16.msra.mxu0 %v7208_v38 }
0x1a5c   :  { %5782 = vmatpush3.bf16.msra.mxu1 %v7212_v41  ;;  %5783 = vmatprep.subr.bf16.mxu0 %v6587_v62 }
0x1a5d   :  { %5789 = vmatprep.subr.bf16.mxu1 %v6587_v62 }
0x1b29   :  { %v2466_v54 = vpop.f32.mrb[16].mxu0 }
0x1b2a   :  { %v2471_v55 = vrot.slane %v2466_v54, 6  ;;  %v5383_v56 = vpop.f32.mrb[17].mxu0  ;;  %v2546_v58 = vpop.f32.mrb[22].mxu1 }
0x1b2b   :  { %v2551_v59 = vrot.slane %v2546_v58, 4  ;;  %v5394_v61 = vpop.f32.mrb[23].mxu1 }
0x1b2c   :  { %v2473_v1 = vadd.f32 %v2471_v55, %v7183_v18 }
0x1b2d   :  { %v2553_v2 = vadd.f32 %v2551_v59, %v7181_v3 }
0x1b2e   :  { %6093 = vtanh.f32 %v2473_v1  ;;  %v4883_v9 = vmul.f32 -1.442695, %v2473_v1 }
0x1b2f   :  { %6095 = vtanh.f32 %v2553_v2  ;;  %v4884_v63 = vmul.f32 -1.442695, %v2553_v2 }
0x1b31   :  { %6097 = vpow2.f32 %v4884_v63 }
0x1b32   :  { %6099 = vpow2.f32 %v4883_v9 }
0x1b38   :  { %v6094_v52 = vpop.eup %6093 }
0x1b39   :  { %v6096_v4 = vpop.eup %6095  ;;  %2568 = vrot.lane.b32.xlu1 %v6094_v52, %s6586_s5 }
0x1b3a   :  { %2597 = vrot.lane.b32.xlu0 %v6096_v4, %s6586_s5 }
0x1b3b   :  { %v6098_v44 = vpop.eup %6097 }
0x1b3c   :  { %v2586_v17 = vadd.f32 1.0, %v6098_v44  ;;  %v6100_v43 = vpop.eup %6099 }
0x1b3d   :  { %v2557_v10 = vadd.f32 1.0, %v6100_v43 }
0x1b3e   :  { %2592 = vrot.lane.b32.xlu0 %v2591_v5, %s6590_s25  ;;  %6101 = vrcp.f32 %v2586_v17 }
0x1b3f   :  { %6103 = vrcp.f32 %v2557_v10 }
0x1b42   :  { %2563 = vrot.lane.b32.xlu0 %v2562_v8, %s6590_s25 }
0x1b48   :  { %v6102_v13 = vpop.eup %6101 }
0x1b49   :  { %v6104_v6 = vpop.eup %6103 }
0x1bab   :  { %v2569_v16 = vpop.permute.xlu1 %2568 }
0x1bac   :  { %v2598_v14 = vpop.permute.xlu0 %2597  ;;  %v2571_v19 = vmul.f32 %v6104_v6, %v2569_v16 }
0x1bad   :  { %v2600_v37 = vmul.f32 %v6102_v13, %v2598_v14 }
0x1baf   :  { %2602 = vrot.lane.b32.xlu1 %v2600_v37, %s6590_s25 }
0x1bb0   :  { %v2593_v21 = vpop.permute.xlu0 %2592 }
0x1bb1   :  { %v2595_v22 = vmul.f32 %v6102_v13, %v2593_v21 }
0x1bb3   :  { %2573 = vrot.lane.b32.xlu1 %v2571_v19, %s6590_s25 }
0x1bb4   :  { %v2564_v23 = vpop.permute.xlu0 %2563 }
0x1bb5   :  { %v2566_v27 = vmul.f32 %v6104_v6, %v2564_v23 }
0x1c21   :  { %v2603_v24 = vpop.permute.xlu1 %2602 }
0x1c22   :  { %v7253_v25 = vadd.f32 %v2603_v24, %v2595_v22 }
0x1c24   :  { %6105 = vtanh.f32 %v7253_v25  ;;  %v2807_v63 = vrot.slane %v7253_v25, 2 }
0x1c25   :  { %v2574_v29 = vpop.permute.xlu1 %2573 }
0x1c26   :  { %v7256_v30 = vadd.f32 %v2574_v29, %v2566_v27 }
0x1c28   :  { %6107 = vtanh.f32 %v7256_v30  ;;  %v2780_v17 = vrot.slane %v7256_v30, 6 }
0x1c2e   :  { %v6106_v60 = vpop.eup %6105 }
0x1c2f   :  { %2608 = vrot.lane.b32.xlu0 %v6106_v60, %s6586_s5 }
0x1c32   :  { %v6108_v31 = vpop.eup %6107 }
0x1c33   :  { %2579 = vrot.lane.b32.xlu1 %v6108_v31, %s6586_s5 }
0x1ca1   :  { %v2609_v47 = vpop.permute.xlu0 %2608 }
0x1ca2   :  { %v7261_v28 = vmul.f32 %v6102_v13, %v2609_v47 }
0x1ca4   :  { %v2693_v32 = vrot.slane %v7261_v28, 4 }
0x1ca5   :  { %v2580_v11 = vpop.permute.xlu1 %2579 }
0x1ca6   :  { %v7264_v57 = vmul.f32 %v6104_v6, %v2580_v11  ;;  %2694 = vrot.lane.b32.xlu0 %v2693_v32, %s6590_s25 }
0x1ca8   :  { %v2613_v42 = vrot.slane %v7264_v57, 2 }
0x1caa   :  { %2614 = vrot.lane.b32.xlu1 %v2613_v42, %s6590_s25 }
0x1d18   :  { %v2695_v0 = vpop.permute.xlu0 %2694 }
0x1d19   :  { %5415 = vmatmul.mubr.msk.f32.vlgmr.msra.gmra.mrb[24].mxu1 %vm390_vm4, %v2695_v0 }
0x1d1a   :  { %5791 = vmatpush3.bf16.msra.mxu1 %v7203_v34  ;;  %5436 = vmatprep.mubr.msk.f32.mxu1 %vm6588_vm5, %v6585_v20 }
0x1d1b   :  { %5792 = vmatprep.subr.bf16.mxu1 %v6587_v62 }
0x1d1c   :  { %v2615_v33 = vpop.permute.xlu1 %2614 }
0x1d1d   :  { %5404 = vmatmul.mubr.msk.f32.vlgmr.msra.gmra.mrb[18].mxu0 %vm390_vm4, %v2615_v33 }
0x1d1e   :  { %5785 = vmatpush3.bf16.msra.mxu0 %v7200_v26  ;;  %5794 = vmatpush3.bf16.msra.mxu1 %v7212_v41 }
0x1d1f   :  { %5786 = vmatprep.subr.bf16.mxu0 %v6587_v62  ;;  %5425 = vmatprep.mubr.msk.f32.mxu0 %vm6588_vm5, %v6585_v20 }
0x1d20   :  { %5801 = vmatprep.subr.bf16.mxu1 %v6587_v62 }
0x1d22   :  { %5788 = vmatpush3.bf16.msra.mxu0 %v7208_v38 }
0x1d23   :  { %5795 = vmatprep.subr.bf16.mxu0 %v6587_v62 }
0x1dec   :  { %v2764_v12 = vpop.f32.mrb[24].mxu1 }
0x1ded   :  { %v2769_v35 = vrot.slane %v2764_v12, 6  ;;  %v5416_v36 = vpop.f32.mrb[25].mxu1 }
0x1def   :  { %v2771_v39 = vadd.f32 %v2769_v35, %v7181_v3 }
0x1df0   :  { %v2684_v40 = vpop.f32.mrb[18].mxu0 }
0x1df1   :  { %6109 = vtanh.f32 %v2771_v39  ;;  %v2689_v45 = vrot.slane %v2684_v40, 4  ;;  %v5405_v48 = vpop.f32.mrb[19].mxu0  ;;  %v4888_v54 = vmul.f32 -1.442695, %v2771_v39 }
0x1df3   :  { %v2691_v50 = vadd.f32 %v2689_v45, %v7183_v18 }
0x1df5   :  { %6111 = vtanh.f32 %v2691_v50  ;;  %v4887_v55 = vmul.f32 -1.442695, %v2691_v50 }
0x1df6   :  { %6113 = vpow2.f32 %v4888_v54 }
0x1df7   :  { %6115 = vpow2.f32 %v4887_v55 }
0x1dfb   :  { %v6110_v51 = vpop.eup %6109 }
0x1dfc   :  { %2811 = vrot.lane.b32.xlu0 %v6110_v51, %s6586_s5 }
0x1dff   :  { %v6112_v53 = vpop.eup %6111 }
0x1e00   :  { %2784 = vrot.lane.b32.xlu1 %v6112_v53, %s6586_s5  ;;  %v6114_v56 = vpop.eup %6113 }
0x1e01   :  { %v2802_v58 = vadd.f32 1.0, %v6114_v56  ;;  %v6116_v59 = vpop.eup %6115 }
0x1e02   :  { %v2775_v61 = vadd.f32 1.0, %v6116_v59 }
0x1e03   :  { %6117 = vrcp.f32 %v2802_v58 }
0x1e04   :  { %6119 = vrcp.f32 %v2775_v61 }
0x1e0d   :  { %v6118_v1 = vpop.eup %6117 }
0x1e0e   :  { %v6120_v4 = vpop.eup %6119  ;;  %v2809_v9 = vmul.f32 %v6118_v1, %v2807_v63 }
0x1e0f   :  { %v2782_v10 = vmul.f32 %v6120_v4, %v2780_v17 }
0x1e6e   :  { %v2812_v2 = vpop.permute.xlu0 %2811 }
0x1e6f   :  { %v2814_v52 = vmul.f32 %v6118_v1, %v2812_v2 }
0x1e71   :  { %2816 = vrot.lane.b32.xlu0 %v2814_v52, %s6590_s25 }
0x1e72   :  { %v2785_v5 = vpop.permute.xlu1 %2784 }
0x1e73   :  { %v2787_v8 = vmul.f32 %v6120_v4, %v2785_v5 }
0x1e75   :  { %2789 = vrot.lane.b32.xlu1 %v2787_v8, %s6590_s25 }
0x1ee3   :  { %v2817_v44 = vpop.permute.xlu0 %2816 }
0x1ee4   :  { %v7291_v43 = vadd.f32 %v2817_v44, %v2809_v9 }
0x1ee6   :  { %6121 = vtanh.f32 %v7291_v43  ;;  %v3018_v53 = vrot.slane %v7291_v43, 2 }
0x1ee7   :  { %v2790_v13 = vpop.permute.xlu1 %2789 }
0x1ee8   :  { %v7294_v14 = vadd.f32 %v2790_v13, %v2782_v10 }
0x1eea   :  { %6123 = vtanh.f32 %v7294_v14  ;;  %v2991_v58 = vrot.slane %v7294_v14, 6 }
0x1ef0   :  { %v6122_v37 = vpop.eup %6121 }
0x1ef1   :  { %2822 = vrot.lane.b32.xlu0 %v6122_v37, %s6586_s5 }
0x1ef4   :  { %v6124_v16 = vpop.eup %6123 }
0x1ef5   :  { %2795 = vrot.lane.b32.xlu1 %v6124_v16, %s6586_s5 }
0x1f63   :  { %v2823_v6 = vpop.permute.xlu0 %2822 }
0x1f64   :  { %v7299_v19 = vmul.f32 %v6118_v1, %v2823_v6 }
0x1f66   :  { %v2907_v21 = vrot.slane %v7299_v19, 2 }
0x1f67   :  { %v2796_v22 = vpop.permute.xlu1 %2795 }
0x1f68   :  { %v7302_v23 = vmul.f32 %v6120_v4, %v2796_v22  ;;  %2908 = vrot.lane.b32.xlu0 %v2907_v21, %s6590_s25 }
0x1f6a   :  { %v2827_v24 = vrot.slane %v7302_v23, 4 }
0x1f6c   :  { %2828 = vrot.lane.b32.xlu1 %v2827_v24, %s6590_s25 }
0x1fda   :  { %v2909_v25 = vpop.permute.xlu0 %2908 }
0x1fdb   :  { %5437 = vmatmul.mubr.msk.f32.vlgmr.msra.gmra.mrb[26].mxu1 %vm390_vm4, %v2909_v25 }
0x1fdc   :  { %5803 = vmatpush3.bf16.msra.mxu1 %v7203_v34  ;;  %5458 = vmatprep.mubr.msk.f32.mxu1 %vm6588_vm5, %v6585_v20 }
0x1fdd   :  { %5804 = vmatprep.subr.bf16.mxu1 %v6587_v62 }
0x1fde   :  { %v2829_v27 = vpop.permute.xlu1 %2828 }
0x1fdf   :  { %5426 = vmatmul.mubr.msk.f32.vlgmr.msra.gmra.mrb[20].mxu0 %vm390_vm4, %v2829_v27 }
0x1fe0   :  { %5806 = vmatpush3.bf16.msra.mxu1 %v7212_v41  ;;  %5797 = vmatpush3.bf16.msra.mxu0 %v7200_v26 }
0x1fe1   :  { %5798 = vmatprep.subr.bf16.mxu0 %v6587_v62  ;;  %5447 = vmatprep.mubr.msk.f32.mxu0 %vm6588_vm5, %v6585_v20 }
0x1fe2   :  { %5813 = vmatprep.subr.bf16.mxu1 %v6587_v62 }
0x1fe4   :  { %5800 = vmatpush3.bf16.msra.mxu0 %v7208_v38 }
0x1fe5   :  { %5807 = vmatprep.subr.bf16.mxu0 %v6587_v62 }
0x20ae   :  { %v2978_v29 = vpop.f32.mrb[26].mxu1 }
0x20af   :  { %v2982_v30 = vadd.f32 %v2978_v29, %v7181_v3  ;;  %v5438_v60 = vpop.f32.mrb[27].mxu1 }
0x20b1   :  { %6125 = vtanh.f32 %v2982_v30  ;;  %v4892_v33 = vmul.f32 -1.442695, %v2982_v30 }
0x20b2   :  { %v2898_v31 = vpop.f32.mrb[20].mxu0 }
0x20b3   :  { %v2903_v47 = vrot.slane %v2898_v31, 2  ;;  %v5427_v32 = vpop.f32.mrb[21].mxu0 }
0x20b5   :  { %v2905_v11 = vadd.f32 %v2903_v47, %v7183_v18 }
0x20b7   :  { %6127 = vtanh.f32 %v2905_v11  ;;  %v4891_v12 = vmul.f32 -1.442695, %v2905_v11 }
0x20b8   :  { %6129 = vpow2.f32 %v4892_v33 }
0x20b9   :  { %6131 = vpow2.f32 %v4891_v12 }
0x20bb   :  { %v6126_v42 = vpop.eup %6125 }
0x20bc   :  { %3022 = vrot.lane.b32.xlu0 %v6126_v42, %s6586_s5 }
0x20c1   :  { %v6128_v0 = vpop.eup %6127 }
0x20c2   :  { %2995 = vrot.lane.b32.xlu1 %v6128_v0, %s6586_s5  ;;  %v6130_v35 = vpop.eup %6129 }
0x20c3   :  { %v3013_v3 = vadd.f32 1.0, %v6130_v35  ;;  %v6132_v36 = vpop.eup %6131 }
0x20c4   :  { %v2986_v39 = vadd.f32 1.0, %v6132_v36 }
0x20c5   :  { %6133 = vrcp.f32 %v3013_v3 }
0x20c6   :  { %6135 = vrcp.f32 %v2986_v39 }
0x20cf   :  { %v6134_v40 = vpop.eup %6133 }
0x20d0   :  { %v6136_v48 = vpop.eup %6135  ;;  %v3020_v54 = vmul.f32 %v6134_v40, %v3018_v53 }
0x20d1   :  { %v2993_v59 = vmul.f32 %v6136_v48, %v2991_v58 }
0x212e   :  { %v3023_v45 = vpop.permute.xlu0 %3022 }
0x212f   :  { %v3025_v18 = vmul.f32 %v6134_v40, %v3023_v45 }
0x2131   :  { %3027 = vrot.lane.b32.xlu0 %v3025_v18, %s6590_s25 }
0x2134   :  { %v2996_v50 = vpop.permute.xlu1 %2995 }
0x2135   :  { %v2998_v51 = vmul.f32 %v6136_v48, %v2996_v50 }
0x2137   :  { %3000 = vrot.lane.b32.xlu1 %v2998_v51, %s6590_s25 }
0x21a3   :  { %v3028_v55 = vpop.permute.xlu0 %3027 }
0x21a4   :  { %v7328_v56 = vadd.f32 %v3028_v55, %v3020_v54 }
0x21a6   :  { %6137 = vtanh.f32 %v7328_v56  ;;  %v3228_v33 = vrot.slane %v7328_v56, 2 }
0x21a9   :  { %v3001_v61 = vpop.permute.xlu1 %3000 }
0x21aa   :  { %v7332_v1 = vadd.f32 %v3001_v61, %v2993_v59 }
0x21ac   :  { %6139 = vtanh.f32 %v7332_v1  ;;  %v3201_v36 = vrot.slane %v7332_v1, 6 }
0x21b0   :  { %v6138_v2 = vpop.eup %6137 }
0x21b1   :  { %3033 = vrot.lane.b32.xlu0 %v6138_v2, %s6586_s5 }
0x21b6   :  { %v6140_v52 = vpop.eup %6139 }
0x21b7   :  { %3006 = vrot.lane.b32.xlu1 %v6140_v52, %s6586_s5 }
0x2223   :  { %v3034_v4 = vpop.permute.xlu0 %3033 }
0x2224   :  { %v7337_v5 = vmul.f32 %v6134_v40, %v3034_v4 }
0x2226   :  { %3115 = vrot.lane.b32.xlu0 %v7337_v5, %s6590_s25 }
0x2229   :  { %v3007_v8 = vpop.permute.xlu1 %3006 }
0x222a   :  { %v7341_v63 = vmul.f32 %v6136_v48, %v3007_v8 }
0x222c   :  { %v3038_v9 = vrot.slane %v7341_v63, 6 }
0x222e   :  { %3039 = vrot.lane.b32.xlu1 %v3038_v9, %s6590_s25 }
0x2298   :  { %v3116_v44 = vpop.permute.xlu0 %3115 }
0x2299   :  { %5459 = vmatmul.mubr.msk.f32.vlgmr.msra.gmra.mrb[28].mxu1 %vm390_vm4, %v3116_v44 }
0x229a   :  { %5815 = vmatpush3.bf16.msra.mxu1 %v7203_v34  ;;  %5480 = vmatprep.mubr.msk.f32.mxu1 %vm6588_vm5, %v6585_v20 }
0x229b   :  { %5816 = vmatprep.subr.bf16.mxu1 %v6587_v62 }
0x229e   :  { %5818 = vmatpush3.bf16.msra.mxu1 %v7212_v41 }
0x229f   :  { %5825 = vmatprep.subr.bf16.mxu1 %v6587_v62 }
0x22a0   :  { %v3040_v17 = vpop.permute.xlu1 %3039 }
0x22a1   :  { %5448 = vmatmul.mubr.msk.f32.vlgmr.msra.gmra.mrb[22].mxu0 %vm390_vm4, %v3040_v17 }
0x22a2   :  { %5809 = vmatpush3.bf16.msra.mxu0 %v7200_v26  ;;  %5469 = vmatprep.mubr.msk.f32.mxu0 %vm6588_vm5, %v6585_v20 }
0x22a3   :  { %5810 = vmatprep.subr.bf16.mxu0 %v6587_v62 }
0x22a6   :  { %5812 = vmatpush3.bf16.msra.mxu0 %v7208_v38 }
0x22a7   :  { %5819 = vmatprep.subr.bf16.mxu0 %v6587_v62 }
0x236c   :  { %v3185_v43 = vpop.f32.mrb[28].mxu1 }
0x236d   :  { %v3190_v10 = vrot.slane %v3185_v43, 2  ;;  %v5460_v13 = vpop.f32.mrb[29].mxu1 }
0x236f   :  { %v3192_v14 = vadd.f32 %v3190_v10, %v7185_v7 }
0x2371   :  { %6141 = vtanh.f32 %v3192_v14  ;;  %v4896_v24 = vmul.f32 -1.442695, %v3192_v14 }
0x2374   :  { %v3109_v37 = vpop.f32.mrb[22].mxu0 }
0x2375   :  { %v3113_v16 = vadd.f32 %v3109_v37, %v7179_v15  ;;  %v5449_v6 = vpop.f32.mrb[23].mxu0 }
0x2377   :  { %6143 = vtanh.f32 %v3113_v16  ;;  %v4895_v25 = vmul.f32 -1.442695, %v3113_v16 }
0x2378   :  { %6145 = vpow2.f32 %v4896_v24 }
0x2379   :  { %6147 = vpow2.f32 %v4895_v25 }
0x237b   :  { %v6142_v21 = vpop.eup %6141 }
0x237c   :  { %3232 = vrot.lane.b32.xlu0 %v6142_v21, %s6586_s5 }
0x2381   :  { %v6144_v22 = vpop.eup %6143 }
0x2382   :  { %3205 = vrot.lane.b32.xlu1 %v6144_v22, %s6586_s5  ;;  %v6146_v27 = vpop.eup %6145 }
0x2383   :  { %v3223_v29 = vadd.f32 1.0, %v6146_v27  ;;  %v6148_v30 = vpop.eup %6147 }
0x2384   :  { %v3196_v60 = vadd.f32 1.0, %v6148_v30 }
0x2385   :  { %6149 = vrcp.f32 %v3223_v29 }
0x2386   :  { %6151 = vrcp.f32 %v3196_v60 }
0x238f   :  { %v6150_v31 = vpop.eup %6149 }
0x2390   :  { %v6152_v11 = vpop.eup %6151  ;;  %v3230_v12 = vmul.f32 %v6150_v31, %v3228_v33 }
0x2391   :  { %v3203_v39 = vmul.f32 %v6152_v11, %v3201_v36 }
0x23ee   :  { %v3233_v47 = vpop.permute.xlu0 %3232 }
0x23ef   :  { %v3235_v32 = vmul.f32 %v6150_v31, %v3233_v47 }
0x23f1   :  { %3237 = vrot.lane.b32.xlu0 %v3235_v32, %s6590_s25 }
0x23f4   :  { %v3206_v42 = vpop.permute.xlu1 %3205 }
0x23f5   :  { %v3208_v0 = vmul.f32 %v6152_v11, %v3206_v42 }
0x23f7   :  { %3210 = vrot.lane.b32.xlu1 %v3208_v0, %s6590_s25 }
0x2463   :  { %v3238_v35 = vpop.permute.xlu0 %3237 }
0x2464   :  { %v7366_v3 = vadd.f32 %v3238_v35, %v3230_v12 }
0x2466   :  { %6153 = vtanh.f32 %v7366_v3  ;;  %v3441_v29 = vrot.slane %v7366_v3, 2 }
0x2469   :  { %v3211_v40 = vpop.permute.xlu1 %3210 }
0x246a   :  { %v7370_v45 = vadd.f32 %v3211_v40, %v3203_v39 }
0x246c   :  { %6155 = vtanh.f32 %v7370_v45 }
0x2470   :  { %v6154_v18 = vpop.eup %6153 }
0x2471   :  { %3243 = vrot.lane.b32.xlu0 %v6154_v18, %s6586_s5 }
0x2476   :  { %v6156_v48 = vpop.eup %6155 }
0x2477   :  { %3216 = vrot.lane.b32.xlu1 %v6156_v48, %s6586_s5 }
0x24e3   :  { %v3244_v50 = vpop.permute.xlu0 %3243 }
0x24e4   :  { %v7375_v51 = vmul.f32 %v6150_v31, %v3244_v50  ;;  %v3414_v31 = vrot.slane %v7370_v45, 6 }
0x24e6   :  { %v3327_v53 = vrot.slane %v7375_v51, 6 }
0x24e8   :  { %3328 = vrot.lane.b32.xlu0 %v3327_v53, %s6590_s25 }
0x24e9   :  { %v3217_v54 = vpop.permute.xlu1 %3216 }
0x24ea   :  { %v7379_v55 = vmul.f32 %v6152_v11, %v3217_v54 }
0x24ec   :  { %3248 = vrot.lane.b32.xlu1 %v7379_v55, %s6590_s25 }
0x255a   :  { %v3329_v56 = vpop.permute.xlu0 %3328 }
0x255b   :  { %5481 = vmatmul.mubr.msk.f32.vlgmr.msra.gmra.mrb[30].mxu1 %vm390_vm4, %v3329_v56 }
0x255c   :  { %5827 = vmatpush3.bf16.msra.mxu1 %v7203_v34  ;;  %5502 = vmatprep.mubr.msk.f32.mxu1 %vm6588_vm5, %v6585_v20 }
0x255d   :  { %5828 = vmatprep.subr.bf16.mxu1 %v6587_v62 }
0x255e   :  { %v3249_v58 = vpop.permute.xlu1 %3248 }
0x255f   :  { %5470 = vmatmul.mubr.msk.f32.vlgmr.msra.gmra.mrb[24].mxu0 %vm390_vm4, %v3249_v58 }
0x2560   :  { %5821 = vmatpush3.bf16.msra.mxu0 %v7200_v26  ;;  %5830 = vmatpush3.bf16.msra.mxu1 %v7212_v41 }
0x2561   :  { %5822 = vmatprep.subr.bf16.mxu0 %v6587_v62  ;;  %5491 = vmatprep.mubr.msk.f32.mxu0 %vm6588_vm5, %v6585_v20 }
0x2562   :  { %5837 = vmatprep.subr.bf16.mxu1 %v6587_v62 }
0x2564   :  { %5824 = vmatpush3.bf16.msra.mxu0 %v7208_v38 }
0x2565   :  { %5831 = vmatprep.subr.bf16.mxu0 %v6587_v62 }
0x262e   :  { %v3398_v59 = vpop.f32.mrb[30].mxu1 }
0x262f   :  { %v3403_v61 = vrot.slane %v3398_v59, 4  ;;  %v5482_v1 = vpop.f32.mrb[31].mxu1 }
0x2631   :  { %v3405_v2 = vadd.f32 %v3403_v61, %v7185_v7 }
0x2632   :  { %v3318_v52 = vpop.f32.mrb[24].mxu0 }
0x2633   :  { %6157 = vtanh.f32 %v3405_v2  ;;  %v3323_v4 = vrot.slane %v3318_v52, 6  ;;  %v5471_v8 = vpop.f32.mrb[25].mxu0  ;;  %v4900_v43 = vmul.f32 -1.442695, %v3405_v2 }
0x2635   :  { %v3325_v9 = vadd.f32 %v3323_v4, %v7179_v15 }
0x2637   :  { %6159 = vtanh.f32 %v3325_v9  ;;  %v4899_v10 = vmul.f32 -1.442695, %v3325_v9 }
0x2638   :  { %6161 = vpow2.f32 %v4900_v43 }
0x2639   :  { %6163 = vpow2.f32 %v4899_v10 }
0x263d   :  { %v6158_v44 = vpop.eup %6157 }
0x263e   :  { %3445 = vrot.lane.b32.xlu0 %v6158_v44, %s6586_s5 }
0x2641   :  { %v6160_v17 = vpop.eup %6159 }
0x2642   :  { %3418 = vrot.lane.b32.xlu1 %v6160_v17, %s6586_s5  ;;  %v6162_v13 = vpop.eup %6161 }
0x2643   :  { %v3436_v14 = vadd.f32 1.0, %v6162_v13  ;;  %v6164_v37 = vpop.eup %6163 }
0x2644   :  { %v3409_v16 = vadd.f32 1.0, %v6164_v37 }
0x2645   :  { %6165 = vrcp.f32 %v3436_v14 }
0x2646   :  { %6167 = vrcp.f32 %v3409_v16 }
0x264f   :  { %v6166_v6 = vpop.eup %6165 }
0x2650   :  { %v6168_v24 = vpop.eup %6167  ;;  %v3443_v30 = vmul.f32 %v6166_v6, %v3441_v29 }
0x2651   :  { %v3416_v32 = vmul.f32 %v6168_v24, %v3414_v31 }
0x26b0   :  { %v3446_v21 = vpop.permute.xlu0 %3445 }
0x26b1   :  { %v3448_v22 = vmul.f32 %v6166_v6, %v3446_v21 }
0x26b3   :  { %3450 = vrot.lane.b32.xlu0 %v3448_v22, %s6590_s25 }
0x26b4   :  { %v3419_v25 = vpop.permute.xlu1 %3418 }
0x26b5   :  { %v3421_v27 = vmul.f32 %v6168_v24, %v3419_v25 }
0x26b7   :  { %3423 = vrot.lane.b32.xlu1 %v3421_v27, %s6590_s25 }
0x2725   :  { %v3451_v60 = vpop.permute.xlu0 %3450 }
0x2726   :  { %v7405_v47 = vadd.f32 %v3451_v60, %v3443_v30 }
0x2728   :  { %6169 = vtanh.f32 %v7405_v47  ;;  %v3655_v13 = vrot.slane %v7405_v47, 2 }
0x2729   :  { %v3424_v11 = vpop.permute.xlu1 %3423 }
0x272a   :  { %v7408_v42 = vadd.f32 %v3424_v11, %v3416_v32 }
0x272c   :  { %6171 = vtanh.f32 %v7408_v42  ;;  %v3628_v16 = vrot.slane %v7408_v42, 6 }
0x2732   :  { %v6170_v0 = vpop.eup %6169 }
0x2733   :  { %3456 = vrot.lane.b32.xlu0 %v6170_v0, %s6586_s5 }
0x2736   :  { %v6172_v33 = vpop.eup %6171 }
0x2737   :  { %3429 = vrot.lane.b32.xlu1 %v6172_v33, %s6586_s5 }
0x27a5   :  { %v3457_v12 = vpop.permute.xlu0 %3456 }
0x27a6   :  { %v7413_v35 = vmul.f32 %v6166_v6, %v3457_v12 }
0x27a8   :  { %v3541_v3 = vrot.slane %v7413_v35, 4 }
0x27a9   :  { %v3430_v36 = vpop.permute.xlu1 %3429 }
0x27aa   :  { %v7416_v39 = vmul.f32 %v6168_v24, %v3430_v36  ;;  %3542 = vrot.lane.b32.xlu0 %v3541_v3, %s6590_s25 }
0x27ac   :  { %v3461_v40 = vrot.slane %v7416_v39, 2 }
0x27ae   :  { %3462 = vrot.lane.b32.xlu1 %v3461_v40, %s6590_s25 }
0x281c   :  { %v3543_v45 = vpop.permute.xlu0 %3542 }
0x281d   :  { %5503 = vmatmul.mubr.msk.f32.vlgmr.msra.gmra.mrb[32].mxu1 %vm390_vm4, %v3543_v45 }
0x281e   :  { %5839 = vmatpush3.bf16.msra.mxu1 %v7203_v34  ;;  %5524 = vmatprep.mubr.msk.f32.mxu1 %vm6588_vm5, %v6585_v20 }
0x281f   :  { %5840 = vmatprep.subr.bf16.mxu1 %v6587_v62 }
0x2820   :  { %v3463_v18 = vpop.permute.xlu1 %3462 }
0x2821   :  { %5492 = vmatmul.mubr.msk.f32.vlgmr.msra.gmra.mrb[26].mxu0 %vm390_vm4, %v3463_v18 }
0x2822   :  { %5833 = vmatpush3.bf16.msra.mxu0 %v7200_v26  ;;  %5842 = vmatpush3.bf16.msra.mxu1 %v7212_v41 }
0x2823   :  { %5834 = vmatprep.subr.bf16.mxu0 %v6587_v62  ;;  %5513 = vmatprep.mubr.msk.f32.mxu0 %vm6588_vm5, %v6585_v20 }
0x2824   :  { %5843 = vmatprep.subr.bf16.mxu1 %v6587_v62 }
0x2826   :  { %5836 = vmatpush3.bf16.msra.mxu0 %v7208_v38 }
0x2827   :  { %5527 = vmatprep.subr.mxu0 %v6585_v20 }
0x28f0   :  { %v3612_v34 = vpop.f32.mrb[32].mxu1 }
0x28f1   :  { %v3617_v48 = vrot.slane %v3612_v34, 6  ;;  %v5504_v50 = vpop.f32.mrb[33].mxu1 }
0x28f3   :  { %v3619_v53 = vadd.f32 %v3617_v48, %v7185_v7 }
0x28f4   :  { %v3532_v54 = vpop.f32.mrb[26].mxu0 }
0x28f5   :  { %6173 = vtanh.f32 %v3619_v53  ;;  %v3537_v26 = vrot.slane %v3532_v54, 4  ;;  %v5493_v41 = vpop.f32.mrb[27].mxu0  ;;  %v4904_v38 = vmul.f32 -1.442695, %v3619_v53 }
0x28f7   :  { %v3539_v56 = vadd.f32 %v3537_v26, %v7179_v15 }
0x28f9   :  { %6175 = vtanh.f32 %v3539_v56  ;;  %v4903_v61 = vmul.f32 -1.442695, %v3539_v56 }
0x28fa   :  { %6177 = vpow2.f32 %v4904_v38 }
0x28fb   :  { %6179 = vpow2.f32 %v4903_v61  ;;  %v4909_v61 = vld [vmem:[#allocation16] ss:$0 sm:$0xff] }
0x28ff   :  { %v6174_v58 = vpop.eup %6173 }
0x2900   :  { %3659 = vrot.lane.b32.xlu0 %v6174_v58, %s6586_s5 }
0x2903   :  { %v6176_v59 = vpop.eup %6175 }
0x2904   :  { %3632 = vrot.lane.b32.xlu1 %v6176_v59, %s6586_s5  ;;  %v6178_v1 = vpop.eup %6177 }
0x2905   :  { %v3650_v2 = vadd.f32 1.0, %v6178_v1  ;;  %v6180_v52 = vpop.eup %6179 }
0x2906   :  { %v3623_v4 = vadd.f32 1.0, %v6180_v52 }
0x2907   :  { %6181 = vrcp.f32 %v3650_v2 }
0x2908   :  { %6183 = vrcp.f32 %v3623_v4 }
0x2911   :  { %v6182_v8 = vpop.eup %6181 }
0x2912   :  { %v6184_v17 = vpop.eup %6183  ;;  %v3657_v14 = vmul.f32 %v6182_v8, %v3655_v13 }
0x2913   :  { %v3630_v21 = vmul.f32 %v6184_v17, %v3628_v16 }
0x2972   :  { %v3660_v9 = vpop.permute.xlu0 %3659 }
0x2973   :  { %v3662_v44 = vmul.f32 %v6182_v8, %v3660_v9 }
0x2975   :  { %3664 = vrot.lane.b32.xlu0 %v3662_v44, %s6590_s25 }
0x2976   :  { %v3633_v43 = vpop.permute.xlu1 %3632 }
0x2977   :  { %v3635_v10 = vmul.f32 %v6184_v17, %v3633_v43 }
0x2979   :  { %3637 = vrot.lane.b32.xlu1 %v3635_v10, %s6590_s25 }
0x29e7   :  { %v3665_v37 = vpop.permute.xlu0 %3664 }
0x29e8   :  { %v3667_v6 = vadd.f32 %v3665_v37, %v3657_v14 }
0x29ea   :  { %6185 = vtanh.f32 %v3667_v6  ;;  %v3866_v1 = vrot.slane %v3667_v6, 2 }
0x29eb   :  { %v3638_v22 = vpop.permute.xlu1 %3637 }
0x29ec   :  { %v3640_v24 = vadd.f32 %v3638_v22, %v3630_v21 }
0x29ee   :  { %6187 = vtanh.f32 %v3640_v24 }
0x29f4   :  { %v6186_v25 = vpop.eup %6185 }
0x29f5   :  { %3670 = vrot.lane.b32.xlu0 %v6186_v25, %s6586_s5 }
0x29f8   :  { %v6188_v27 = vpop.eup %6187 }
0x29f9   :  { %3643 = vrot.lane.b32.xlu1 %v6188_v27, %s6586_s5 }
0x2a67   :  { %v3671_v29 = vpop.permute.xlu0 %3670 }
0x2a68   :  { %v7445_v30 = vmul.f32 %v6182_v8, %v3671_v29  ;;  %v3839_v8 = vrot.slane %v3640_v24, 6 }
0x2a6a   :  { %v3755_v60 = vrot.slane %v7445_v30, 2 }
0x2a6b   :  { %v3644_v31 = vpop.permute.xlu1 %3643 }
0x2a6c   :  { %v7448_v47 = vmul.f32 %v6184_v17, %v3644_v31  ;;  %3756 = vrot.lane.b32.xlu0 %v3755_v60, %s6590_s25 }
0x2a6e   :  { %v3675_v32 = vrot.slane %v7448_v47, 4 }
0x2a70   :  { %3676 = vrot.lane.b32.xlu1 %v3675_v32, %s6590_s25 }
0x2ade   :  { %v3757_v11 = vpop.permute.xlu0 %3756 }
0x2adf   :  { %5525 = vmatmul.mubr.msk.f32.vlgmr.msra.gmra.mrb[34].mxu1 %vm390_vm4, %v3757_v11 }
0x2ae0   :  { %5540 = vmatprep.mubr.msk.f32.mxu1 %vm6588_vm5, %v6585_v20 }
0x2ae2   :  { %v3677_v42 = vpop.permute.xlu1 %3676 }
0x2ae3   :  { %5514 = vmatmul.mubr.msk.f32.vlgmr.msra.gmra.mrb[28].mxu0 %vm390_vm4, %v3677_v42 }
0x2ae4   :  { %5529 = vmatprep.mubr.msk.f32.mxu0 %vm6588_vm5, %v6585_v20 }
0x2bb2   :  { %v3826_v0 = vpop.f32.mrb[34].mxu1 }
0x2bb3   :  { %v3830_v33 = vadd.f32 %v3826_v0, %v7185_v7  ;;  %v5526_v12 = vpop.f32.mrb[35].mxu1 }
0x2bb5   :  { %6189 = vtanh.f32 %v3830_v33  ;;  %v4908_v48 = vmul.f32 -1.442695, %v3830_v33 }
0x2bb6   :  { %v3746_v3 = vpop.f32.mrb[28].mxu0 }
0x2bb7   :  { %v3751_v36 = vrot.slane %v3746_v3, 2  ;;  %v5515_v40 = vpop.f32.mrb[29].mxu0 }
0x2bb9   :  { %v3753_v45 = vadd.f32 %v3751_v36, %v7179_v15 }
0x2bbb   :  { %6191 = vtanh.f32 %v3753_v45  ;;  %v4907_v50 = vmul.f32 -1.442695, %v3753_v45 }
0x2bbc   :  { %6193 = vpow2.f32 %v4908_v48 }
0x2bbd   :  { %6195 = vpow2.f32 %v4907_v50  ;;  %v3886_v50 = vld [vmem:[#allocation3] sm:$0x1] }
0x2bbe   :  { %5894 = vpush %v3886_v50 }
0x2bbf   :  { %v6190_v18 = vpop.eup %6189 }
0x2bc0   :  { %3870 = vrot.lane.b32.xlu0 %v6190_v18, %s6586_s5 }
0x2bc5   :  { %v6192_v34 = vpop.eup %6191 }
0x2bc6   :  { %3843 = vrot.lane.b32.xlu1 %v6192_v34, %s6586_s5  ;;  %v6194_v53 = vpop.eup %6193 }
0x2bc7   :  { %v3861_v7 = vadd.f32 1.0, %v6194_v53  ;;  %v6196_v54 = vpop.eup %6195 }
0x2bc8   :  { %v3834_v26 = vadd.f32 1.0, %v6196_v54 }
0x2bc9   :  { %6197 = vrcp.f32 %v3861_v7 }
0x2bca   :  { %6199 = vrcp.f32 %v3834_v26 }
0x2bd3   :  { %v6198_v41 = vpop.eup %6197 }
0x2bd4   :  { %v6200_v58 = vpop.eup %6199  ;;  %v3868_v2 = vmul.f32 %v6198_v41, %v3866_v1 }
0x2bd5   :  { %v3841_v9 = vmul.f32 %v6200_v58, %v3839_v8 }
0x2bef   :  { %s5895_s17 = spop %5894 }
0x2c32   :  { %v3871_v56 = vpop.permute.xlu0 %3870 }
0x2c33   :  { %v3873_v15 = vmul.f32 %v6198_v41, %v3871_v56 }
0x2c35   :  { %3875 = vrot.lane.b32.xlu0 %v3873_v15, %s6590_s25 }
0x2c38   :  { %v3844_v59 = vpop.permute.xlu1 %3843 }
0x2c39   :  { %v3846_v38 = vmul.f32 %v6200_v58, %v3844_v59 }
0x2c3b   :  { %3848 = vrot.lane.b32.xlu1 %v3846_v38, %s6590_s25 }
0x2c3f   :  { %3895 = vrot.lane.b32.xlu1 %v4909_v61, %s6589_s21 }
0x2ca7   :  { %v3876_v52 = vpop.permute.xlu0 %3875 }
0x2ca8   :  { %v3878_v4 = vadd.f32 %v3876_v52, %v3868_v2 }
0x2caa   :  { %6201 = vtanh.f32 %v3878_v4 }
0x2cad   :  { %v3849_v44 = vpop.permute.xlu1 %3848 }
0x2cae   :  { %v3851_v17 = vadd.f32 %v3849_v44, %v3841_v9 }
0x2cb0   :  { %6203 = vtanh.f32 %v3851_v17 }
0x2cb1   :  { %v3896_v10 = vpop.permute.xlu1 %3895 }
0x2cb2   :  { %v3923_v14 = vmul.f32 %v3896_v10, %v7264_v57  ;;  %v3898_v37 = vmul.f32 %v3896_v10, %v7223_v49  ;;  %v3943_v16 = vmul.f32 %v3896_v10, %v7302_v23  ;;  %v3963_v6 = vmul.f32 %v3896_v10, %v7341_v63 }
0x2cb3   :  { %v3983_v21 = vmul.f32 %v3896_v10, %v7379_v55  ;;  %v4004_v22 = vmul.f32 %v3896_v10, %v7416_v39  ;;  %v4024_v24 = vmul.f32 %v3896_v10, %v7448_v47 }
0x2cb4   :  { %v6202_v43 = vpop.eup %6201 }
0x2cb5   :  { %3881 = vrot.lane.b32.xlu0 %v6202_v43, %s6586_s5 }
0x2cb9   :  { %3906 = vrot.lane.b32.xlu0 %v4909_v61, %s6586_s5 }
0x2cba   :  { %v6204_v13 = vpop.eup %6203 }
0x2cbb   :  { %3854 = vrot.lane.b32.xlu1 %v6204_v13, %s6586_s5 }
0x2cbd   :  { %3925 = vrot.lane.b32.xlu0 %v3923_v14, %s6590_s25 }
0x2cc1   :  { %3900 = vrot.lane.b32.xlu0 %v3898_v37, %s6590_s25 }
0x2cc5   :  { %3945 = vrot.lane.b32.xlu0 %v3943_v16, %s6590_s25 }
0x2cc9   :  { %3965 = vrot.lane.b32.xlu0 %v3963_v6, %s6590_s25 }
0x2ccd   :  { %3985 = vrot.lane.b32.xlu0 %v3983_v21, %s6590_s25 }
0x2cd1   :  { %4006 = vrot.lane.b32.xlu0 %v4004_v22, %s6590_s25 }
0x2cd5   :  { %4026 = vrot.lane.b32.xlu0 %v4024_v24, %s6590_s25  ;;  %v4255_v24 = vld [vmem:[%s7636_s15] sm:$0xff] }
0x2cd6   :  { %5528 = vmatpush3.msra.mxu0 %v4255_v24 }
0x2cd7   :  { %5849 = vmatprep.subr.bf16.mxu0 %v6587_v62 }
0x2d27   :  { %v3882_v25 = vpop.permute.xlu0 %3881 }
0x2d28   :  { %v7494_v33 = vmul.f32 %v6198_v41, %v3882_v25  ;;  %v4254_v25 = vld [vmem:[%s7637_s18] sm:$0x3] }
0x2d29   :  { %5530 = vmatmul.mubr.msk.f32.vlgmr.msra.gmra.mrb[30].mxu0 %vm4263_vm15, %v4254_v25 }
0x2d2a   :  { %5551 = vmatprep.mubr.msk.f32.mxu0 %vm6588_vm5, %v6585_v20 }
0x2d2b   :  { %v3907_v27 = vpop.permute.xlu0 %3906 }
0x2d2c   :  { %v3931_v29 = vmul.f32 %v3907_v27, %v7445_v30  ;;  %v3951_v11 = vmul.f32 %v3907_v27, %v7413_v35  ;;  %v3971_v42 = vmul.f32 %v3907_v27, %v7375_v51  ;;  %v3991_v0 = vmul.f32 %v3907_v27, %v7337_v5 }
0x2d2d   :  { %v3855_v60 = vpop.permute.xlu1 %3854  ;;  %v3909_v12 = vmul.f32 %v3907_v27, %v7494_v33  ;;  %v4012_v3 = vmul.f32 %v3907_v27, %v7299_v19  ;;  %v4032_v36 = vmul.f32 %v3907_v27, %v7261_v28  ;;  %v4052_v40 = vmul.f32 %v3907_v27, %v7221_v46 }
0x2d2e   :  { %v7484_v31 = vmul.f32 %v6200_v58, %v3855_v60  ;;  %3933 = vrot.lane.b32.xlu1 %v3931_v29, %s6590_s25 }
0x2d2f   :  { %v3926_v45 = vpop.permute.xlu0 %3925 }
0x2d30   :  { %v4044_v32 = vmul.f32 %v3896_v10, %v7484_v31  ;;  %v3928_v18 = vsel %vm831_vm7, %v3926_v45, 0.0 }
0x2d32   :  { %4046 = vrot.lane.b32.xlu0 %v4044_v32, %s6590_s25  ;;  %3953 = vrot.lane.b32.xlu1 %v3951_v11, %s6590_s25 }
0x2d33   :  { %v3901_v34 = vpop.permute.xlu0 %3900 }
0x2d34   :  { %v3903_v48 = vsel %vm606_vm6, %v3901_v34, 0.0 }
0x2d36   :  { %3973 = vrot.lane.b32.xlu1 %v3971_v42, %s6590_s25 }
0x2d37   :  { %v3946_v53 = vpop.permute.xlu0 %3945 }
0x2d38   :  { %v3948_v56 = vsel %vm1055_vm9, %v3946_v53, 0.0 }
0x2d3a   :  { %3993 = vrot.lane.b32.xlu1 %v3991_v0, %s6590_s25  ;;  %v3918_v0 = vstv %s5895_s17 }
0x2d3b   :  { %v3966_v7 = vpop.permute.xlu0 %3965 }
0x2d3c   :  { %v3968_v38 = vsel %vm1276_vm8, %v3966_v7, 0.0 }
0x2d3e   :  { %3911 = vrot.lane.b32.xlu1 %v3909_v12, %s6590_s25 }
0x2d3f   :  { %v3986_v58 = vpop.permute.xlu0 %3985 }
0x2d40   :  { %v3988_v52 = vsel %vm606_vm6, %v3986_v58, 0.0 }
0x2d42   :  { %4014 = vrot.lane.b32.xlu1 %v4012_v3, %s6590_s25 }
0x2d43   :  { %v4007_v1 = vpop.permute.xlu0 %4006 }
0x2d44   :  { %v4009_v9 = vsel %vm831_vm7, %v4007_v1, 0.0 }
0x2d46   :  { %4034 = vrot.lane.b32.xlu1 %v4032_v36, %s6590_s25 }
0x2d47   :  { %v4027_v17 = vpop.permute.xlu0 %4026 }
0x2d48   :  { %v4029_v10 = vsel %vm1055_vm9, %v4027_v17, 0.0 }
0x2d4a   :  { %4054 = vrot.lane.b32.xlu1 %v4052_v40, %s6590_s25 }
0x2d51   :  { %3929 = vadd.xlane.f32.xlu0 %v3928_v18 }
0x2d55   :  { %3904 = vadd.xlane.f32.xlu0 %v3903_v48 }
0x2da0   :  { %v3934_v54 = vpop.permute.xlu1 %3933 }
0x2da1   :  { %v3936_v26 = vsel %vm831_vm7, %v3934_v54, 0.0 }
0x2da2   :  { %3937 = vadd.xlane.f32.xlu1 %v3936_v26 }
0x2da4   :  { %v3954_v41 = vpop.permute.xlu1 %3953  ;;  %v4047_v14 = vpop.permute.xlu0 %4046 }
0x2da5   :  { %v3956_v15 = vsel %vm1055_vm9, %v3954_v41, 0.0  ;;  %v4049_v16 = vsel %vm1276_vm8, %v4047_v14, 0.0 }
0x2da6   :  { %3957 = vadd.xlane.f32.xlu0 %v3956_v15  ;;  %3949 = vadd.xlane.f32.xlu1 %v3948_v56 }
0x2da8   :  { %v3974_v59 = vpop.permute.xlu1 %3973 }
0x2da9   :  { %v3976_v61 = vsel %vm1276_vm8, %v3974_v59, 0.0  ;;  %v3888_v59 = vld [vmem:[%s7638_s26] sm:$0xff] }
0x2daa   :  { %3977 = vadd.xlane.f32.xlu0 %v3976_v61  ;;  %3969 = vadd.xlane.f32.xlu1 %v3968_v38  ;;  %vm3921_vm0 = vcmp.eq.f32.partialorder %v3888_v59, 0.0 }
0x2dac   :  { %v3994_v2 = vpop.permute.xlu1 %3993 }
0x2dad   :  { %v3996_v4 = vsel %vm606_vm6, %v3994_v2, 0.0 }
0x2dae   :  { %3997 = vadd.xlane.f32.xlu0 %v3996_v4  ;;  %3989 = vadd.xlane.f32.xlu1 %v3988_v52 }
0x2db0   :  { %v3912_v8 = vpop.permute.xlu1 %3911 }
0x2db1   :  { %v3914_v44 = vsel %vm606_vm6, %v3912_v8, 0.0 }
0x2db2   :  { %3915 = vadd.xlane.f32.xlu0 %v3914_v44  ;;  %4010 = vadd.xlane.f32.xlu1 %v4009_v9 }
0x2db4   :  { %v4015_v43 = vpop.permute.xlu1 %4014 }
0x2db5   :  { %v4017_v13 = vsel %vm831_vm7, %v4015_v43, 0.0 }
0x2db6   :  { %4018 = vadd.xlane.f32.xlu0 %v4017_v13  ;;  %4030 = vadd.xlane.f32.xlu1 %v4029_v10 }
0x2db8   :  { %v4035_v37 = vpop.permute.xlu1 %4034 }
0x2db9   :  { %v4037_v6 = vsel %vm1055_vm9, %v4035_v37, 0.0 }
0x2dba   :  { %4038 = vadd.xlane.f32.xlu0 %v4037_v6  ;;  %4050 = vadd.xlane.f32.xlu1 %v4049_v16 }
0x2dbc   :  { %v4055_v21 = vpop.permute.xlu1 %4054 }
0x2dbd   :  { %v4057_v22 = vsel %vm1276_vm8, %v4055_v21, 0.0  ;;  %v3889_v21 = vld [vmem:[%s7638_s26 + $0x8] sm:$0xff] }
0x2dbe   :  { %4058 = vadd.xlane.f32.xlu0 %v4057_v22  ;;  %vm4002_vm1 = vcmp.eq.f32.partialorder %v3889_v21, 0.0 }
0x2dde   :  { %v3930_v27 = vpop.xlane.xlu0 %3929 }
0x2de2   :  { %v3905_v29 = vpop.xlane.xlu0 %3904 }
0x2e2f   :  { %v3938_v60 = vpop.xlane.xlu1 %3937 }
0x2e30   :  { %v3939_v42 = vadd.f32 %v3938_v60, %v3930_v27 }
0x2e32   :  { %v3940_v40 = vadd.f32 %v3939_v42, %v3918_v0 }
0x2e33   :  { %v3950_v32 = vpop.xlane.xlu1 %3949  ;;  %v3958_v11 = vpop.xlane.xlu0 %3957 }
0x2e34   :  { %v3959_v36 = vadd.f32 %v3958_v11, %v3950_v32  ;;  %6205 = vtanh.f32 %v3940_v40 }
0x2e36   :  { %v3960_v48 = vadd.f32 %v3959_v36, %v3918_v0 }
0x2e37   :  { %v3970_v12 = vpop.xlane.xlu1 %3969  ;;  %v3978_v3 = vpop.xlane.xlu0 %3977 }
0x2e38   :  { %v3979_v45 = vadd.f32 %v3978_v3, %v3970_v12  ;;  %6207 = vtanh.f32 %v3960_v48 }
0x2e3a   :  { %v3980_v50 = vadd.f32 %v3979_v45, %v3918_v0 }
0x2e3b   :  { %v3990_v18 = vpop.xlane.xlu1 %3989  ;;  %v3998_v34 = vpop.xlane.xlu0 %3997 }
0x2e3c   :  { %v3999_v53 = vadd.f32 %v3998_v34, %v3990_v18  ;;  %6209 = vtanh.f32 %v3980_v50 }
0x2e3e   :  { %v4000_v56 = vadd.f32 %v3999_v53, %v3918_v0  ;;  %v6206_v2 = vpop.eup %6205 }
0x2e3f   :  { %v4011_v7 = vpop.xlane.xlu1 %4010  ;;  %v3916_v54 = vpop.xlane.xlu0 %3915  ;;  %v3942_v9 = vsel %vm3921_vm0, -1e+09, %v6206_v2 }
0x2e40   :  { %v3917_v26 = vadd.f32 %v3916_v54, %v3905_v29  ;;  %v4065_v37 = vrot.slane %v3942_v9, 2 }
0x2e42   :  { %v3919_v41 = vadd.f32 %v3918_v0, %v3917_v26  ;;  %v6208_v4 = vpop.eup %6207 }
0x2e43   :  { %v4019_v15 = vpop.xlane.xlu0 %4018  ;;  %v4031_v38 = vpop.xlane.xlu1 %4030  ;;  %v3962_v13 = vsel %vm3921_vm0, -1e+09, %v6208_v4 }
0x2e44   :  { %6211 = vtanh.f32 %v3919_v41  ;;  %v4020_v58 = vadd.f32 %v4019_v15, %v4011_v7  ;;  %v4069_v24 = vrot.slane %v3962_v13, 4 }
0x2e45   :  { %6213 = vtanh.f32 %v4000_v56 }
0x2e46   :  { %v4021_v61 = vadd.f32 %v4020_v58, %v3918_v0  ;;  %v6210_v43 = vpop.eup %6209 }
0x2e47   :  { %v4039_v1 = vpop.xlane.xlu0 %4038  ;;  %v4051_v44 = vpop.xlane.xlu1 %4050  ;;  %v3982_v6 = vsel %vm3921_vm0, -1e+09, %v6210_v43 }
0x2e48   :  { %6215 = vtanh.f32 %v4021_v61  ;;  %v4040_v52 = vadd.f32 %v4039_v1, %v4031_v38  ;;  %v4073_v60 = vrot.slane %v3982_v6, 6 }
0x2e4a   :  { %v4041_v8 = vadd.f32 %v4040_v52, %v3918_v0 }
0x2e4b   :  { %v4059_v17 = vpop.xlane.xlu0 %4058 }
0x2e4c   :  { %6217 = vtanh.f32 %v4041_v8  ;;  %v4060_v10 = vadd.f32 %v4059_v17, %v4051_v44 }
0x2e4e   :  { %v6212_v14 = vpop.eup %6211  ;;  %v4061_v16 = vadd.f32 %v4060_v10, %v3918_v0 }
0x2e4f   :  { %v3922_v22 = vsel %vm3921_vm0, -1e+09, %v6212_v14  ;;  %v6214_v27 = vpop.eup %6213 }
0x2e50   :  { %v4067_v25 = vmax.f32 %v3922_v22, %v4065_v37  ;;  %6219 = vtanh.f32 %v4061_v16  ;;  %v4003_v12 = vsel %vm4002_vm1, -1e+09, %v6214_v27 }
0x2e52   :  { %v6216_v29 = vpop.eup %6215  ;;  %v4071_v32 = vmax.f32 %v4067_v25, %v4069_v24 }
0x2e53   :  { %v4023_v11 = vsel %vm4002_vm1, -1e+09, %v6216_v29 }
0x2e54   :  { %v4075_v42 = vmax.f32 %v4071_v32, %v4073_v60  ;;  %v4078_v40 = vrot.slane %v4023_v11, 2 }
0x2e56   :  { %v6218_v3 = vpop.eup %6217  ;;  %v4076_v36 = vmax.f32 %v4075_v42, %v4003_v12 }
0x2e57   :  { %v4043_v0 = vsel %vm4002_vm1, -1e+09, %v6218_v3 }
0x2e58   :  { %v4080_v45 = vmax.f32 %v4076_v36, %v4078_v40  ;;  %v4082_v18 = vrot.slane %v4043_v0, 4 }
0x2e5a   :  { %v6220_v34 = vpop.eup %6219  ;;  %v4084_v50 = vmax.f32 %v4080_v45, %v4082_v18 }
0x2e5b   :  { %v4063_v48 = vsel %vm4002_vm1, -1e+09, %v6220_v34  ;;  %v4338_v34 = vld [vmem:[%s7639_s6] sm:$0x3] }
0x2e5c   :  { %v4086_v53 = vrot.slane %v4063_v48, 6 }
0x2e5e   :  { %v4088_v7 = vmax.f32 %v4084_v50, %v4086_v53  ;;  %v4366_v50 = vld [vmem:[%s7640_s14 + $0x28] sm:$0xff]  ;;  %v4367_v53 = vld [vmem:[%s7640_s14 + $0x30] sm:$0xff] }
0x2e60   :  { %v4089_v54 = vsub.f32 %v3922_v22, %v4088_v7  ;;  %v4093_v26 = vrot.slane %v4088_v7, 6  ;;  %v4098_v41 = vrot.slane %v4088_v7, 4  ;;  %v4103_v56 = vrot.slane %v4088_v7, 2 }
0x2e61   :  { %v4108_v15 = vsub.f32 %v4003_v12, %v4088_v7 }
0x2e62   :  { %v4090_v58 = vmul.f32 1.442695, %v4089_v54  ;;  %v4095_v59 = vsub.f32 %v3942_v9, %v4093_v26  ;;  %v4100_v38 = vsub.f32 %v3962_v13, %v4098_v41  ;;  %v4105_v61 = vsub.f32 %v3982_v6, %v4103_v56  ;;  %v4368_v54 = vld [vmem:[%s7640_s14 + $0x38] sm:$0xff] }
0x2e63   :  { %v4109_v1 = vmul.f32 1.442695, %v4108_v15  ;;  %v4111_v2 = vsub.f32 %v4023_v11, %v4093_v26  ;;  %v4114_v52 = vsub.f32 %v4043_v0, %v4098_v41  ;;  %v4117_v10 = vsub.f32 %v4063_v48, %v4103_v56  ;;  %v4365_v48 = vld [vmem:[%s7640_s14 + $0x20] sm:$0xff]  ;;  %v4362_v41 = vld [vmem:[%s7640_s14 + $0x8] sm:$0xff] }
0x2e64   :  { %6221 = vpow2.f32 %v4090_v58  ;;  %v4096_v4 = vmul.f32 1.442695, %v4095_v59  ;;  %v4101_v8 = vmul.f32 1.442695, %v4100_v38  ;;  %v4106_v44 = vmul.f32 1.442695, %v4105_v61 }
0x2e65   :  { %6223 = vpow2.f32 %v4109_v1  ;;  %v4112_v17 = vmul.f32 1.442695, %v4111_v2  ;;  %v4115_v43 = vmul.f32 1.442695, %v4114_v52  ;;  %v4118_v14 = vmul.f32 1.442695, %v4117_v10 }
0x2e66   :  { %6225 = vpow2.f32 %v4096_v4  ;;  %v5844_v7 = vpack.c.bf16 %v4366_v50, %v4365_v48  ;;  %v4361_v26 = vld [vmem:[%s7640_s14] sm:$0xff]  ;;  %v5847_v15 = vpack.c.bf16 %v4368_v54, %v4367_v53  ;;  %v4333_v50 = vpop.f32.mrb[30].mxu0 }
0x2e67   :  { %6227 = vpow2.f32 %v4101_v8  ;;  %v5850_v56 = vpack.c.bf16 %v4362_v41, %v4361_v26  ;;  %v5531_v53 = vpop.f32.mrb[31].mxu0  ;;  %v4519_v26 = vld [vmem:[%s7641_s22] sm:$0xff]  ;;  %v4520_v41 = vld [vmem:[%s7641_s22 + $0x8] sm:$0xff] }
0x2e68   :  { %6229 = vpow2.f32 %v4106_v44  ;;  %5845 = vmatpush3.bf16.msra.mxu1 %v5844_v7 }
0x2e69   :  { %6231 = vpow2.f32 %v4112_v17  ;;  %5846 = vmatprep.subr.bf16.mxu1 %v6587_v62  ;;  %5851 = vmatpush3.bf16.msra.mxu0 %v5850_v56  ;;  %v4912_v56 = vld [vmem:[%s7642_s1] ss:$0 sm:$0xff] }
0x2e6a   :  { %6233 = vpow2.f32 %v4115_v43  ;;  %5852 = vmatprep.subr.bf16.mxu0 %v6587_v62 }
0x2e6b   :  { %6235 = vpow2.f32 %v4118_v14 }
0x2e6c   :  { %5848 = vmatpush3.bf16.msra.mxu1 %v5847_v15 }
0x2e6d   :  { %5855 = vmatprep.subr.bf16.mxu1 %v6587_v62 }
0x2e6e   :  { %v6222_v9 = vpop.eup %6221 }
0x2e6f   :  { %v6224_v13 = vpop.eup %6223  ;;  %4149 = vperm.xlu0 %5947, %v6222_v9  }
0x2e70   :  { %v6226_v37 = vpop.eup %6225 }
0x2e71   :  { %v6228_v16 = vpop.eup %6227  ;;  %v4121_v6 = vrot.slane %v6226_v37, 2  ;;  %4155 = vperm.xlu1 %5948, %v6226_v37  }
0x2e72   :  { %v6230_v21 = vpop.eup %6229  ;;  %v4125_v24 = vrot.slane %v6228_v16, 4 }
0x2e73   :  { %v4123_v22 = vadd.f32 %v6222_v9, %v4121_v6  ;;  %4198 = vperm.xlu0 %5947, %v6224_v13   ;;  %v6232_v25 = vpop.eup %6231  ;;  %v4129_v29 = vrot.slane %v6230_v21, 6 }
0x2e74   :  { %v6234_v60 = vpop.eup %6233  ;;  %v4134_v42 = vrot.slane %v6232_v25, 2 }
0x2e75   :  { %v4127_v27 = vadd.f32 %v4125_v24, %v4123_v22  ;;  %4169 = vperm.xlu1 %5948, %v6228_v16   ;;  %v6236_v12 = vpop.eup %6235  ;;  %v4138_v36 = vrot.slane %v6234_v60, 4 }
0x2e76   :  { %v4142_v0 = vrot.slane %v6236_v12, 6 }
0x2e77   :  { %v4131_v32 = vadd.f32 %v4129_v29, %v4127_v27  ;;  %4220 = vperm.xlu0 %5947, %v6234_v60  }
0x2e79   :  { %v4132_v11 = vadd.f32 %v6224_v13, %v4131_v32  ;;  %4183 = vperm.xlu1 %5948, %v6230_v21  }
0x2e7b   :  { %v4136_v3 = vadd.f32 %v4134_v42, %v4132_v11 }
0x2e7d   :  { %v4140_v40 = vadd.f32 %v4138_v36, %v4136_v3  ;;  %4206 = vperm.xlu1 %5948, %v6232_v25   ;;  %v4363_v36 = vld [vmem:[%s7640_s14 + $0x10] sm:$0xff] }
0x2e7f   :  { %v4144_v45 = vadd.f32 %v4142_v0, %v4140_v40 }
0x2e81   :  { %6237 = vrcp.f32 %v4144_v45  ;;  %4234 = vperm.xlu1 %5948, %v6236_v12  }
0x2e8b   :  { %v6238_v18 = vpop.eup %6237 }
0x2e8c   :  { %4249 = vperm.xlu0 %5947, %v6238_v18  }
0x2e90   :  { %4342 = vperm.xlu0 %5947, %v4338_v34  }
0x2eee   :  { %v4150_v59 = vpop.permute.xlu0 %4149 }
0x2eef   :  { %v4152_v17 = vmul.f32 %v4150_v59, %v7223_v49  ;;  %v4153_v43 = vmul.f32 %v4150_v59, %v7494_v33  ;;  %v4521_v59 = vld [vmem:[%s7641_s22 + $0x10] sm:$0xff] }
0x2ef0   :  { %v4156_v58 = vpop.permute.xlu1 %4155 }
0x2ef1   :  { %v4158_v38 = vmul.f32 %v4156_v58, %v7264_v57  ;;  %v4163_v61 = vmul.f32 %v4156_v58, %v7445_v30  ;;  %v5856_v58 = vpack.c.bf16 %v4520_v41, %v4519_v26 }
0x2ef2   :  { %v4199_v44 = vpop.permute.xlu0 %4198 }
0x2ef3   :  { %v4160_v4 = vrot.slane %v4158_v38, 2  ;;  %v4165_v8 = vrot.slane %v4163_v61, 2  ;;  %v4203_v33 = vmul.f32 %v4199_v44, %v7337_v5  ;;  %v4522_v61 = vld [vmem:[%s7641_s22 + $0x18] sm:$0xff] }
0x2ef4   :  { %v4170_v1 = vpop.permute.xlu1 %4169 }
0x2ef5   :  { %v4172_v2 = vmul.f32 %v4170_v1, %v7302_v23  ;;  %v4177_v52 = vmul.f32 %v4170_v1, %v7413_v35  ;;  %v4162_v13 = vadd.f32 %v4160_v4, %v4152_v17  ;;  %v4167_v37 = vadd.f32 %v4165_v8, %v4153_v43  ;;  %v4601_v1 = vld [vmem:[%s7643_s30] sm:$0xff] }
0x2ef6   :  { %v4221_v22 = vpop.permute.xlu0 %4220  ;;  %v5859_v8 = vpack.c.bf16 %v4522_v61, %v4521_v59  ;;  %v4523_v17 = vld [vmem:[%s7641_s22 + $0x20] sm:$0xff] }
0x2ef7   :  { %v4174_v10 = vrot.slane %v4172_v2, 4  ;;  %v4179_v14 = vrot.slane %v4177_v52, 4  ;;  %v4223_v5 = vmul.f32 %v4221_v22, %v7448_v47  ;;  %v4602_v2 = vld [vmem:[%s7643_s30 + $0x8] sm:$0xff]  ;;  %v4913_v52 = vld [vmem:[#allocation19] ss:$0 sm:$0xff] }
0x2ef8   :  { %v4184_v9 = vpop.permute.xlu1 %4183 }
0x2ef9   :  { %v4186_v57 = vmul.f32 %v4184_v9, %v7341_v63  ;;  %v4191_v30 = vmul.f32 %v4184_v9, %v7375_v51  ;;  %v4176_v16 = vadd.f32 %v4174_v10, %v4162_v13  ;;  %v4181_v23 = vadd.f32 %v4179_v14, %v4167_v37  ;;  %v4524_v10 = vld [vmem:[%s7641_s22 + $0x28] sm:$0xff]  ;;  %v4687_v14 = vld [vmem:[%s6733_s23] sm:$0xff] }
0x2efa   :  { %v4201_v63 = vmul.f32 %v4199_v44, %v7379_v55  ;;  %v4228_v51 = vmul.f32 %v4221_v22, %v7261_v28  ;;  %v4225_v18 = vrot.slane %v4223_v5, 4  ;;  %v5868_v44 = vpack.c.bf16 %v4602_v2, %v4601_v1  ;;  %v4688_v9 = vld [vmem:[%s6733_s23 + $0x8] sm:$0xff]  ;;  %v4701_v5 = vld [vmem:[%s6733_s23 + $0x70] sm:$0xff] }
0x2efb   :  { %v4188_v6 = vrot.slane %v4186_v57, 6  ;;  %v4193_v35 = vrot.slane %v4191_v30, 6  ;;  %v5862_v37 = vpack.c.bf16 %v4524_v10, %v4523_v17  ;;  %v4910_v57 = vld [vmem:[#allocation18] ss:$0 sm:$0xff]  ;;  %v4525_v30 = vld [vmem:[%s7641_s22 + $0x30] sm:$0xff] }
0x2efc   :  { %v4207_v21 = vpop.permute.xlu1 %4206  ;;  %v4230_v0 = vrot.slane %v4228_v51, 4  ;;  %v4334_v22 = vadd.f32 %v4910_v57, %v4333_v50 }
0x2efd   :  { %v4214_v49 = vmul.f32 %v4207_v21, %v7299_v19  ;;  %v4190_v24 = vadd.f32 %v4188_v6, %v4176_v16  ;;  %v4195_v25 = vadd.f32 %v4193_v35, %v4181_v23  ;;  %v4209_v27 = vmul.f32 %v4207_v21, %v7416_v39  ;;  %v4364_v19 = vld [vmem:[%s7640_s14 + $0x18] sm:$0xff]  ;;  %v4689_v35 = vld [vmem:[%s6733_s23 + $0x10] sm:$0xff] }
0x2efe   :  { %v5853_v40 = vpack.c.bf16 %v4364_v19, %v4363_v36  ;;  %v5871_v16 = vpack.c.bf16 %v4688_v9, %v4687_v14  ;;  %v4526_v6 = vld [vmem:[%s7641_s22 + $0x38] sm:$0xff]  ;;  %v4699_v36 = vld [vmem:[%s6733_s23 + $0x60] sm:$0xff]  ;;  %v4700_v19 = vld [vmem:[%s6733_s23 + $0x68] sm:$0xff] }
0x2eff   :  { %v4216_v29 = vrot.slane %v4214_v49, 2  ;;  %v4204_v60 = vadd.f32 %v4203_v33, %v4195_v25  ;;  %v4202_v11 = vadd.f32 %v4201_v63, %v4190_v24  ;;  %v4211_v42 = vrot.slane %v4209_v27, 2  ;;  %v4690_v21 = vld [vmem:[%s6733_s23 + $0x18] sm:$0xff]  ;;  %v4691_v25 = vld [vmem:[%s6733_s23 + $0x20] sm:$0xff]  ;;  %v4692_v27 = vld [vmem:[%s6733_s23 + $0x28] sm:$0xff] }
0x2f00   :  { %v4235_v32 = vpop.permute.xlu1 %4234  ;;  %5854 = vmatpush3.bf16.msra.mxu0 %v5853_v40  ;;  %v5865_v49 = vpack.c.bf16 %v4526_v6, %v4525_v30  ;;  %v5874_v33 = vpack.c.bf16 %v4690_v21, %v4689_v35  ;;  %v4337_v24 = vmax.f32 %v4334_v22, 0.0  ;;  %v4693_v63 = vld [vmem:[%s6733_s23 + $0x30] sm:$0xff]  ;;  %v5889_v40 = vpack.c.bf16 %v4700_v19, %v4699_v36 }
0x2f01   :  { %v4218_v12 = vadd.f32 %v4216_v29, %v4204_v60  ;;  %v4242_v3 = vmul.f32 %v4235_v32, %v7221_v46  ;;  %v4213_v39 = vadd.f32 %v4211_v42, %v4202_v11  ;;  %v4237_v45 = vmul.f32 %v4235_v32, %v7484_v31  ;;  %5867 = vmatprep.subr.bf16.mxu0 %v6587_v62  ;;  %v4695_v60 = vld [vmem:[%s6733_s23 + $0x40] sm:$0xff]  ;;  %v4696_v32 = vld [vmem:[%s6733_s23 + $0x48] sm:$0xff]  ;;  %v4697_v11 = vld [vmem:[%s6733_s23 + $0x50] sm:$0xff] }
0x2f02   :  { %v5877_v29 = vpack.c.bf16 %v4692_v27, %v4691_v25  ;;  %v5883_v42 = vpack.c.bf16 %v4696_v32, %v4695_v60 }
0x2f03   :  { %v4244_v55 = vrot.slane %v4242_v3, 6  ;;  %v4232_v28 = vadd.f32 %v4230_v0, %v4218_v12  ;;  %v4239_v34 = vrot.slane %v4237_v45, 6  ;;  %v4227_v46 = vadd.f32 %v4225_v18, %v4213_v39  ;;  %v4698_v12 = vld [vmem:[%s6733_s23 + $0x58] sm:$0xff] }
0x2f04   :  { %v5886_v3 = vpack.c.bf16 %v4698_v12, %v4697_v11  ;;  %v4702_v0 = vld [vmem:[%s6733_s23 + $0x78] sm:$0xff] }
0x2f05   :  { %v4246_v48 = vadd.f32 %v4244_v55, %v4232_v28  ;;  %v4241_v31 = vadd.f32 %v4239_v34, %v4227_v46  ;;  %v5892_v39 = vpack.c.bf16 %v4702_v0, %v4701_v5 }
0x2f0b   :  { %v4250_v47 = vpop.permute.xlu0 %4249 }
0x2f0c   :  { %v4253_v7 = vmul.f32 %v4250_v47, %v4246_v48  ;;  %v4252_v54 = vmul.f32 %v4250_v47, %v4241_v31 }
0x2f0e   :  { %4370 = vrot.lane.b32.xlu1 %v4253_v7, %s6590_s25  ;;  %v4918_v7 = vld [vmem:[#allocation21] ss:$0 sm:$0xff] }
0x2f0f   :  { %v4343_v15 = vpop.permute.xlu0 %4342 }
0x2f10   :  { %v4351_v38 = vmul.f32 %v4912_v56, %v4343_v15 }
0x2f12   :  { %4445 = vrot.lane.b32.xlu1 %v4252_v54, %s6590_s25  ;;  %v4359_v43 = vadd.f32 %v4913_v52, %v4351_v38 }
0x2f14   :  { %v4360_v23 = vmax.f32 %v4359_v43, 0.0 }
0x2f80   :  { %v4371_v4 = vpop.permute.xlu1 %4370 }
0x2f81   :  { %5541 = vmatmul.mubr.msk.f32.vlgmr.msra.gmra.mrb[36].mxu1 %vm390_vm4, %v4371_v4 }
0x2f82   :  { %5857 = vmatpush3.bf16.msra.mxu1 %v5856_v58  ;;  %5570 = vmatprep.mubr.msk.f32.mxu1 %vm6588_vm5, %v6585_v20 }
0x2f83   :  { %5858 = vmatprep.subr.bf16.mxu1 %v6587_v62 }
0x2f84   :  { %v4446_v13 = vpop.permute.xlu1 %4445 }
0x2f85   :  { %5552 = vmatmul.mubr.msk.f32.vlgmr.msra.gmra.mrb[32].mxu0 %vm390_vm4, %v4446_v13 }
0x2f86   :  { %5860 = vmatpush3.bf16.msra.mxu1 %v5859_v8  ;;  %5869 = vmatpush3.bf16.msra.mxu0 %v5868_v44 }
0x2f87   :  { %5861 = vmatprep.subr.bf16.mxu1 %v6587_v62  ;;  %5577 = vmatprep.mubr.msk.f32.mxu0 %vm6588_vm5, %v6585_v20 }
0x2f88   :  { %5870 = vmatprep.subr.bf16.mxu0 %v6587_v62 }
0x2f89   :  { %5578 = vmatmul.mubr.msk.f32.vlgmr.msra.gmra.mrb[34].mxu0 %vm4603_vm2, %v4360_v23 }
0x2f8a   :  { %5863 = vmatpush3.bf16.msra.mxu1 %v5862_v37  ;;  %5872 = vmatpush3.bf16.msra.mxu0 %v5871_v16 }
0x2f8b   :  { %5864 = vmatprep.subr.bf16.mxu1 %v6587_v62  ;;  %5873 = vmatprep.subr.bf16.mxu0 %v6587_v62 }
0x2f8c   :  { %5612 = vmatprep.mubr.msk.f32.mxu0 %vm6588_vm5, %v6585_v20  ;;  %v4694_v20 = vld [vmem:[%s6733_s23 + $0x38] sm:$0xff]  ;;  %s4788_s23 = sshll.u32 %s6591_s7, 4  ;;  %s4789_s23 = int_to_ptr.vmem [resolvable:$true] %s4788_s23 }
0x2f8d   :  { %v5880_v51 = vpack.c.bf16 %v4694_v20, %v4693_v63  ;;  %s6503_s11 = scalar_lea.vmem %s4789_s23, 32  ;;  %p6508_p13 = scmp.lt.s32.totalorder %s4789_s23, %s4789_s23 }
0x2f8e   :  { %5866 = vmatpush3.bf16.msra.mxu1 %v5865_v49  ;;  %5875 = vmatpush3.bf16.msra.mxu0 %v5874_v33  ;;  %p6504_p12 = scmp.ne.s32.totalorder %s4789_s23, %s6503_s11  ;;  %p6509_p0 = scmp.lt.s32.totalorder %s6503_s11, %s6503_s11 }
0x2f8f   :  { %5876 = vmatprep.subr.bf16.mxu0 %v6587_v62 }
0x2f90   :  { %p6510_p1 = por %p6509_p0, %p6508_p13 }
0x2f91   :  { %5571 = vmatmul.mubr.msk.f32.vlgmr.msra.gmra.mrb[38].mxu1 %vm2179_vm14, %v4337_v24 }
0x2f92   :  { %5878 = vmatpush3.bf16.msra.mxu0 %v5877_v29  ;;  %p6511_p2 = pnand %p6510_p1, %p6504_p12 }
0x2f93   :  { %5879 = vmatprep.subr.bf16.mxu0 %v6587_v62 }
0x2f96   :  { %5881 = vmatpush3.bf16.msra.mxu0 %v5880_v51 }
0x2f97   :  { %5882 = vmatprep.subr.bf16.mxu0 %v6587_v62 }
0x2f9a   :  { %5884 = vmatpush3.bf16.msra.mxu0 %v5883_v42 }
0x2f9b   :  { %5885 = vmatprep.subr.bf16.mxu0 %v6587_v62 }
0x2f9e   :  { %5887 = vmatpush3.bf16.msra.mxu0 %v5886_v3 }
0x2f9f   :  { %5888 = vmatprep.subr.bf16.mxu0 %v6587_v62 }
0x2fa2   :  { %5890 = vmatpush3.bf16.msra.mxu0 %v5889_v40 }
0x2fa3   :  { %5891 = vmatprep.subr.bf16.mxu0 %v6587_v62  ;;  %v4919_v62 = vld [vmem:[#allocation22] ss:$0 sm:$0xff] }
0x2fa6   :  { %5893 = vmatpush3.bf16.msra.mxu0 %v5892_v39 }
0x3054   :  { %v4440_v45 = vpop.f32.mrb[36].mxu1 }
0x3055   :  { %v5542_v55 = vpop.f32.mrb[37].mxu1 }
0x3058   :  { %v4515_v28 = vpop.f32.mrb[32].mxu0 }
0x3059   :  { %v4516_v18 = vadd.f32 %v4515_v28, %v4440_v45  ;;  %v5553_v34 = vpop.f32.mrb[33].mxu0 }
0x305c   :  { %v4673_v46 = vpop.f32.mrb[34].mxu0 }
0x305d   :  { %v5579_v48 = vpop.f32.mrb[35].mxu0 }
0x3064   :  { %v4596_v50 = vpop.f32.mrb[38].mxu1 }
0x3065   :  { %v4600_v47 = vadd.f32 %v4596_v50, %v4516_v18  ;;  %v5572_v53 = vpop.f32.mrb[39].mxu1 }
0x3067   :  { %v4677_v31 = vadd.f32 %v4673_v46, %v4600_v47 }
0x3069   :  { %v4685_v54 = vadd.f32 %v4918_v7, %v4677_v31 }
0x306b   :  { %v4686_v26 = vmax.f32 %v4685_v54, 0.0 }
0x306d   :  { %5613 = vmatmul.mubr.f32.vlgmr.msra.gmra.mrb[36].mxu0 %v4686_v26 }
0x3140   :  { %v4776_v41 = vpop.f32.mrb[36].mxu0 }
0x3141   :  { %v4777_v56 = vadd.f32 %v4919_v62, %v4776_v41  ;;  %v5614_v15 = vpop.f32.mrb[37].mxu0 }
0x3143   :  { %4781 = vst.msk [vmem:[#allocation24] sm:$0x3] %vm4780_vm3, %v4777_v56 }
0x3144   :  { %6514 = shalt.err (!%p6511_p2)
}
0x3145   :  { %s6515_s4 = scalar_lea.hbm %s6743_s24, 32 }
0x3146   :  { %p6516_p3 = scmp.ne.s32.totalorder %s6743_s24, %s6515_s4  ;;  %p6519_p4 = scmp.lt.u32.totalorder %s6515_s4, %s6743_s24 }
0x3148   :  { %p6521_p5 = pnand %p6519_p4, %p6516_p3 }
0x314a   :  { %6524 = shalt.err (!%p6521_p5)
}
0x314b   :  { %4791 = dma.vmem_to_hbm [thread:$0]  %s4789_s23, 32, %s6743_s24, [#allocation6]  }
0x314c   :  { %6539 = dma.done.wait [#allocation6], 32  }
0x314d   :  { %6540 = vsyncadd [#allocation6], 4294967264 }
0x314e   :  { %4795 = vsyncpa [#allocation5], 1 }
0x314f   :  { %4796 = vsyncpa [#allocation8], 1 }
0x3150   :  { %4797 = vsyncpa [#allocation11], 1 }
0x3151   :  { %4798 = vsyncpa [#allocation14], 1 }
0x3152   :  { %4799 = vsyncpa [#allocation17], 1 }
0x3153   :  { %4800 = vsyncpa [#allocation20], 1 }
0x3154   :  { %4801 = vsyncpa [#allocation23], 1 }
0x3155   :  { %4802 = vsyncpa [#allocation6], 1 }

</bundles_post_ra>
